<compile_context>
chip_gen: v7x
topology: tpu7x:2x2x1
jax: 0.10.0
libtpu: 0.0.40
codegen_flags: <defaults>
</compile_context>

<pallas_src>
import jax
import jax.numpy as jnp
from jax.experimental import pallas as pl
from jax.experimental.pallas import tpu as pltpu

EPS = 1e-5          # BatchNorm eps
VOCAB = 27
N_EMBD = 30
N_HIDDEN = 512
B = 8
T = 8               # three FlattenConsecutive(2) stages -> T must be 8
V_PAD = 32          # padded one-hot columns / folded-embedding rows
OUT_PAD = 128       # lane-dense padded output head width


def fused_forward_kernel(onehot_ref,
                         e1a_ref, e1b_ref, g1_ref, be1_ref,
                         w2a_hbm, w2b_hbm, g2_ref, be2_ref,
                         w3a_hbm, w3b_hbm, g3_ref, be3_ref,
                         w4_ref, b4_ref,
                         o_ref,
                         w2a_v, w2b_v, w3a_v, w3b_v, sem):
    # Kick off the big layer-2/3 weight DMAs immediately so they overlap with
    # the one-hot matmul / layer-1 BN+tanh work.
    cp_w2a = pltpu.make_async_copy(w2a_hbm, w2a_v, sem.at[0]); cp_w2a.start()
    cp_w2b = pltpu.make_async_copy(w2b_hbm, w2b_v, sem.at[1]); cp_w2b.start()
    cp_w3a = pltpu.make_async_copy(w3a_hbm, w3a_v, sem.at[2]); cp_w3a.start()
    cp_w3b = pltpu.make_async_copy(w3b_hbm, w3b_v, sem.at[3]); cp_w3b.start()

    def bn_tanh(h, gamma, beta):
        # Custom BatchNorm1d (training): mean/var over all rows per feature,
        # unbiased variance (torch.var default, divide by N-1).
        n = h.shape[0]
        mean = jnp.sum(h, axis=0, keepdims=True) * (1.0 / n)
        diff = h - mean
        var = jnp.sum(diff * diff, axis=0, keepdims=True) * (1.0 / (n - 1))
        scale = gamma * jax.lax.rsqrt(var + EPS)   # fold gamma into the scale
        return jnp.tanh(diff * scale + beta)

    def pair_dot(x, wa, wb):
        # FlattenConsecutive(2) + Linear(no bias):
        #   concat(x_even, x_odd) @ W  ==  x_even @ W[:C] + x_odd @ W[C:]
        # Rows were pre-permuted so even/odd are the contiguous halves.
        half = x.shape[0] // 2
        xa = x[:half].astype(jnp.bfloat16)
        xb = x[half:].astype(jnp.bfloat16)
        return (jnp.dot(xa, wa, preferred_element_type=jnp.float32)
                + jnp.dot(xb, wb, preferred_element_type=jnp.float32))

    # Layer 1: one-hot rows hit the folded (emb @ W1) tables -> (32, 512).
    h1 = bn_tanh(pair_dot(onehot_ref[...], e1a_ref[...], e1b_ref[...]),
                 g1_ref[...], be1_ref[...])

    # Layer 2 -> (16, 512)
    cp_w2a.wait(); cp_w2b.wait()
    h2 = bn_tanh(pair_dot(h1, w2a_v[...], w2b_v[...]), g2_ref[...], be2_ref[...])

    # Layer 3 -> (8, 512), rows already in batch order
    cp_w3a.wait(); cp_w3b.wait()
    h3 = bn_tanh(pair_dot(h2, w3a_v[...], w3b_v[...]), g3_ref[...], be3_ref[...])

    # Output head: lane-dense (8, 128) store; wrapper slices back to 27 cols.
    o_ref[...] = (jnp.dot(h3.astype(jnp.bfloat16), w4_ref[...],
                          preferred_element_type=jnp.float32) + b4_ref[...])
    # TODO(synk): running_mean/running_var buffer updates (training-time side
    # effects of BatchNorm1d) are not emitted; add extra outputs if buffer
    # parity is needed.


def init_raw_params(key):
    """Torch-layout parameters (same init distributions as the PyTorch module)."""
    k_emb, k1, k2, k3, k4 = jax.random.split(key, 5)
    raw = {
        "emb": jax.random.normal(k_emb, (VOCAB, N_EMBD), jnp.float32),          # nn.Embedding ~ N(0,1)
        "w1": jax.random.normal(k1, (2 * N_EMBD, N_HIDDEN), jnp.float32) / (2 * N_EMBD) ** 0.5,
        "w2": jax.random.normal(k2, (2 * N_HIDDEN, N_HIDDEN), jnp.float32) / (2 * N_HIDDEN) ** 0.5,
        "w3": jax.random.normal(k3, (2 * N_HIDDEN, N_HIDDEN), jnp.float32) / (2 * N_HIDDEN) ** 0.5,
        "w4": jax.random.normal(k4, (N_HIDDEN, VOCAB), jnp.float32) / N_HIDDEN ** 0.5,
        "b4": jnp.zeros((VOCAB,), jnp.float32),
    }
    for i in (1, 2, 3):
        raw[f"g{i}"] = jnp.ones((N_HIDDEN,), jnp.float32)
        raw[f"be{i}"] = jnp.zeros((N_HIDDEN,), jnp.float32)
    return raw


def pack_params(raw):
    """One-time repack: fold emb into layer 1, split/pad weights, bf16 storage."""
    P = jax.lax.Precision.HIGHEST
    bf16 = jnp.bfloat16
    p = {}
    emb_pad = jnp.zeros((V_PAD, N_EMBD), jnp.float32).at[:VOCAB].set(raw["emb"])
    w1 = raw["w1"]                                                   # (60, 512)
    # Folded embedding->layer-1 tables (computed in f32, stored bf16).
    p["e1a"] = jnp.dot(emb_pad, w1[:N_EMBD], precision=P).astype(bf16)   # (32, 512)
    p["e1b"] = jnp.dot(emb_pad, w1[N_EMBD:], precision=P).astype(bf16)   # (32, 512)
    p["w2a"] = raw["w2"][:N_HIDDEN].astype(bf16)
    p["w2b"] = raw["w2"][N_HIDDEN:].astype(bf16)
    p["w3a"] = raw["w3"][:N_HIDDEN].astype(bf16)
    p["w3b"] = raw["w3"][N_HIDDEN:].astype(bf16)
    p["w4"] = jnp.zeros((N_HIDDEN, OUT_PAD), bf16).at[:, :VOCAB].set(raw["w4"].astype(bf16))
    p["b4"] = jnp.zeros((1, OUT_PAD), jnp.float32).at[0, :VOCAB].set(raw["b4"])
    for i in (1, 2, 3):
        p[f"g{i}"] = raw[f"g{i}"].reshape(1, -1).astype(jnp.float32)
        p[f"be{i}"] = raw[f"be{i}"].reshape(1, -1).astype(jnp.float32)
    return p


@jax.jit
def custom_model_forward(params, ix):
    Bx, Tx = ix.shape  # (8, 8)
    # Reorder rows so every FlattenConsecutive(2) pairing is a contiguous
    # first-half / second-half split inside the kernel:
    #   t = 4*t2 + 2*t1 + t0  ->  row = t0*4B + t1*2B + t2*B + b
    ix_perm = jnp.transpose(ix.reshape(Bx, 2, 2, 2), (3, 2, 1, 0)).reshape(-1)
    onehot = (ix_perm[:, None] ==
              jnp.arange(V_PAD, dtype=ix_perm.dtype)[None, :]).astype(jnp.bfloat16)  # (64, 32)

    vmem = pl.BlockSpec(memory_space=pltpu.MemorySpace.VMEM)
    hbm = pl.BlockSpec(memory_space=pl.ANY)     # manual DMA inside the kernel

    out = pl.pallas_call(
        fused_forward_kernel,
        out_shape=jax.ShapeDtypeStruct((Bx, OUT_PAD), jnp.float32),
        in_specs=[vmem,                       # onehot
                  vmem, vmem, vmem, vmem,     # e1a, e1b, g1, be1
                  hbm, hbm, vmem, vmem,       # w2a, w2b, g2, be2
                  hbm, hbm, vmem, vmem,       # w3a, w3b, g3, be3
                  vmem, vmem],                # w4, b4
        out_specs=vmem,
        scratch_shapes=[pltpu.VMEM((N_HIDDEN, N_HIDDEN), jnp.bfloat16),
                        pltpu.VMEM((N_HIDDEN, N_HIDDEN), jnp.bfloat16),
                        pltpu.VMEM((N_HIDDEN, N_HIDDEN), jnp.bfloat16),
                        pltpu.VMEM((N_HIDDEN, N_HIDDEN), jnp.bfloat16),
                        pltpu.SemaphoreType.DMA((4,))],
    )(onehot,
      params["e1a"], params["e1b"], params["g1"], params["be1"],
      params["w2a"], params["w2b"], params["g2"], params["be2"],
      params["w3a"], params["w3b"], params["g3"], params["be3"],
      params["w4"], params["b4"])
    return out[:, :VOCAB]


def reference_forward(raw, ix, *, bf16_weights=False):
    """Pure-JAX mirror of the PyTorch module (training-mode BN, unbiased var)."""
    P = jax.lax.Precision.HIGHEST
    q = ((lambda w: w.astype(jnp.bfloat16).astype(jnp.float32)) if bf16_weights
         else (lambda w: w))

    def bn_tanh(h, g, b):
        mean = jnp.mean(h, axis=0, keepdims=True)
        d = h - mean
        var = jnp.sum(d * d, axis=0, keepdims=True) / (h.shape[0] - 1)   # torch.var default
        return jnp.tanh(g * d / jnp.sqrt(var + EPS) + b)

    Bx = ix.shape[0]
    emb = q(raw["emb"])[ix]                                              # (B, 8, 30)
    x = emb.reshape(Bx * 4, 2 * N_EMBD)
    h = bn_tanh(jnp.dot(x, q(raw["w1"]), precision=P), raw["g1"], raw["be1"])
    x = h.reshape(Bx * 2, 2 * N_HIDDEN)
    h = bn_tanh(jnp.dot(x, q(raw["w2"]), precision=P), raw["g2"], raw["be2"])
    x = h.reshape(Bx, 2 * N_HIDDEN)
    h = bn_tanh(jnp.dot(x, q(raw["w3"]), precision=P), raw["g3"], raw["be3"])
    return jnp.dot(h, q(raw["w4"]), precision=P) + raw["b4"]


if __name__ == "__main__":
    key = jax.random.PRNGKey(0)
    k_params, k_input = jax.random.split(key)
    raw = init_raw_params(k_params)
    params = pack_params(raw)
    ix = jax.random.randint(k_input, (B, T), 0, VOCAB, dtype=jnp.int32)

    logits = custom_model_forward(params, ix)
    jax.block_until_ready(logits)
    assert logits.shape == (B, VOCAB)

    # Primary check: same bf16-quantized weights as the kernel (kernel-logic parity).
    ref_q = reference_forward(raw, ix, bf16_weights=True)
    err_q = float(jnp.max(jnp.abs(logits - ref_q)))
    assert jnp.allclose(logits, ref_q, rtol=3e-2, atol=3e-2), f"max abs err vs bf16-weight ref {err_q}"

    # Sanity check against the full-f32 module (bounds total bf16-storage error).
    ref_f = reference_forward(raw, ix, bf16_weights=False)
    err_f = float(jnp.max(jnp.abs(logits - ref_f)))
    assert err_f < 0.15, f"max abs err vs f32 ref {err_f}"

    print("KERNEL_OK")
</pallas_src>

<mosaic_0001>
module attributes {stable_mosaic.version = 11 : i64} {
  func.func @fused_forward_kernel(%arg0: memref<64x32xbf16, #tpu.memory_space<vmem>>, %arg1: memref<32x512xbf16, #tpu.memory_space<vmem>>, %arg2: memref<32x512xbf16, #tpu.memory_space<vmem>>, %arg3: memref<1x512xf32, #tpu.memory_space<vmem>>, %arg4: memref<1x512xf32, #tpu.memory_space<vmem>>, %arg5: memref<512x512xbf16, #tpu.memory_space<any>>, %arg6: memref<512x512xbf16, #tpu.memory_space<any>>, %arg7: memref<1x512xf32, #tpu.memory_space<vmem>>, %arg8: memref<1x512xf32, #tpu.memory_space<vmem>>, %arg9: memref<512x512xbf16, #tpu.memory_space<any>>, %arg10: memref<512x512xbf16, #tpu.memory_space<any>>, %arg11: memref<1x512xf32, #tpu.memory_space<vmem>>, %arg12: memref<1x512xf32, #tpu.memory_space<vmem>>, %arg13: memref<512x128xbf16, #tpu.memory_space<vmem>>, %arg14: memref<1x128xf32, #tpu.memory_space<vmem>>, %arg15: memref<8x128xf32, #tpu.memory_space<vmem>>, %arg16: memref<512x512xbf16, #tpu.memory_space<vmem>>, %arg17: memref<512x512xbf16, #tpu.memory_space<vmem>>, %arg18: memref<512x512xbf16, #tpu.memory_space<vmem>>, %arg19: memref<512x512xbf16, #tpu.memory_space<vmem>>, %arg20: memref<4x!tpu.dma_semaphore, #tpu.memory_space<semaphore_mem>>) attributes {dimension_semantics = [], scalar_prefetch = 0 : i64, scratch_operands = 5 : i64, tpu.core_type = #tpu.core_type<tc>} {
    %c0_i32 = arith.constant 0 : i32
    %0 = tpu.memref_slice %arg20[%c0_i32] : memref<4x!tpu.dma_semaphore, #tpu.memory_space<semaphore_mem>> -> memref<1x!tpu.dma_semaphore, #tpu.memory_space<semaphore_mem>>
    %1 = tpu.memref_squeeze %0 : memref<1x!tpu.dma_semaphore, #tpu.memory_space<semaphore_mem>> -> memref<!tpu.dma_semaphore, #tpu.memory_space<semaphore_mem>>
    tpu.enqueue_dma source(%arg5 : memref<512x512xbf16, #tpu.memory_space<any>>) target(%arg16 : memref<512x512xbf16, #tpu.memory_space<vmem>>) target_semaphore(%1 : memref<!tpu.dma_semaphore, #tpu.memory_space<semaphore_mem>>)
    %c1_i32 = arith.constant 1 : i32
    %2 = tpu.memref_slice %arg20[%c1_i32] : memref<4x!tpu.dma_semaphore, #tpu.memory_space<semaphore_mem>> -> memref<1x!tpu.dma_semaphore, #tpu.memory_space<semaphore_mem>>
    %3 = tpu.memref_squeeze %2 : memref<1x!tpu.dma_semaphore, #tpu.memory_space<semaphore_mem>> -> memref<!tpu.dma_semaphore, #tpu.memory_space<semaphore_mem>>
    tpu.enqueue_dma source(%arg6 : memref<512x512xbf16, #tpu.memory_space<any>>) target(%arg17 : memref<512x512xbf16, #tpu.memory_space<vmem>>) target_semaphore(%3 : memref<!tpu.dma_semaphore, #tpu.memory_space<semaphore_mem>>)
    %c2_i32 = arith.constant 2 : i32
    %4 = tpu.memref_slice %arg20[%c2_i32] : memref<4x!tpu.dma_semaphore, #tpu.memory_space<semaphore_mem>> -> memref<1x!tpu.dma_semaphore, #tpu.memory_space<semaphore_mem>>
    %5 = tpu.memref_squeeze %4 : memref<1x!tpu.dma_semaphore, #tpu.memory_space<semaphore_mem>> -> memref<!tpu.dma_semaphore, #tpu.memory_space<semaphore_mem>>
    tpu.enqueue_dma source(%arg9 : memref<512x512xbf16, #tpu.memory_space<any>>) target(%arg18 : memref<512x512xbf16, #tpu.memory_space<vmem>>) target_semaphore(%5 : memref<!tpu.dma_semaphore, #tpu.memory_space<semaphore_mem>>)
    %c3_i32 = arith.constant 3 : i32
    %6 = tpu.memref_slice %arg20[%c3_i32] : memref<4x!tpu.dma_semaphore, #tpu.memory_space<semaphore_mem>> -> memref<1x!tpu.dma_semaphore, #tpu.memory_space<semaphore_mem>>
    %7 = tpu.memref_squeeze %6 : memref<1x!tpu.dma_semaphore, #tpu.memory_space<semaphore_mem>> -> memref<!tpu.dma_semaphore, #tpu.memory_space<semaphore_mem>>
    tpu.enqueue_dma source(%arg10 : memref<512x512xbf16, #tpu.memory_space<any>>) target(%arg19 : memref<512x512xbf16, #tpu.memory_space<vmem>>) target_semaphore(%7 : memref<!tpu.dma_semaphore, #tpu.memory_space<semaphore_mem>>)
    %c0 = arith.constant 0 : index
    %c0_0 = arith.constant 0 : index
    %8 = vector.load %arg0[%c0, %c0_0] : memref<64x32xbf16, #tpu.memory_space<vmem>>, vector<64x32xbf16>
    %c0_1 = arith.constant 0 : index
    %c0_2 = arith.constant 0 : index
    %9 = vector.load %arg1[%c0_1, %c0_2] : memref<32x512xbf16, #tpu.memory_space<vmem>>, vector<32x512xbf16>
    %c0_3 = arith.constant 0 : index
    %c0_4 = arith.constant 0 : index
    %10 = vector.load %arg2[%c0_3, %c0_4] : memref<32x512xbf16, #tpu.memory_space<vmem>>, vector<32x512xbf16>
    %11 = vector.extract_strided_slice %8 {offsets = [0, 0], sizes = [32, 32], strides = [1, 1]} : vector<64x32xbf16> to vector<32x32xbf16>
    %12 = vector.extract_strided_slice %8 {offsets = [32, 0], sizes = [32, 32], strides = [1, 1]} : vector<64x32xbf16> to vector<32x32xbf16>
    %cst = arith.constant dense<0.000000e+00> : vector<32x512xf32>
    %13 = tpu.matmul %11, %9, %cst {dimension_numbers = #tpu.dot_dimension_numbers<[1], [0], [0], [1], [0, 0, 1, 1], [], []>} : vector<32x32xbf16>, vector<32x512xbf16>, vector<32x512xf32> -> vector<32x512xf32>
    %cst_5 = arith.constant dense<0.000000e+00> : vector<32x512xf32>
    %14 = tpu.matmul %12, %10, %cst_5 {dimension_numbers = #tpu.dot_dimension_numbers<[1], [0], [0], [1], [0, 0, 1, 1], [], []>} : vector<32x32xbf16>, vector<32x512xbf16>, vector<32x512xf32> -> vector<32x512xf32>
    %15 = arith.addf %13, %14 : vector<32x512xf32>
    %c0_6 = arith.constant 0 : index
    %c0_7 = arith.constant 0 : index
    %16 = vector.load %arg3[%c0_6, %c0_7] : memref<1x512xf32, #tpu.memory_space<vmem>>, vector<1x512xf32>
    %c0_8 = arith.constant 0 : index
    %c0_9 = arith.constant 0 : index
    %17 = vector.load %arg4[%c0_8, %c0_9] : memref<1x512xf32, #tpu.memory_space<vmem>>, vector<1x512xf32>
    %cst_10 = arith.constant dense<0.000000e+00> : vector<512xf32>
    %18 = vector.multi_reduction <add>, %15, %cst_10 [0] : vector<32x512xf32> to vector<512xf32>
    %19 = vector.shape_cast %18 : vector<512xf32> to vector<1x512xf32>
    %cst_11 = arith.constant 3.125000e-02 : f32
    %20 = vector.broadcast %cst_11 : f32 to vector<1x512xf32>
    %21 = arith.mulf %19, %20 : vector<1x512xf32>
    %22 = vector.broadcast %21 : vector<1x512xf32> to vector<32x512xf32>
    %23 = arith.subf %15, %22 : vector<32x512xf32>
    %24 = arith.mulf %23, %23 : vector<32x512xf32>
    %cst_12 = arith.constant dense<0.000000e+00> : vector<512xf32>
    %25 = vector.multi_reduction <add>, %24, %cst_12 [0] : vector<32x512xf32> to vector<512xf32>
    %26 = vector.shape_cast %25 : vector<512xf32> to vector<1x512xf32>
    %cst_13 = arith.constant 0.0322580636 : f32
    %27 = vector.broadcast %cst_13 : f32 to vector<1x512xf32>
    %28 = arith.mulf %26, %27 : vector<1x512xf32>
    %cst_14 = arith.constant 9.99999974E-6 : f32
    %29 = vector.broadcast %cst_14 : f32 to vector<1x512xf32>
    %30 = arith.addf %28, %29 : vector<1x512xf32>
    %31 = math.rsqrt %30 : vector<1x512xf32>
    %32 = arith.mulf %16, %31 : vector<1x512xf32>
    %33 = vector.broadcast %32 : vector<1x512xf32> to vector<32x512xf32>
    %34 = arith.mulf %23, %33 : vector<32x512xf32>
    %35 = vector.broadcast %17 : vector<1x512xf32> to vector<32x512xf32>
    %36 = arith.addf %34, %35 : vector<32x512xf32>
    %37 = math.tanh %36 : vector<32x512xf32>
    %c0_i32_15 = arith.constant 0 : i32
    %38 = tpu.memref_slice %arg20[%c0_i32_15] : memref<4x!tpu.dma_semaphore, #tpu.memory_space<semaphore_mem>> -> memref<1x!tpu.dma_semaphore, #tpu.memory_space<semaphore_mem>>
    %39 = tpu.memref_squeeze %38 : memref<1x!tpu.dma_semaphore, #tpu.memory_space<semaphore_mem>> -> memref<!tpu.dma_semaphore, #tpu.memory_space<semaphore_mem>>
    tpu.wait_dma2 semaphore(%39 : memref<!tpu.dma_semaphore, #tpu.memory_space<semaphore_mem>>) src(%arg5 : memref<512x512xbf16, #tpu.memory_space<any>>) dst(%arg16 : memref<512x512xbf16, #tpu.memory_space<vmem>>)
    %c1_i32_16 = arith.constant 1 : i32
    %40 = tpu.memref_slice %arg20[%c1_i32_16] : memref<4x!tpu.dma_semaphore, #tpu.memory_space<semaphore_mem>> -> memref<1x!tpu.dma_semaphore, #tpu.memory_space<semaphore_mem>>
    %41 = tpu.memref_squeeze %40 : memref<1x!tpu.dma_semaphore, #tpu.memory_space<semaphore_mem>> -> memref<!tpu.dma_semaphore, #tpu.memory_space<semaphore_mem>>
    tpu.wait_dma2 semaphore(%41 : memref<!tpu.dma_semaphore, #tpu.memory_space<semaphore_mem>>) src(%arg6 : memref<512x512xbf16, #tpu.memory_space<any>>) dst(%arg17 : memref<512x512xbf16, #tpu.memory_space<vmem>>)
    %c0_17 = arith.constant 0 : index
    %c0_18 = arith.constant 0 : index
    %42 = vector.load %arg16[%c0_17, %c0_18] : memref<512x512xbf16, #tpu.memory_space<vmem>>, vector<512x512xbf16>
    %c0_19 = arith.constant 0 : index
    %c0_20 = arith.constant 0 : index
    %43 = vector.load %arg17[%c0_19, %c0_20] : memref<512x512xbf16, #tpu.memory_space<vmem>>, vector<512x512xbf16>
    %44 = vector.extract_strided_slice %37 {offsets = [0, 0], sizes = [16, 512], strides = [1, 1]} : vector<32x512xf32> to vector<16x512xf32>
    %45 = arith.truncf %44 : vector<16x512xf32> to vector<16x512xbf16>
    %46 = vector.extract_strided_slice %37 {offsets = [16, 0], sizes = [16, 512], strides = [1, 1]} : vector<32x512xf32> to vector<16x512xf32>
    %47 = arith.truncf %46 : vector<16x512xf32> to vector<16x512xbf16>
    %cst_21 = arith.constant dense<0.000000e+00> : vector<16x512xf32>
    %48 = tpu.matmul %45, %42, %cst_21 {dimension_numbers = #tpu.dot_dimension_numbers<[1], [0], [0], [1], [0, 0, 1, 1], [], []>} : vector<16x512xbf16>, vector<512x512xbf16>, vector<16x512xf32> -> vector<16x512xf32>
    %cst_22 = arith.constant dense<0.000000e+00> : vector<16x512xf32>
    %49 = tpu.matmul %47, %43, %cst_22 {dimension_numbers = #tpu.dot_dimension_numbers<[1], [0], [0], [1], [0, 0, 1, 1], [], []>} : vector<16x512xbf16>, vector<512x512xbf16>, vector<16x512xf32> -> vector<16x512xf32>
    %50 = arith.addf %48, %49 : vector<16x512xf32>
    %c0_23 = arith.constant 0 : index
    %c0_24 = arith.constant 0 : index
    %51 = vector.load %arg7[%c0_23, %c0_24] : memref<1x512xf32, #tpu.memory_space<vmem>>, vector<1x512xf32>
    %c0_25 = arith.constant 0 : index
    %c0_26 = arith.constant 0 : index
    %52 = vector.load %arg8[%c0_25, %c0_26] : memref<1x512xf32, #tpu.memory_space<vmem>>, vector<1x512xf32>
    %cst_27 = arith.constant dense<0.000000e+00> : vector<512xf32>
    %53 = vector.multi_reduction <add>, %50, %cst_27 [0] : vector<16x512xf32> to vector<512xf32>
    %54 = vector.shape_cast %53 : vector<512xf32> to vector<1x512xf32>
    %cst_28 = arith.constant 6.250000e-02 : f32
    %55 = vector.broadcast %cst_28 : f32 to vector<1x512xf32>
    %56 = arith.mulf %54, %55 : vector<1x512xf32>
    %57 = vector.broadcast %56 : vector<1x512xf32> to vector<16x512xf32>
    %58 = arith.subf %50, %57 : vector<16x512xf32>
    %59 = arith.mulf %58, %58 : vector<16x512xf32>
    %cst_29 = arith.constant dense<0.000000e+00> : vector<512xf32>
    %60 = vector.multi_reduction <add>, %59, %cst_29 [0] : vector<16x512xf32> to vector<512xf32>
    %61 = vector.shape_cast %60 : vector<512xf32> to vector<1x512xf32>
    %cst_30 = arith.constant 0.0666666701 : f32
    %62 = vector.broadcast %cst_30 : f32 to vector<1x512xf32>
    %63 = arith.mulf %61, %62 : vector<1x512xf32>
    %cst_31 = arith.constant 9.99999974E-6 : f32
    %64 = vector.broadcast %cst_31 : f32 to vector<1x512xf32>
    %65 = arith.addf %63, %64 : vector<1x512xf32>
    %66 = math.rsqrt %65 : vector<1x512xf32>
    %67 = arith.mulf %51, %66 : vector<1x512xf32>
    %68 = vector.broadcast %67 : vector<1x512xf32> to vector<16x512xf32>
    %69 = arith.mulf %58, %68 : vector<16x512xf32>
    %70 = vector.broadcast %52 : vector<1x512xf32> to vector<16x512xf32>
    %71 = arith.addf %69, %70 : vector<16x512xf32>
    %72 = math.tanh %71 : vector<16x512xf32>
    %c2_i32_32 = arith.constant 2 : i32
    %73 = tpu.memref_slice %arg20[%c2_i32_32] : memref<4x!tpu.dma_semaphore, #tpu.memory_space<semaphore_mem>> -> memref<1x!tpu.dma_semaphore, #tpu.memory_space<semaphore_mem>>
    %74 = tpu.memref_squeeze %73 : memref<1x!tpu.dma_semaphore, #tpu.memory_space<semaphore_mem>> -> memref<!tpu.dma_semaphore, #tpu.memory_space<semaphore_mem>>
    tpu.wait_dma2 semaphore(%74 : memref<!tpu.dma_semaphore, #tpu.memory_space<semaphore_mem>>) src(%arg9 : memref<512x512xbf16, #tpu.memory_space<any>>) dst(%arg18 : memref<512x512xbf16, #tpu.memory_space<vmem>>)
    %c3_i32_33 = arith.constant 3 : i32
    %75 = tpu.memref_slice %arg20[%c3_i32_33] : memref<4x!tpu.dma_semaphore, #tpu.memory_space<semaphore_mem>> -> memref<1x!tpu.dma_semaphore, #tpu.memory_space<semaphore_mem>>
    %76 = tpu.memref_squeeze %75 : memref<1x!tpu.dma_semaphore, #tpu.memory_space<semaphore_mem>> -> memref<!tpu.dma_semaphore, #tpu.memory_space<semaphore_mem>>
    tpu.wait_dma2 semaphore(%76 : memref<!tpu.dma_semaphore, #tpu.memory_space<semaphore_mem>>) src(%arg10 : memref<512x512xbf16, #tpu.memory_space<any>>) dst(%arg19 : memref<512x512xbf16, #tpu.memory_space<vmem>>)
    %c0_34 = arith.constant 0 : index
    %c0_35 = arith.constant 0 : index
    %77 = vector.load %arg18[%c0_34, %c0_35] : memref<512x512xbf16, #tpu.memory_space<vmem>>, vector<512x512xbf16>
    %c0_36 = arith.constant 0 : index
    %c0_37 = arith.constant 0 : index
    %78 = vector.load %arg19[%c0_36, %c0_37] : memref<512x512xbf16, #tpu.memory_space<vmem>>, vector<512x512xbf16>
    %79 = vector.extract_strided_slice %72 {offsets = [0, 0], sizes = [8, 512], strides = [1, 1]} : vector<16x512xf32> to vector<8x512xf32>
    %80 = arith.truncf %79 : vector<8x512xf32> to vector<8x512xbf16>
    %81 = vector.extract_strided_slice %72 {offsets = [8, 0], sizes = [8, 512], strides = [1, 1]} : vector<16x512xf32> to vector<8x512xf32>
    %82 = arith.truncf %81 : vector<8x512xf32> to vector<8x512xbf16>
    %cst_38 = arith.constant dense<0.000000e+00> : vector<8x512xf32>
    %83 = tpu.matmul %80, %77, %cst_38 {dimension_numbers = #tpu.dot_dimension_numbers<[1], [0], [0], [1], [0, 0, 1, 1], [], []>} : vector<8x512xbf16>, vector<512x512xbf16>, vector<8x512xf32> -> vector<8x512xf32>
    %cst_39 = arith.constant dense<0.000000e+00> : vector<8x512xf32>
    %84 = tpu.matmul %82, %78, %cst_39 {dimension_numbers = #tpu.dot_dimension_numbers<[1], [0], [0], [1], [0, 0, 1, 1], [], []>} : vector<8x512xbf16>, vector<512x512xbf16>, vector<8x512xf32> -> vector<8x512xf32>
    %85 = arith.addf %83, %84 : vector<8x512xf32>
    %c0_40 = arith.constant 0 : index
    %c0_41 = arith.constant 0 : index
    %86 = vector.load %arg11[%c0_40, %c0_41] : memref<1x512xf32, #tpu.memory_space<vmem>>, vector<1x512xf32>
    %c0_42 = arith.constant 0 : index
    %c0_43 = arith.constant 0 : index
    %87 = vector.load %arg12[%c0_42, %c0_43] : memref<1x512xf32, #tpu.memory_space<vmem>>, vector<1x512xf32>
    %cst_44 = arith.constant dense<0.000000e+00> : vector<512xf32>
    %88 = vector.multi_reduction <add>, %85, %cst_44 [0] : vector<8x512xf32> to vector<512xf32>
    %89 = vector.shape_cast %88 : vector<512xf32> to vector<1x512xf32>
    %cst_45 = arith.constant 1.250000e-01 : f32
    %90 = vector.broadcast %cst_45 : f32 to vector<1x512xf32>
    %91 = arith.mulf %89, %90 : vector<1x512xf32>
    %92 = vector.broadcast %91 : vector<1x512xf32> to vector<8x512xf32>
    %93 = arith.subf %85, %92 : vector<8x512xf32>
    %94 = arith.mulf %93, %93 : vector<8x512xf32>
    %cst_46 = arith.constant dense<0.000000e+00> : vector<512xf32>
    %95 = vector.multi_reduction <add>, %94, %cst_46 [0] : vector<8x512xf32> to vector<512xf32>
    %96 = vector.shape_cast %95 : vector<512xf32> to vector<1x512xf32>
    %cst_47 = arith.constant 0.142857149 : f32
    %97 = vector.broadcast %cst_47 : f32 to vector<1x512xf32>
    %98 = arith.mulf %96, %97 : vector<1x512xf32>
    %cst_48 = arith.constant 9.99999974E-6 : f32
    %99 = vector.broadcast %cst_48 : f32 to vector<1x512xf32>
    %100 = arith.addf %98, %99 : vector<1x512xf32>
    %101 = math.rsqrt %100 : vector<1x512xf32>
    %102 = arith.mulf %86, %101 : vector<1x512xf32>
    %103 = vector.broadcast %102 : vector<1x512xf32> to vector<8x512xf32>
    %104 = arith.mulf %93, %103 : vector<8x512xf32>
    %105 = vector.broadcast %87 : vector<1x512xf32> to vector<8x512xf32>
    %106 = arith.addf %104, %105 : vector<8x512xf32>
    %107 = math.tanh %106 : vector<8x512xf32>
    %108 = arith.truncf %107 : vector<8x512xf32> to vector<8x512xbf16>
    %c0_49 = arith.constant 0 : index
    %c0_50 = arith.constant 0 : index
    %109 = vector.load %arg13[%c0_49, %c0_50] : memref<512x128xbf16, #tpu.memory_space<vmem>>, vector<512x128xbf16>
    %cst_51 = arith.constant dense<0.000000e+00> : vector<8x128xf32>
    %110 = tpu.matmul %108, %109, %cst_51 {dimension_numbers = #tpu.dot_dimension_numbers<[1], [0], [0], [1], [0, 0, 1, 1], [], []>} : vector<8x512xbf16>, vector<512x128xbf16>, vector<8x128xf32> -> vector<8x128xf32>
    %c0_52 = arith.constant 0 : index
    %c0_53 = arith.constant 0 : index
    %111 = vector.load %arg14[%c0_52, %c0_53] : memref<1x128xf32, #tpu.memory_space<vmem>>, vector<1x128xf32>
    %112 = vector.broadcast %111 : vector<1x128xf32> to vector<8x128xf32>
    %113 = arith.addf %110, %112 : vector<8x128xf32>
    %c0_54 = arith.constant 0 : index
    %c0_55 = arith.constant 0 : index
    %114 = vector.load %arg15[%c0_54, %c0_55] : memref<8x128xf32, #tpu.memory_space<vmem>>, vector<8x128xf32>
    tpu.vector_store %arg15[%c0_54, %c0_55], %113 {strides = array<i32>} : memref<8x128xf32, #tpu.memory_space<vmem>>, vector<8x128xf32>,
    return
  }
}

</mosaic_0001>

<bundles_post_ra>
// kernel: eq.8
= control target key start
LH: loop header
LB: loop body
LE: loop exit
PB: predicated region body
PF: predicated region fallthrough
CT: control target
= control target key end

     0   :  { %vm21_vm0 = vcmask 64512   ;;  %s84_s14 = smov 40   ;;  %s85_s15 = smov 48   ;;  %vm27_vm1 = vcmask 523712   ;;  %vm33_vm2 = vcmask 458112   ;;  %vm39_vm3 = vcmask 392512   ;;  %s115_s0 = inlined_call_operand.vmem [shape: s32[2,2,2,8], index: 0, kind: input, shape index: {}]   ;;  %s116_s1 = inlined_call_operand.vmem [shape: s32[64], index: 1, kind: output, shape index: {}]  }
   0x1   :  { %v73_v0 = vld [vmem:[%s115_s0 + $0x6] sm:$0x3]  ;;  %v74_v1 = vld [vmem:[%s115_s0 + $0x4] sm:$0x3]  ;;  %v75_v2 = vld [vmem:[%s115_s0 + $0x2] sm:$0x3] }
   0x2   :  { %8 = vst [vmem:[#allocation1 + $0x18] sm:$0x3] %v73_v0  ;;  %13 = vst [vmem:[#allocation1 + $0x10] sm:$0x3] %v74_v1  ;;  %v18_v3 = vld [vmem:[%s115_s0] sm:$0x3] }
   0x3   :  { %17 = vst [vmem:[#allocation1 + $0x8] sm:$0x3] %v75_v2  ;;  %19 = vst [vmem:[#allocation1] sm:$0x3] %v18_v3  ;;  %s83_s0 = smov 56   ;;  %s86_s16 = smov 32  }
   0x4   :  { %s87_s17 = smov 24   ;;  %s88_s18 = smov 16   ;;  %vm45_vm4 = vcmask 326912   ;;  %vm51_vm5 = vcmask 261312   ;;  %vm57_vm6 = vcmask 195712   ;;  %vm63_vm7 = vcmask 130112  }
   0x5   :  { %s89_s19 = smov 8  }
   0x9   :  { %v24_v4 = vld [vmem:[#allocation1 + $0x19] sm:$0x1]   ;;  %v36_v5 = vld [vmem:[#allocation1 + $0x11] sm:$0x1]   ;;  %v30_v6 = vld [vmem:[#allocation1 + $0x18] sm:$0x1]  }
   0xa   :  { %25 = vrot.lane.b32.xlu0 %v24_v4, %s83_s0  ;;  %37 = vrot.lane.b32.xlu1 %v36_v5, %s84_s14  ;;  %v42_v7 = vld [vmem:[#allocation1 + $0x10] sm:$0x1]   ;;  %v20_v8 = vld [vmem:[#allocation1] sm:$0x1]   ;;  %v48_v9 = vld [vmem:[#allocation1 + $0x9] sm:$0x1]  }
   0xb   :  { %22 = vst.msk [vmem:[#allocation0] sm:$0x1] %vm21_vm0, %v20_v8   ;;  %v54_v10 = vld [vmem:[#allocation1 + $0x8] sm:$0x1]   ;;  %v60_v11 = vld [vmem:[#allocation1 + $0x1] sm:$0x1]  }
   0xe   :  { %31 = vrot.lane.b32.xlu0 %v30_v6, %s85_s15  ;;  %43 = vrot.lane.b32.xlu1 %v42_v7, %s86_s16 }
  0x12   :  { %49 = vrot.lane.b32.xlu0 %v48_v9, %s87_s17  ;;  %55 = vrot.lane.b32.xlu1 %v54_v10, %s88_s18 }
  0x16   :  { %61 = vrot.lane.b32.xlu0 %v60_v11, %s89_s19 }
  0x7c   :  { %v26_v12 = vpop.permute.xlu0 %25   ;;  %v38_v13 = vpop.permute.xlu1 %37  }
  0x7d   :  { %28 = vst.msk [vmem:[#allocation0] sm:$0x1] %vm27_vm1, %v26_v12  }
  0x80   :  { %v32_v14 = vpop.permute.xlu0 %31   ;;  %v44_v15 = vpop.permute.xlu1 %43  }
  0x81   :  { %34 = vst.msk [vmem:[#allocation0] sm:$0x1] %vm33_vm2, %v32_v14  }
  0x82   :  { %40 = vst.msk [vmem:[#allocation0] sm:$0x1] %vm39_vm3, %v38_v13  }
  0x83   :  { %46 = vst.msk [vmem:[#allocation0] sm:$0x1] %vm45_vm4, %v44_v15  }
  0x84   :  { %v50_v16 = vpop.permute.xlu0 %49   ;;  %v56_v17 = vpop.permute.xlu1 %55  }
  0x85   :  { %52 = vst.msk [vmem:[#allocation0] sm:$0x1] %vm51_vm5, %v50_v16  }
  0x86   :  { %58 = vst.msk [vmem:[#allocation0] sm:$0x1] %vm57_vm6, %v56_v17  }
  0x88   :  { %v62_v18 = vpop.permute.xlu0 %61  }
  0x89   :  { %64 = vst.msk [vmem:[#allocation0] sm:$0x1] %vm63_vm7, %v62_v18  }
  0x90   :  { %v68_v19 = vld [vmem:[#allocation0] sm:$0x1] }
  0x91   :  { %70 = vst [vmem:[%s116_s1] sm:$0x1] %v68_v19 }

// kernel: custom_model_forward.1
= control target key start
LH: loop header
LB: loop body
LE: loop exit
PB: predicated region body
PF: predicated region fallthrough
CT: control target
= control target key end

     0   :  { %20 = vsyncpa [#allocation8], 0  ;;  %s3757_s0 = inlined_call_operand.vmem [shape: bf16[64,32], index: 0, kind: input, shape index: {}]   ;;  %s3758_s1 = inlined_call_operand.vmem [shape: bf16[32,512], index: 1, kind: input, shape index: {}]   ;;  %s3759_s2 = inlined_call_operand.hbm [shape: bf16[32,512], index: 2, kind: input, shape index: {}]   ;;  %s3760_s3 = inlined_call_operand.vmem [shape: f32[1,512], index: 3, kind: input, shape index: {}]   ;;  %s3761_s4 = inlined_call_operand.vmem [shape: f32[1,512], index: 4, kind: input, shape index: {}]   ;;  %s3762_s5 = inlined_call_operand.hbm [shape: bf16[512,512], index: 5, kind: input, shape index: {}]   ;;  %s3763_s6 = inlined_call_operand.hbm [shape: bf16[512,512], index: 6, kind: input, shape index: {}]   ;;  %s3764_s7 = inlined_call_operand.vmem [shape: f32[1,512], index: 7, kind: input, shape index: {}]   ;;  %s3765_s8 = inlined_call_operand.vmem [shape: f32[1,512], index: 8, kind: input, shape index: {}]   ;;  %s3766_s9 = inlined_call_operand.hbm [shape: bf16[512,512], index: 9, kind: input, shape index: {}]   ;;  %s3767_s10 = inlined_call_operand.hbm [shape: bf16[512,512], index: 10, kind: input, shape index: {}]   ;;  %s3768_s11 = inlined_call_operand.vmem [shape: f32[1,512], index: 11, kind: input, shape index: {}]   ;;  %s3769_s12 = inlined_call_operand.vmem [shape: f32[1,512], index: 12, kind: input, shape index: {}]   ;;  %s3770_s13 = inlined_call_operand.hbm [shape: bf16[512,128], index: 13, kind: input, shape index: {}]   ;;  %s3771_s14 = inlined_call_operand.hbm [shape: f32[1,128], index: 14, kind: input, shape index: {}]   ;;  %s3772_s15 = inlined_call_operand.hbm [shape: f32[8,128], index: 15, kind: output, shape index: {}]  }
   0x1   :  { %21 = vsyncpa [#allocation11], 0 }
   0x2   :  { %22 = vsyncpa [#allocation9], 0  ;;  %s3207_s18 = smov [#allocation10]   ;;  %s3105_s22 = scalar_lea.hbm %s3770_s13, 4096 }
   0x3   :  { %s56_s19 = sshll.u32 %s3207_s18, 4  ;;  %p3106_p0 = scmp.ne.s32.totalorder %s3770_s13, %s3105_s22  ;;  %s57_s19 = int_to_ptr.vmem [resolvable:$true] %s56_s19 }
   0x4   :  { %p3109_p1 = scmp.lt.u32.totalorder %s3105_s22, %s3770_s13 }
   0x6   :  { %p3111_p2 = pnand %p3109_p1, %p3106_p0 }
   0x8   :  { %3114 = shalt.err (!%p3111_p2)
}
   0x9   :  { %s3115_s27 = scalar_lea.vmem %s57_s19, 4096  ;;  %p3120_p4 = scmp.lt.s32.totalorder %s57_s19, %s57_s19 }
   0xa   :  { %p3116_p3 = scmp.ne.s32.totalorder %s57_s19, %s3115_s27  ;;  %p3121_p5 = scmp.lt.s32.totalorder %s3115_s27, %s3115_s27 }
   0xc   :  { %p3122_p6 = por %p3121_p5, %p3120_p4 }
   0xe   :  { %p3123_p7 = pnand %p3122_p6, %p3116_p3 }
  0x10   :  { %3126 = shalt.err (!%p3123_p7)
}
  0x11   :  { %s3773_s28 = smov 64   ;;  %s3209_s29 = smov 4  }
  0x12   :  { %62 = dma.hbm_to_vmem [thread:$0]  %s3770_s13, 4096, %s57_s19, [#allocation11], %s3773_s28, %s3773_s28, %s3209_s29  }
  0x13   :  { %s3210_s17 = smov [#allocation7]   ;;  %s3127_s22 = scalar_lea.hbm %s3759_s2, 1024 }
  0x14   :  { %s32_s18 = sshll.u32 %s3210_s17, 4  ;;  %p3128_p8 = scmp.ne.s32.totalorder %s3759_s2, %s3127_s22  ;;  %s33_s18 = int_to_ptr.vmem [resolvable:$true] %s32_s18 }
  0x15   :  { %p3131_p9 = scmp.lt.u32.totalorder %s3127_s22, %s3759_s2 }
  0x17   :  { %p3133_p10 = pnand %p3131_p9, %p3128_p8 }
  0x19   :  { %3136 = shalt.err (!%p3133_p10)
}
  0x1a   :  { %s3137_s27 = scalar_lea.vmem %s33_s18, 1024  ;;  %p3142_p12 = scmp.lt.s32.totalorder %s33_s18, %s33_s18 }
  0x1b   :  { %p3138_p11 = scmp.ne.s32.totalorder %s33_s18, %s3137_s27  ;;  %p3143_p13 = scmp.lt.s32.totalorder %s3137_s27, %s3137_s27 }
  0x1d   :  { %p3144_p0 = por %p3143_p13, %p3142_p12 }
  0x1f   :  { %p3145_p1 = pnand %p3144_p0, %p3138_p11 }
  0x21   :  { %3148 = shalt.err (!%p3145_p1)
}
  0x22   :  { %s3211_s13 = smov 256   ;;  %s3212_s19 = smov 16  }
  0x23   :  { %38 = dma.hbm_to_vmem [thread:$0]  %s3759_s2, 1024, %s33_s18, [#allocation8], %s3211_s13, %s3211_s13, %s3212_s19  }
  0x24   :  { %s3213_s17 = smov [#allocation12]   ;;  %s3149_s23 = scalar_lea.hbm %s3771_s14, 16 }
  0x25   :  { %s69_s20 = sshll.u32 %s3213_s17, 4  ;;  %p3150_p2 = scmp.ne.s32.totalorder %s3771_s14, %s3149_s23  ;;  %s70_s20 = int_to_ptr.vmem [resolvable:$true] %s69_s20 }
  0x26   :  { %p3153_p3 = scmp.lt.u32.totalorder %s3149_s23, %s3771_s14 }
  0x28   :  { %p3155_p4 = pnand %p3153_p3, %p3150_p2 }
  0x2a   :  { %3158 = shalt.err (!%p3155_p4)
}
  0x2b   :  { %s3159_s28 = scalar_lea.vmem %s70_s20, 16  ;;  %s3163_s2 = scalar_lea.vmem %s70_s20, 32 }
  0x2c   :  { %p3160_p5 = scmp.ne.s32.totalorder %s70_s20, %s3159_s28  ;;  %p3164_p6 = scmp.lt.s32.totalorder %s70_s20, %s70_s20 }
  0x2d   :  { %p3165_p7 = scmp.lt.s32.totalorder %s3163_s2, %s3159_s28 }
  0x2f   :  { %p3166_p8 = por %p3165_p7, %p3164_p6 }
  0x31   :  { %p3167_p9 = pnand %p3166_p8, %p3160_p5 }
  0x33   :  { %3170 = shalt.err (!%p3167_p9)
}
  0x34   :  { %72 = dma.hbm_to_vmem [thread:$0]  %s3771_s14, 16, %s70_s20, [#allocation11]  }
  0x35   :  { %3193 = dma.done.wait [#allocation8], 1024  }
  0x36   :  { %3194 = vsyncadd [#allocation8], 4294966272 }
  0x37   :  { %3195 = dma.done.wait [#allocation11], 4112  }
  0x38   :  { %3196 = vsyncadd [#allocation11], 4294963184  ;;  %s87_s30 = sld [smem:[#allocation0]]   ;;  %s3214_s16 = smov 512   ;;  %v3215_v0 = vmov 0   ;;  %vm297_vm0 = vcmask 261120  }
  0x39   :  { %99 = sst [smem:[#allocation15]] %s3214_s16  ;;  %336 = vmatprep.mubr.bf16.mxu0 %v3215_v0  ;;  %389 = vmatprep.mubr.bf16.mxu1 %v3215_v0  ;;  %s3216_s28 = smov [#allocation2]  }
  0x3a   :  { %101 = sst [smem:[#allocation15 + $0x1]] %s3214_s16  ;;  %s95_s17 = sshll.u32 %s3216_s28, 4  ;;  %s96_s17 = int_to_ptr.vmem [resolvable:$true] %s95_s17 }
  0x3b   :  { %103 = sst [smem:[#allocation15 + $0x2]] %s3209_s29  ;;  %s3775_s14 = smov 64  }
  0x3c   :  { %105 = sst [smem:[#allocation15 + $0x3]] %s3775_s14  ;;  %s3217_s22 = smov 128  }
  0x3d   :  { %111 = sst [smem:[#allocation15 + $0x6]] %s3211_s13  ;;  %s3218_s23 = smov 2  }
  0x3e   :  { %113 = sst [smem:[#allocation15 + $0x7]] %s3775_s14  ;;  %s2759_s20 = sshll.u32 %s87_s30, 26 }
  0x3f   :  { %115 = sst [smem:[#allocation15 + $0x8]] %s3209_s29  ;;  %s3362_s21 = sadd.s32 134217728, %s2759_s20 }
  0x40   :  { %107 = sst [smem:[#allocation15 + $0x4]] %s3217_s22  ;;  %s3219_s24 = smov [#allocation6]  }
  0x41   :  { %109 = sst [smem:[#allocation15 + $0x5]] %s3218_s23  ;;  %s3220_s25 = smov [#allocation14]  }
  0x42   :  { %117 = dma.general %s3762_s5, 16384, %s96_s17, %s3219_s24, %s3220_s25, [#allocation15], %s3362_s21, 0  }
  0x43   :  { %134 = sst [smem:[#allocation17]] %s3214_s16  ;;  %s3221_s2 = smov [#allocation3]  }
  0x44   :  { %136 = sst [smem:[#allocation17 + $0x1]] %s3214_s16  ;;  %s130_s18 = sshll.u32 %s3221_s2, 4  ;;  %s131_s18 = int_to_ptr.vmem [resolvable:$true] %s130_s18 }
  0x45   :  { %138 = sst [smem:[#allocation17 + $0x2]] %s3209_s29  ;;  %s3222_s5 = smov [#allocation6 + $0x1]  }
  0x46   :  { %140 = sst [smem:[#allocation17 + $0x3]] %s3775_s14  ;;  %s3223_s19 = smov [#allocation16]  }
  0x47   :  { %142 = sst [smem:[#allocation17 + $0x4]] %s3217_s22  ;;  %s3224_s17 = smov [#allocation4]  }
  0x48   :  { %144 = sst [smem:[#allocation17 + $0x5]] %s3218_s23  ;;  %s165_s20 = sshll.u32 %s3224_s17, 4  ;;  %s166_s20 = int_to_ptr.vmem [resolvable:$true] %s165_s20 }
  0x49   :  { %146 = sst [smem:[#allocation17 + $0x6]] %s3211_s13  ;;  %s3226_s24 = smov [#allocation18]  }
  0x4a   :  { %148 = sst [smem:[#allocation17 + $0x7]] %s3775_s14  ;;  %s3227_s27 = smov [#allocation5]  }
  0x4b   :  { %150 = sst [smem:[#allocation17 + $0x8]] %s3209_s29  ;;  %s200_s2 = sshll.u32 %s3227_s27, 4  ;;  %s201_s2 = int_to_ptr.vmem [resolvable:$true] %s200_s2 }
  0x4c   :  { %152 = dma.general %s3763_s6, 16384, %s131_s18, %s3222_s5, %s3223_s19, [#allocation17], %s3362_s21, 0  }
  0x4d   :  { %169 = sst [smem:[#allocation19]] %s3214_s16  ;;  %s3225_s6 = smov [#allocation6 + $0x2]  }
  0x4e   :  { %171 = sst [smem:[#allocation19 + $0x1]] %s3214_s16  ;;  %s3229_s18 = smov [#allocation20]  }
  0x4f   :  { %173 = sst [smem:[#allocation19 + $0x2]] %s3209_s29 }
  0x50   :  { %175 = sst [smem:[#allocation19 + $0x3]] %s3775_s14 }
  0x51   :  { %177 = sst [smem:[#allocation19 + $0x4]] %s3217_s22 }
  0x52   :  { %179 = sst [smem:[#allocation19 + $0x5]] %s3218_s23 }
  0x53   :  { %181 = sst [smem:[#allocation19 + $0x6]] %s3211_s13 }
  0x54   :  { %183 = sst [smem:[#allocation19 + $0x7]] %s3775_s14 }
  0x55   :  { %185 = sst [smem:[#allocation19 + $0x8]] %s3209_s29 }
  0x56   :  { %187 = dma.general %s3766_s9, 16384, %s166_s20, %s3225_s6, %s3226_s24, [#allocation19], %s3362_s21, 0  }
  0x57   :  { %204 = sst [smem:[#allocation21]] %s3214_s16  ;;  %s3228_s9 = smov [#allocation6 + $0x3]  }
  0x58   :  { %206 = sst [smem:[#allocation21 + $0x1]] %s3214_s16 }
  0x59   :  { %208 = sst [smem:[#allocation21 + $0x2]] %s3209_s29 }
  0x5a   :  { %210 = sst [smem:[#allocation21 + $0x3]] %s3775_s14 }
  0x5b   :  { %212 = sst [smem:[#allocation21 + $0x4]] %s3217_s22 }
  0x5c   :  { %214 = sst [smem:[#allocation21 + $0x5]] %s3218_s23 }
  0x5d   :  { %216 = sst [smem:[#allocation21 + $0x6]] %s3211_s13 }
  0x5e   :  { %218 = sst [smem:[#allocation21 + $0x7]] %s3775_s14 }
  0x5f   :  { %220 = sst [smem:[#allocation21 + $0x8]] %s3209_s29 }
  0x60   :  { %222 = dma.general %s3767_s10, 16384, %s201_s2, %s3228_s9, %s3229_s18, [#allocation21], %s3362_s21, 0  }
  0x61   :  { %v2965_v1 = vld [vmem:[#allocation7 + $0x4] ss:$16 sps:$4 sm:$0xff]   ;;  %v2967_v2 = vld [vmem:[#allocation7 + $0xc] ss:$16 sps:$4 sm:$0xff]   ;;  %v2969_v3 = vld [vmem:[#allocation7] ss:$16 sps:$4 sm:$0xff]  }
  0x62   :  { %304 = vmatprep.subr.bf16.mxu0 %v2965_v1  ;;  %v2970_v4 = vld [vmem:[#allocation7 + $0x8] ss:$16 sps:$4 sm:$0xff]   ;;  %357 = vmatprep.subr.bf16.mxu1 %v2967_v2  ;;  %v2971_v5 = vld [vmem:[#allocation7 + $0x24] ss:$16 sps:$4 sm:$0xff]   ;;  %v2973_v6 = vld [vmem:[#allocation7 + $0x2c] ss:$16 sps:$4 sm:$0xff]  }
  0x63   :  { %305 = vmatpush1.bf16.msra.mxu0 %v2969_v3  ;;  %358 = vmatpush1.bf16.msra.mxu1 %v2970_v4  ;;  %v2975_v7 = vld [vmem:[#allocation7 + $0x20] ss:$16 sps:$4 sm:$0xff]   ;;  %v2976_v8 = vld [vmem:[#allocation7 + $0x28] ss:$16 sps:$4 sm:$0xff]   ;;  %v2980_v11 = vld [vmem:[%s3758_s1 + $0x4] ss:$16 sps:$4 sm:$0xff]  }
  0x64   :  { %306 = vmatprep.subr.bf16.mxu0 %v2971_v5  ;;  %359 = vmatprep.subr.bf16.mxu1 %v2973_v6  ;;  %v2977_v9 = vld [vmem:[%s3757_s0 + $0x10] sm:$0xff]   ;;  %v2981_v12 = vld [vmem:[%s3758_s1 + $0x8] ss:$16 sps:$4 sm:$0xff]   ;;  %v2983_v13 = vld [vmem:[%s3758_s1 + $0xc] ss:$16 sps:$4 sm:$0xff]  }
  0x65   :  { %v2978_v10 = vld [vmem:[%s3758_s1] ss:$16 sps:$4 sm:$0xff]   ;;  %v2987_v15 = vld [vmem:[%s3758_s1 + $0x24] ss:$16 sps:$4 sm:$0xff]   ;;  %v2988_v16 = vld [vmem:[%s3758_s1 + $0x28] ss:$16 sps:$4 sm:$0xff]  }
  0x66   :  { %v2985_v14 = vld [vmem:[%s3758_s1 + $0x20] ss:$16 sps:$4 sm:$0xff]   ;;  %v2990_v17 = vld [vmem:[%s3758_s1 + $0x2c] ss:$16 sps:$4 sm:$0xff]  }
  0x67   :  { %307 = vmatpush1.bf16.msra.mxu0 %v2975_v7  ;;  %360 = vmatpush1.bf16.msra.mxu1 %v2976_v8  ;;  %v2984_v18 = vld [vmem:[%s3757_s0 + $0x18] sm:$0xff]   ;;  %v2991_v19 = vld [vmem:[%s3757_s0] sm:$0xff]   ;;  %v2992_v20 = vld [vmem:[%s3757_s0 + $0x8] sm:$0xff]  }
  0x68   :  { %466 = vmatprep.subr.bf16.mxu0 %v2980_v11  ;;  %519 = vmatprep.subr.bf16.mxu1 %v2983_v13 }
  0x6a   :  { %2777 = vmatmul.mubr.msk.bf16.vlgmr.msra.gmra.mrb[0].mxu0 %vm297_vm0, %v2977_v9  ;;  %2779 = vmatmul.mubr.msk.bf16.vlgmr.msra.gmra.mrb[0].mxu1 %vm297_vm0, %v2977_v9 }
  0x6b   :  { %467 = vmatpush1.bf16.msra.mxu0 %v2978_v10  ;;  %520 = vmatpush1.bf16.msra.mxu1 %v2981_v12 }
  0x6c   :  { %346 = vmatprep.mubr.bf16.mxu0 %v3215_v0  ;;  %399 = vmatprep.mubr.bf16.mxu1 %v3215_v0 }
  0x6d   :  { %468 = vmatprep.subr.bf16.mxu0 %v2987_v15  ;;  %521 = vmatprep.subr.bf16.mxu1 %v2990_v17 }
  0x6f   :  { %469 = vmatpush1.bf16.msra.mxu0 %v2985_v14  ;;  %522 = vmatpush1.bf16.msra.mxu1 %v2988_v16 }
  0x72   :  { %2778 = vmatmul.mubr.msk.bf16.gmra.mrb[4].mxu0 %vm297_vm0, %v2984_v18  ;;  %2780 = vmatmul.mubr.msk.bf16.gmra.mrb[4].mxu1 %vm297_vm0, %v2984_v18 }
  0x73   :  { %498 = vmatprep.mubr.bf16.mxu0 %v3215_v0  ;;  %551 = vmatprep.mubr.bf16.mxu1 %v3215_v0 }
  0x7a   :  { %2791 = vmatmul.mubr.msk.bf16.vlgmr.msra.gmra.mrb[0].mxu0 %vm297_vm0, %v2991_v19  ;;  %2793 = vmatmul.mubr.msk.bf16.vlgmr.msra.gmra.mrb[0].mxu1 %vm297_vm0, %v2991_v19 }
  0x7b   :  { %508 = vmatprep.mubr.bf16.mxu0 %v3215_v0  ;;  %561 = vmatprep.mubr.bf16.mxu1 %v3215_v0 }
  0x82   :  { %2792 = vmatmul.mubr.msk.bf16.gmra.mrb[4].mxu0 %vm297_vm0, %v2992_v20  ;;  %2794 = vmatmul.mubr.msk.bf16.gmra.mrb[4].mxu1 %vm297_vm0, %v2992_v20 }
 0x14d   :  { %v500_v21 = vpop.f32.mrb[0].mxu0  ;;  %v553_v22 = vpop.f32.mrb[0].mxu1 }
 0x14e   :  { %v3459_v23 = vpop.f32.mrb[1].mxu0  ;;  %v3461_v24 = vpop.f32.mrb[1].mxu1 }
 0x14f   :  { %v504_v25 = vpop.f32.mrb[2].mxu0  ;;  %v557_v26 = vpop.f32.mrb[2].mxu1 }
 0x150   :  { %v574_v27 = vadd.f32 %v504_v25, %v500_v21  ;;  %v592_v28 = vadd.f32 %v557_v26, %v553_v22  ;;  %v3463_v29 = vpop.f32.mrb[3].mxu0  ;;  %v3465_v30 = vpop.f32.mrb[3].mxu1 }
 0x151   :  { %v583_v31 = vadd.f32 %v3463_v29, %v3459_v23  ;;  %v601_v32 = vadd.f32 %v3465_v30, %v3461_v24 }
 0x155   :  { %v510_v33 = vpop.f32.mrb[4].mxu0  ;;  %v563_v34 = vpop.f32.mrb[4].mxu1 }
 0x156   :  { %v575_v35 = vadd.f32 %v574_v27, %v510_v33  ;;  %v593_v36 = vadd.f32 %v592_v28, %v563_v34  ;;  %v512_v37 = vpop.f32.mrb[5].mxu0  ;;  %v3471_v38 = vpop.f32.mrb[5].mxu1 }
 0x157   :  { %v584_v39 = vadd.f32 %v583_v31, %v512_v37  ;;  %v602_v40 = vadd.f32 %v601_v32, %v3471_v38  ;;  %v514_v41 = vpop.f32.mrb[6].mxu0  ;;  %v567_v42 = vpop.f32.mrb[6].mxu1 }
 0x158   :  { %v576_v43 = vadd.f32 %v575_v35, %v514_v41  ;;  %v594_v44 = vadd.f32 %v593_v36, %v567_v42  ;;  %v516_v45 = vpop.f32.mrb[7].mxu0  ;;  %v569_v46 = vpop.f32.mrb[7].mxu1 }
 0x159   :  { %v585_v47 = vadd.f32 %v584_v39, %v516_v45  ;;  %v603_v48 = vadd.f32 %v602_v40, %v569_v46 }
 0x15a   :  { %v577_v49 = vrot.slane %v576_v43, 4  ;;  %v595_v50 = vrot.slane %v594_v44, 4 }
 0x15b   :  { %v586_v51 = vrot.slane %v585_v47, 4  ;;  %v604_v52 = vrot.slane %v603_v48, 4 }
 0x15c   :  { %v578_v53 = vadd.f32 %v577_v49, %v576_v43  ;;  %v596_v54 = vadd.f32 %v595_v50, %v594_v44 }
 0x15d   :  { %v587_v55 = vadd.f32 %v586_v51, %v585_v47  ;;  %v605_v56 = vadd.f32 %v604_v52, %v603_v48 }
 0x15e   :  { %v579_v57 = vrot.slane %v578_v53, 2  ;;  %v597_v58 = vrot.slane %v596_v54, 2 }
 0x15f   :  { %v588_v59 = vrot.slane %v587_v55, 2  ;;  %v606_v60 = vrot.slane %v605_v56, 2 }
 0x160   :  { %v580_v61 = vadd.f32 %v579_v57, %v578_v53  ;;  %v598_v62 = vadd.f32 %v597_v58, %v596_v54 }
 0x161   :  { %v589_v63 = vadd.f32 %v588_v59, %v587_v55  ;;  %v607_v0 = vadd.f32 %v606_v60, %v605_v56 }
 0x162   :  { %v581_v1 = vrot.slane %v580_v61, 1  ;;  %v599_v2 = vrot.slane %v598_v62, 1 }
 0x163   :  { %v590_v3 = vrot.slane %v589_v63, 1  ;;  %v608_v4 = vrot.slane %v607_v0, 1 }
 0x164   :  { %v582_v5 = vadd.f32 %v581_v1, %v580_v61  ;;  %v600_v6 = vadd.f32 %v599_v2, %v598_v62 }
 0x165   :  { %v591_v7 = vadd.f32 %v590_v3, %v589_v63  ;;  %v609_v8 = vadd.f32 %v608_v4, %v607_v0 }
 0x166   :  { %v610_v9 = vmul.f32 0.03125, %v582_v5  ;;  %v612_v10 = vmul.f32 0.03125, %v600_v6 }
 0x167   :  { %v611_v11 = vmul.f32 0.03125, %v591_v7  ;;  %v613_v12 = vmul.f32 0.03125, %v609_v8 }
 0x168   :  { %v3474_v13 = vsub.f32 %v500_v21, %v610_v9  ;;  %v3476_v14 = vsub.f32 %v504_v25, %v610_v9  ;;  %v3478_v15 = vsub.f32 %v510_v33, %v610_v9  ;;  %v3480_v16 = vsub.f32 %v514_v41, %v610_v9 }
 0x169   :  { %v3482_v17 = vsub.f32 %v553_v22, %v612_v10  ;;  %v3484_v18 = vsub.f32 %v557_v26, %v612_v10  ;;  %v3486_v19 = vsub.f32 %v563_v34, %v612_v10  ;;  %v3488_v20 = vsub.f32 %v567_v42, %v612_v10 }
 0x16a   :  { %v630_v27 = vmul.f32 %v3474_v13, %v3474_v13  ;;  %v634_v21 = vmul.f32 %v3476_v14, %v3476_v14  ;;  %v638_v25 = vmul.f32 %v3478_v15, %v3478_v15  ;;  %v642_v28 = vmul.f32 %v3480_v16, %v3480_v16 }
 0x16b   :  { %v632_v22 = vmul.f32 %v3482_v17, %v3482_v17  ;;  %v636_v26 = vmul.f32 %v3484_v18, %v3484_v18  ;;  %v640_v31 = vmul.f32 %v3486_v19, %v3486_v19  ;;  %v3505_v33 = vsub.f32 %v3459_v23, %v611_v11 }
 0x16c   :  { %v646_v32 = vadd.f32 %v634_v21, %v630_v27  ;;  %v3508_v34 = vsub.f32 %v3463_v29, %v611_v11  ;;  %v3510_v35 = vsub.f32 %v512_v37, %v611_v11  ;;  %v3512_v39 = vsub.f32 %v516_v45, %v611_v11 }
 0x16d   :  { %v664_v36 = vadd.f32 %v636_v26, %v632_v22  ;;  %v3515_v40 = vsub.f32 %v3461_v24, %v613_v12  ;;  %v3518_v41 = vsub.f32 %v3465_v30, %v613_v12  ;;  %v644_v43 = vmul.f32 %v3488_v20, %v3488_v20 }
 0x16e   :  { %v647_v42 = vadd.f32 %v646_v32, %v638_v25  ;;  %v631_v23 = vmul.f32 %v3505_v33, %v3505_v33  ;;  %v635_v29 = vmul.f32 %v3508_v34, %v3508_v34  ;;  %v639_v44 = vmul.f32 %v3510_v35, %v3510_v35 }
 0x16f   :  { %v665_v37 = vadd.f32 %v664_v36, %v640_v31  ;;  %v3529_v24 = vsub.f32 %v3471_v38, %v613_v12  ;;  %v3531_v45 = vsub.f32 %v569_v46, %v613_v12  ;;  %v633_v48 = vmul.f32 %v3515_v40, %v3515_v40 }
 0x170   :  { %v648_v30 = vadd.f32 %v647_v42, %v642_v28  ;;  %v655_v47 = vadd.f32 %v635_v29, %v631_v23  ;;  %v637_v49 = vmul.f32 %v3518_v41, %v3518_v41  ;;  %v643_v51 = vmul.f32 %v3512_v39, %v3512_v39 }
 0x171   :  { %v666_v50 = vadd.f32 %v665_v37, %v644_v43  ;;  %v641_v38 = vmul.f32 %v3529_v24, %v3529_v24  ;;  %v645_v57 = vmul.f32 %v3531_v45, %v3531_v45  ;;  %v3230_v29 = vmov 1966171168  }
 0x172   :  { %v649_v52 = vrot.slane %v648_v30, 4  ;;  %v656_v53 = vadd.f32 %v655_v47, %v639_v44  ;;  %v673_v54 = vadd.f32 %v637_v49, %v633_v48  ;;  %v701_v37 = vunpack.c.l.s4 %v3230_v29 }
 0x173   :  { %v667_v46 = vrot.slane %v666_v50, 4  ;;  %v703_v44 = vlaneseq }
 0x174   :  { %v650_v55 = vadd.f32 %v649_v52, %v648_v30  ;;  %v657_v56 = vadd.f32 %v656_v53, %v643_v51  ;;  %v674_v58 = vadd.f32 %v673_v54, %v641_v38  ;;  %v702_v30 = vunpack.c.0.s8 %v701_v37 }
 0x175   :  { %v668_v59 = vadd.f32 %v667_v46, %v666_v50  ;;  %v704_v47 = vshrl.u32 %v703_v44, 7 }
 0x176   :  { %v651_v60 = vrot.slane %v650_v55, 2  ;;  %v658_v61 = vrot.slane %v657_v56, 4  ;;  %v675_v62 = vadd.f32 %v674_v58, %v645_v57 }
 0x177   :  { %v669_v63 = vrot.slane %v668_v59, 2  ;;  %v3543_v50 = vsub.s32 %v702_v30, %v704_v47  ;;  %v3550_v57 = vsub.s32 0, %v704_v47 }
 0x178   :  { %v652_v0 = vadd.f32 %v651_v60, %v650_v55  ;;  %v659_v1 = vadd.f32 %v658_v61, %v657_v56  ;;  %v676_v2 = vrot.slane %v675_v62, 4  ;;  %v572_v56 = vld [vmem:[%s3760_s3] sm:$0xf]  ;;  %v3555_v60 = vsub.s32 2, %v704_v47 }
 0x179   :  { %v670_v3 = vadd.f32 %v669_v63, %v668_v59  ;;  %v3553_v59 = vsub.s32 1, %v704_v47  ;;  %v3557_v61 = vsub.s32 3, %v704_v47 }
 0x17a   :  { %v653_v4 = vrot.slane %v652_v0, 1  ;;  %v660_v5 = vrot.slane %v659_v1, 2  ;;  %v677_v6 = vadd.f32 %v676_v2, %v675_v62  ;;  %v573_v62 = vld [vmem:[%s3761_s4] sm:$0xf] }
 0x17b   :  { %v671_v7 = vrot.slane %v670_v3, 1 }
 0x17c   :  { %v654_v8 = vadd.f32 %v653_v4, %v652_v0  ;;  %v661_v9 = vadd.f32 %v660_v5, %v659_v1  ;;  %v678_v10 = vrot.slane %v677_v6, 2  ;;  %v765_v4 = vrot.slane %v573_v62, %v3550_v57 }
 0x17d   :  { %v672_v11 = vadd.f32 %v671_v7, %v670_v3  ;;  %v769_v5 = vrot.slane %v573_v62, %v3553_v59  ;;  %v777_v7 = vrot.slane %v573_v62, %v3557_v61 }
 0x17e   :  { %v682_v12 = vmul.f32 0.032258064, %v654_v8  ;;  %v662_v27 = vrot.slane %v661_v9, 1  ;;  %v679_v21 = vadd.f32 %v678_v10, %v677_v6  ;;  %v773_v6 = vrot.slane %v573_v62, %v3555_v60 }
 0x17f   :  { %v684_v25 = vmul.f32 0.032258064, %v672_v11 }
 0x180   :  { %v686_v28 = vadd.f32 1e-05, %v682_v12  ;;  %v663_v22 = vadd.f32 %v662_v27, %v661_v9  ;;  %v680_v26 = vrot.slane %v679_v21, 1 }
 0x181   :  { %v688_v31 = vadd.f32 1e-05, %v684_v25 }
 0x182   :  { %v683_v32 = vmul.f32 0.032258064, %v663_v22  ;;  %v681_v36 = vadd.f32 %v680_v26, %v679_v21  ;;  %2993 = vrsqrt.f32 %v686_v28 }
 0x183   :  { %2995 = vrsqrt.f32 %v688_v31 }
 0x184   :  { %v687_v42 = vadd.f32 1e-05, %v683_v32  ;;  %v685_v43 = vmul.f32 0.032258064, %v681_v36 }
 0x186   :  { %2997 = vrsqrt.f32 %v687_v42  ;;  %v689_v23 = vadd.f32 1e-05, %v685_v43 }
 0x188   :  { %2999 = vrsqrt.f32 %v689_v23 }
 0x18c   :  { %v2994_v48 = vpop.eup %2993 }
 0x18d   :  { %v2996_v49 = vpop.eup %2995 }
 0x190   :  { %v2998_v51 = vpop.eup %2997 }
 0x191   :  { %v698_v52 = vcombine.low %v2994_v48, %v2998_v51 }
 0x192   :  { %v3000_v53 = vpop.eup %2999 }
 0x193   :  { %v699_v38 = vcombine.low %v2996_v49, %v3000_v53  ;;  %v706_v54 = vrot.slane %v698_v52, %v3543_v50 }
 0x195   :  { %v713_v46 = vrot.slane %v699_v38, %v3543_v50 }
 0x197   :  { %v714_v55 = vcombine.low %v706_v54, %v713_v46 }
 0x199   :  { %v721_v58 = vrot.slane %v714_v55, %v3543_v50 }
 0x19b   :  { %v723_v63 = vmul.f32 %v721_v58, %v572_v56 }
 0x19d   :  { %v728_v0 = vrot.slane %v723_v63, %v3550_v57  ;;  %v732_v1 = vrot.slane %v723_v63, %v3553_v59  ;;  %v736_v2 = vrot.slane %v723_v63, %v3555_v60  ;;  %v740_v3 = vrot.slane %v723_v63, %v3557_v61 }
 0x19f   :  { %v745_v8 = vmul.f32 %v728_v0, %v3474_v13  ;;  %v746_v9 = vmul.f32 %v732_v1, %v3505_v33  ;;  %v747_v10 = vmul.f32 %v736_v2, %v3482_v17  ;;  %v748_v11 = vmul.f32 %v740_v3, %v3515_v40 }
 0x1a0   :  { %v749_v12 = vmul.f32 %v728_v0, %v3476_v14  ;;  %v750_v27 = vmul.f32 %v732_v1, %v3508_v34  ;;  %v751_v21 = vmul.f32 %v736_v2, %v3484_v18  ;;  %v752_v25 = vmul.f32 %v740_v3, %v3518_v41 }
 0x1a1   :  { %v753_v28 = vmul.f32 %v728_v0, %v3478_v15  ;;  %v754_v22 = vmul.f32 %v732_v1, %v3510_v35  ;;  %v755_v13 = vmul.f32 %v736_v2, %v3486_v19  ;;  %v756_v33 = vmul.f32 %v740_v3, %v3529_v24 }
 0x1a2   :  { %v757_v17 = vmul.f32 %v728_v0, %v3480_v16  ;;  %v758_v40 = vmul.f32 %v732_v1, %v3512_v39  ;;  %v759_v14 = vmul.f32 %v736_v2, %v3488_v20  ;;  %v760_v34 = vmul.f32 %v740_v3, %v3531_v45 }
 0x1a3   :  { %v782_v26 = vadd.f32 %v765_v4, %v745_v8  ;;  %v783_v18 = vadd.f32 %v769_v5, %v746_v9  ;;  %v784_v31 = vadd.f32 %v773_v6, %v747_v10  ;;  %v785_v41 = vadd.f32 %v777_v7, %v748_v11 }
 0x1a4   :  { %v786_v32 = vadd.f32 %v765_v4, %v749_v12  ;;  %v787_v15 = vadd.f32 %v769_v5, %v750_v27  ;;  %v788_v35 = vadd.f32 %v773_v6, %v751_v21  ;;  %v789_v19 = vadd.f32 %v777_v7, %v752_v25 }
 0x1a5   :  { %3001 = vtanh.f32 %v782_v26  ;;  %v790_v24 = vadd.f32 %v765_v4, %v753_v28  ;;  %v791_v16 = vadd.f32 %v769_v5, %v754_v22  ;;  %v792_v39 = vadd.f32 %v773_v6, %v755_v13 }
 0x1a6   :  { %3003 = vtanh.f32 %v783_v18  ;;  %v793_v20 = vadd.f32 %v777_v7, %v756_v33  ;;  %v794_v45 = vadd.f32 %v765_v4, %v757_v17  ;;  %v795_v36 = vadd.f32 %v769_v5, %v758_v40 }
 0x1a7   :  { %3005 = vtanh.f32 %v784_v31  ;;  %v796_v43 = vadd.f32 %v773_v6, %v759_v14  ;;  %v797_v29 = vadd.f32 %v777_v7, %v760_v34 }
 0x1a8   :  { %3007 = vtanh.f32 %v785_v41 }
 0x1a9   :  { %3009 = vtanh.f32 %v786_v32 }
 0x1aa   :  { %3011 = vtanh.f32 %v787_v15 }
 0x1ab   :  { %3013 = vtanh.f32 %v788_v35 }
 0x1ac   :  { %3015 = vtanh.f32 %v789_v19 }
 0x1ad   :  { %3017 = vtanh.f32 %v790_v24 }
 0x1ae   :  { %3019 = vtanh.f32 %v791_v16 }
 0x1af   :  { %v3586_v42 = vpop.eup %3001  ;;  %3021 = vtanh.f32 %v792_v39 }
 0x1b0   :  { %v3588_v23 = vpop.eup %3003  ;;  %3023 = vtanh.f32 %v793_v20 }
 0x1b1   :  { %v3590_v37 = vpop.eup %3005  ;;  %3025 = vtanh.f32 %v794_v45 }
 0x1b2   :  { %v3592_v44 = vpop.eup %3007  ;;  %3027 = vtanh.f32 %v795_v36 }
 0x1b3   :  { %v3594_v30 = vpop.eup %3009  ;;  %3029 = vtanh.f32 %v796_v43 }
 0x1b4   :  { %v3596_v47 = vpop.eup %3011  ;;  %3031 = vtanh.f32 %v797_v29 }
 0x1b5   :  { %v3598_v48 = vpop.eup %3013 }
 0x1b6   :  { %v3600_v49 = vpop.eup %3015 }
 0x1b7   :  { %v3602_v51 = vpop.eup %3017 }
 0x1b8   :  { %v3020_v52 = vpop.eup %3019 }
 0x1b9   :  { %v3604_v53 = vpop.eup %3021 }
 0x1ba   :  { %v3606_v38 = vpop.eup %3023 }
 0x1bb   :  { %v3608_v54 = vpop.eup %3025 }
 0x1bc   :  { %v3028_v46 = vpop.eup %3027 }
 0x1bd   :  { %v3610_v55 = vpop.eup %3029 }
 0x1be   :  { %v3612_v56 = vpop.eup %3031 }
 0x1bf   :  { %3197 = dma.done.wait [#allocation6], 16384 }
 0x1c0   :  { %3198 = vsyncadd [#allocation6], 4294950912 }
 0x1c1   :  { %3199 = dma.done.wait [#allocation6 + $0x1], 16384 }
 0x1c2   :  { %3200 = vsyncadd [#allocation6 + $0x1], 4294950912  ;;  %v1081_v58 = vpack.c.bf16 %v3028_v46, %v3020_v52  ;;  %v949_v62 = vld [vmem:[#allocation3 + $0x8] sm:$0xff]  ;;  %v951_v63 = vld [vmem:[#allocation3 + $0x18] sm:$0xff] }
 0x1c3   :  { %v948_v0 = vld [vmem:[#allocation3] sm:$0xff]  ;;  %1084 = vmatprep.subr.bf16.mxu0 %v949_v62  ;;  %1170 = vmatprep.subr.bf16.mxu1 %v951_v63  ;;  %v950_v1 = vld [vmem:[#allocation3 + $0x10] sm:$0xff]  ;;  %v953_v2 = vld [vmem:[#allocation3 + $0x28] sm:$0xff] }
 0x1c4   :  { %1116 = vmatprep.mubr.bf16.mxu0 %v1081_v58  ;;  %1202 = vmatprep.mubr.bf16.mxu1 %v1081_v58  ;;  %v955_v3 = vld [vmem:[#allocation3 + $0x38] sm:$0xff]  ;;  %v952_v4 = vld [vmem:[#allocation3 + $0x20] sm:$0xff]  ;;  %v954_v5 = vld [vmem:[#allocation3 + $0x30] sm:$0xff] }
 0x1c5   :  { %1085 = vmatpush1.bf16.msra.mxu0 %v948_v0  ;;  %1171 = vmatpush1.bf16.msra.mxu1 %v950_v1  ;;  %v957_v6 = vld [vmem:[#allocation3 + $0x48] sm:$0xff]  ;;  %v959_v7 = vld [vmem:[#allocation3 + $0x58] sm:$0xff]  ;;  %v956_v8 = vld [vmem:[#allocation3 + $0x40] sm:$0xff] }
 0x1c6   :  { %1086 = vmatprep.subr.bf16.mxu0 %v953_v2  ;;  %1172 = vmatprep.subr.bf16.mxu1 %v955_v3  ;;  %v958_v9 = vld [vmem:[#allocation3 + $0x50] sm:$0xff]  ;;  %v961_v10 = vld [vmem:[#allocation3 + $0x68] sm:$0xff]  ;;  %v963_v11 = vld [vmem:[#allocation3 + $0x78] sm:$0xff] }
 0x1c7   :  { %v960_v12 = vld [vmem:[#allocation3 + $0x60] sm:$0xff]  ;;  %v962_v27 = vld [vmem:[#allocation3 + $0x70] sm:$0xff]  ;;  %v965_v21 = vld [vmem:[#allocation3 + $0x88] sm:$0xff] }
 0x1c8   :  { %v967_v25 = vld [vmem:[#allocation3 + $0x98] sm:$0xff]  ;;  %v964_v28 = vld [vmem:[#allocation3 + $0x80] sm:$0xff]  ;;  %v966_v22 = vld [vmem:[#allocation3 + $0x90] sm:$0xff] }
 0x1c9   :  { %1087 = vmatpush1.bf16.msra.mxu0 %v952_v4  ;;  %1173 = vmatpush1.bf16.msra.mxu1 %v954_v5  ;;  %v969_v13 = vld [vmem:[#allocation3 + $0xa8] sm:$0xff]  ;;  %v971_v33 = vld [vmem:[#allocation3 + $0xb8] sm:$0xff]  ;;  %v968_v17 = vld [vmem:[#allocation3 + $0xa0] sm:$0xff] }
 0x1ca   :  { %1088 = vmatprep.subr.bf16.mxu0 %v957_v6  ;;  %1174 = vmatprep.subr.bf16.mxu1 %v959_v7  ;;  %v970_v40 = vld [vmem:[#allocation3 + $0xb0] sm:$0xff]  ;;  %v973_v14 = vld [vmem:[#allocation3 + $0xc8] sm:$0xff]  ;;  %v975_v34 = vld [vmem:[#allocation3 + $0xd8] sm:$0xff] }
 0x1cb   :  { %v972_v26 = vld [vmem:[#allocation3 + $0xc0] sm:$0xff]  ;;  %v974_v18 = vld [vmem:[#allocation3 + $0xd0] sm:$0xff]  ;;  %v977_v31 = vld [vmem:[#allocation3 + $0xe8] sm:$0xff] }
 0x1cc   :  { %v979_v41 = vld [vmem:[#allocation3 + $0xf8] sm:$0xff]  ;;  %v976_v32 = vld [vmem:[#allocation3 + $0xe0] sm:$0xff]  ;;  %v978_v15 = vld [vmem:[#allocation3 + $0xf0] sm:$0xff] }
 0x1cd   :  { %1089 = vmatpush1.bf16.msra.mxu0 %v956_v8  ;;  %1175 = vmatpush1.bf16.msra.mxu1 %v958_v9  ;;  %v981_v35 = vld [vmem:[#allocation3 + $0x108] sm:$0xff]  ;;  %v983_v19 = vld [vmem:[#allocation3 + $0x118] sm:$0xff]  ;;  %v980_v24 = vld [vmem:[#allocation3 + $0x100] sm:$0xff] }
 0x1ce   :  { %1090 = vmatprep.subr.bf16.mxu0 %v961_v10  ;;  %1176 = vmatprep.subr.bf16.mxu1 %v963_v11  ;;  %v982_v16 = vld [vmem:[#allocation3 + $0x110] sm:$0xff]  ;;  %v985_v39 = vld [vmem:[#allocation3 + $0x128] sm:$0xff]  ;;  %v987_v20 = vld [vmem:[#allocation3 + $0x138] sm:$0xff] }
 0x1cf   :  { %v984_v45 = vld [vmem:[#allocation3 + $0x120] sm:$0xff]  ;;  %v986_v36 = vld [vmem:[#allocation3 + $0x130] sm:$0xff]  ;;  %v989_v43 = vld [vmem:[#allocation3 + $0x148] sm:$0xff] }
 0x1d0   :  { %v991_v29 = vld [vmem:[#allocation3 + $0x158] sm:$0xff]  ;;  %v988_v52 = vld [vmem:[#allocation3 + $0x140] sm:$0xff]  ;;  %v990_v46 = vld [vmem:[#allocation3 + $0x150] sm:$0xff] }
 0x1d1   :  { %1091 = vmatpush1.bf16.msra.mxu0 %v960_v12  ;;  %1177 = vmatpush1.bf16.msra.mxu1 %v962_v27  ;;  %v993_v58 = vld [vmem:[#allocation3 + $0x168] sm:$0xff]  ;;  %v995_v62 = vld [vmem:[#allocation3 + $0x178] sm:$0xff]  ;;  %v992_v63 = vld [vmem:[#allocation3 + $0x160] sm:$0xff] }
 0x1d2   :  { %1092 = vmatprep.subr.bf16.mxu0 %v965_v21  ;;  %1178 = vmatprep.subr.bf16.mxu1 %v967_v25  ;;  %v994_v0 = vld [vmem:[#allocation3 + $0x170] sm:$0xff]  ;;  %v997_v1 = vld [vmem:[#allocation3 + $0x188] sm:$0xff]  ;;  %v999_v2 = vld [vmem:[#allocation3 + $0x198] sm:$0xff] }
 0x1d3   :  { %v996_v3 = vld [vmem:[#allocation3 + $0x180] sm:$0xff]  ;;  %v998_v4 = vld [vmem:[#allocation3 + $0x190] sm:$0xff]  ;;  %v1001_v5 = vld [vmem:[#allocation3 + $0x1a8] sm:$0xff] }
 0x1d4   :  { %v1003_v6 = vld [vmem:[#allocation3 + $0x1b8] sm:$0xff]  ;;  %v1000_v7 = vld [vmem:[#allocation3 + $0x1a0] sm:$0xff]  ;;  %v1002_v8 = vld [vmem:[#allocation3 + $0x1b0] sm:$0xff] }
 0x1d5   :  { %1093 = vmatpush1.bf16.msra.mxu0 %v964_v28  ;;  %1179 = vmatpush1.bf16.msra.mxu1 %v966_v22  ;;  %v1005_v9 = vld [vmem:[#allocation3 + $0x1c8] sm:$0xff]  ;;  %v1007_v10 = vld [vmem:[#allocation3 + $0x1d8] sm:$0xff]  ;;  %v1004_v11 = vld [vmem:[#allocation3 + $0x1c0] sm:$0xff] }
 0x1d6   :  { %1094 = vmatprep.subr.bf16.mxu0 %v969_v13  ;;  %1180 = vmatprep.subr.bf16.mxu1 %v971_v33  ;;  %v1006_v12 = vld [vmem:[#allocation3 + $0x1d0] sm:$0xff]  ;;  %v1009_v27 = vld [vmem:[#allocation3 + $0x1e8] sm:$0xff]  ;;  %v1011_v21 = vld [vmem:[#allocation3 + $0x1f8] sm:$0xff]  ;;  %v1080_v33 = vpack.c.bf16 %v3608_v54, %v3602_v51 }
 0x1d7   :  { %v1008_v25 = vld [vmem:[#allocation3 + $0x1e0] sm:$0xff]  ;;  %v1010_v28 = vld [vmem:[#allocation3 + $0x1f0] sm:$0xff]  ;;  %v1013_v22 = vld [vmem:[#allocation3 + $0x208] sm:$0xff] }
 0x1d8   :  { %v1015_v13 = vld [vmem:[#allocation3 + $0x218] sm:$0xff]  ;;  %v1021_v51 = vld [vmem:[#allocation3 + $0x248] sm:$0xff] }
 0x1d9   :  { %1095 = vmatpush1.bf16.msra.mxu0 %v968_v17  ;;  %1181 = vmatpush1.bf16.msra.mxu1 %v970_v40  ;;  %v1012_v17 = vld [vmem:[#allocation3 + $0x200] sm:$0xff]  ;;  %v1014_v40 = vld [vmem:[#allocation3 + $0x210] sm:$0xff]  ;;  %v1023_v54 = vld [vmem:[#allocation3 + $0x258] sm:$0xff] }
 0x1da   :  { %1096 = vmatprep.subr.bf16.mxu0 %v973_v14  ;;  %1182 = vmatprep.subr.bf16.mxu1 %v975_v34  ;;  %v1017_v14 = vld [vmem:[#allocation3 + $0x228] sm:$0xff]  ;;  %v1019_v34 = vld [vmem:[#allocation3 + $0x238] sm:$0xff] }
 0x1dd   :  { %1097 = vmatpush1.bf16.msra.mxu0 %v972_v26  ;;  %1183 = vmatpush1.bf16.msra.mxu1 %v974_v18  ;;  %v1083_v26 = vpack.c.bf16 %v3612_v56, %v3606_v38  ;;  %v1016_v18 = vld [vmem:[#allocation3 + $0x220] sm:$0xff]  ;;  %v1027_v38 = vld [vmem:[#allocation3 + $0x278] sm:$0xff] }
 0x1de   :  { %1098 = vmatprep.subr.bf16.mxu0 %v977_v31  ;;  %1184 = vmatprep.subr.bf16.mxu1 %v979_v41  ;;  %v1018_v31 = vld [vmem:[#allocation3 + $0x230] sm:$0xff]  ;;  %v1020_v41 = vld [vmem:[#allocation3 + $0x240] sm:$0xff] }
 0x1df   :  { %v1024_v56 = vld [vmem:[#allocation3 + $0x260] sm:$0xff] }
 0x1e1   :  { %1099 = vmatpush1.bf16.msra.mxu0 %v976_v32  ;;  %1185 = vmatpush1.bf16.msra.mxu1 %v978_v15  ;;  %v1022_v32 = vld [vmem:[#allocation3 + $0x250] sm:$0xff]  ;;  %v1025_v15 = vld [vmem:[#allocation3 + $0x268] sm:$0xff] }
 0x1e2   :  { %1100 = vmatprep.subr.bf16.mxu0 %v981_v35  ;;  %1186 = vmatprep.subr.bf16.mxu1 %v983_v19  ;;  %v1026_v35 = vld [vmem:[#allocation3 + $0x270] sm:$0xff]  ;;  %v1029_v19 = vld [vmem:[#allocation3 + $0x288] sm:$0xff] }
 0x1e5   :  { %1101 = vmatpush1.bf16.msra.mxu0 %v980_v24  ;;  %1187 = vmatpush1.bf16.msra.mxu1 %v982_v16  ;;  %v1031_v24 = vld [vmem:[#allocation3 + $0x298] sm:$0xff]  ;;  %v1028_v16 = vld [vmem:[#allocation3 + $0x280] sm:$0xff] }
 0x1e6   :  { %1102 = vmatprep.subr.bf16.mxu0 %v985_v39  ;;  %1188 = vmatprep.subr.bf16.mxu1 %v987_v20  ;;  %v1030_v39 = vld [vmem:[#allocation3 + $0x290] sm:$0xff]  ;;  %v1033_v20 = vld [vmem:[#allocation3 + $0x2a8] sm:$0xff] }
 0x1e9   :  { %1103 = vmatpush1.bf16.msra.mxu0 %v984_v45  ;;  %1189 = vmatpush1.bf16.msra.mxu1 %v986_v36  ;;  %v1035_v45 = vld [vmem:[#allocation3 + $0x2b8] sm:$0xff]  ;;  %v1032_v36 = vld [vmem:[#allocation3 + $0x2a0] sm:$0xff] }
 0x1ea   :  { %1104 = vmatprep.subr.bf16.mxu0 %v989_v43  ;;  %1190 = vmatprep.subr.bf16.mxu1 %v991_v29  ;;  %v1034_v43 = vld [vmem:[#allocation3 + $0x2b0] sm:$0xff]  ;;  %v1037_v29 = vld [vmem:[#allocation3 + $0x2c8] sm:$0xff] }
 0x1ed   :  { %1105 = vmatpush1.bf16.msra.mxu0 %v988_v52  ;;  %1191 = vmatpush1.bf16.msra.mxu1 %v990_v46  ;;  %v1039_v52 = vld [vmem:[#allocation3 + $0x2d8] sm:$0xff]  ;;  %v1036_v46 = vld [vmem:[#allocation3 + $0x2c0] sm:$0xff] }
 0x1ee   :  { %1106 = vmatprep.subr.bf16.mxu0 %v993_v58  ;;  %1192 = vmatprep.subr.bf16.mxu1 %v995_v62  ;;  %v1038_v58 = vld [vmem:[#allocation3 + $0x2d0] sm:$0xff]  ;;  %v1041_v62 = vld [vmem:[#allocation3 + $0x2e8] sm:$0xff] }
 0x1f1   :  { %1107 = vmatpush1.bf16.msra.mxu0 %v992_v63  ;;  %1193 = vmatpush1.bf16.msra.mxu1 %v994_v0  ;;  %v1043_v63 = vld [vmem:[#allocation3 + $0x2f8] sm:$0xff]  ;;  %v1040_v0 = vld [vmem:[#allocation3 + $0x2e0] sm:$0xff] }
 0x1f2   :  { %1108 = vmatprep.subr.bf16.mxu0 %v997_v1  ;;  %1194 = vmatprep.subr.bf16.mxu1 %v999_v2  ;;  %v1042_v1 = vld [vmem:[#allocation3 + $0x2f0] sm:$0xff]  ;;  %v1045_v2 = vld [vmem:[#allocation3 + $0x308] sm:$0xff] }
 0x1f5   :  { %1109 = vmatpush1.bf16.msra.mxu0 %v996_v3  ;;  %1195 = vmatpush1.bf16.msra.mxu1 %v998_v4  ;;  %v1047_v3 = vld [vmem:[#allocation3 + $0x318] sm:$0xff]  ;;  %v1044_v4 = vld [vmem:[#allocation3 + $0x300] sm:$0xff] }
 0x1f6   :  { %1110 = vmatprep.subr.bf16.mxu0 %v1001_v5  ;;  %1196 = vmatprep.subr.bf16.mxu1 %v1003_v6  ;;  %v1046_v5 = vld [vmem:[#allocation3 + $0x310] sm:$0xff]  ;;  %v1049_v6 = vld [vmem:[#allocation3 + $0x328] sm:$0xff] }
 0x1f9   :  { %1111 = vmatpush1.bf16.msra.mxu0 %v1000_v7  ;;  %1197 = vmatpush1.bf16.msra.mxu1 %v1002_v8  ;;  %v1051_v7 = vld [vmem:[#allocation3 + $0x338] sm:$0xff]  ;;  %v1048_v8 = vld [vmem:[#allocation3 + $0x320] sm:$0xff] }
 0x1fa   :  { %1112 = vmatprep.subr.bf16.mxu0 %v1005_v9  ;;  %1198 = vmatprep.subr.bf16.mxu1 %v1007_v10  ;;  %v1050_v9 = vld [vmem:[#allocation3 + $0x330] sm:$0xff]  ;;  %v1053_v10 = vld [vmem:[#allocation3 + $0x348] sm:$0xff] }
 0x1fd   :  { %1113 = vmatpush1.bf16.msra.mxu0 %v1004_v11  ;;  %1199 = vmatpush1.bf16.msra.mxu1 %v1006_v12  ;;  %v1055_v11 = vld [vmem:[#allocation3 + $0x358] sm:$0xff]  ;;  %v1052_v12 = vld [vmem:[#allocation3 + $0x340] sm:$0xff] }
 0x1fe   :  { %1114 = vmatprep.subr.bf16.mxu0 %v1009_v27  ;;  %1200 = vmatprep.subr.bf16.mxu1 %v1011_v21  ;;  %v1054_v27 = vld [vmem:[#allocation3 + $0x350] sm:$0xff]  ;;  %v1057_v21 = vld [vmem:[#allocation3 + $0x368] sm:$0xff] }
 0x201   :  { %1115 = vmatpush1.bf16.msra.mxu0 %v1008_v25  ;;  %1201 = vmatpush1.bf16.msra.mxu1 %v1010_v28  ;;  %v1059_v25 = vld [vmem:[#allocation3 + $0x378] sm:$0xff]  ;;  %v1056_v28 = vld [vmem:[#allocation3 + $0x360] sm:$0xff] }
 0x202   :  { %1127 = vmatprep.subr.bf16.mxu0 %v1013_v22  ;;  %1213 = vmatprep.subr.bf16.mxu1 %v1015_v13  ;;  %v1058_v22 = vld [vmem:[#allocation3 + $0x370] sm:$0xff]  ;;  %v1061_v13 = vld [vmem:[#allocation3 + $0x388] sm:$0xff] }
 0x204   :  { %1117 = vmatmul.mubr.bf16.vlgmr.msra.gmra.mrb[8].mxu0 %v1080_v33  ;;  %1203 = vmatmul.mubr.bf16.vlgmr.msra.gmra.mrb[8].mxu1 %v1080_v33  ;;  %v1063_v33 = vld [vmem:[#allocation3 + $0x398] sm:$0xff] }
 0x205   :  { %1128 = vmatpush1.bf16.msra.mxu0 %v1012_v17  ;;  %1214 = vmatpush1.bf16.msra.mxu1 %v1014_v40  ;;  %v1060_v17 = vld [vmem:[#allocation3 + $0x380] sm:$0xff]  ;;  %v1062_v40 = vld [vmem:[#allocation3 + $0x390] sm:$0xff] }
 0x206   :  { %1129 = vmatprep.subr.bf16.mxu0 %v1017_v14  ;;  %1215 = vmatprep.subr.bf16.mxu1 %v1019_v34  ;;  %v1065_v14 = vld [vmem:[#allocation3 + $0x3a8] sm:$0xff]  ;;  %v1067_v34 = vld [vmem:[#allocation3 + $0x3b8] sm:$0xff] }
 0x207   :  { %1159 = vmatprep.mubr.bf16.mxu0 %v1083_v26  ;;  %1245 = vmatprep.mubr.bf16.mxu1 %v1083_v26  ;;  %v1064_v26 = vld [vmem:[#allocation3 + $0x3a0] sm:$0xff] }
 0x209   :  { %1130 = vmatpush1.bf16.msra.mxu0 %v1016_v18  ;;  %1216 = vmatpush1.bf16.msra.mxu1 %v1018_v31  ;;  %v1066_v18 = vld [vmem:[#allocation3 + $0x3b0] sm:$0xff]  ;;  %v1069_v31 = vld [vmem:[#allocation3 + $0x3c8] sm:$0xff] }
 0x20a   :  { %1131 = vmatprep.subr.bf16.mxu0 %v1021_v51  ;;  %1217 = vmatprep.subr.bf16.mxu1 %v1023_v54  ;;  %v1071_v51 = vld [vmem:[#allocation3 + $0x3d8] sm:$0xff]  ;;  %v1068_v54 = vld [vmem:[#allocation3 + $0x3c0] sm:$0xff] }
 0x20d   :  { %1132 = vmatpush1.bf16.msra.mxu0 %v1020_v41  ;;  %1218 = vmatpush1.bf16.msra.mxu1 %v1022_v32  ;;  %v1070_v41 = vld [vmem:[#allocation3 + $0x3d0] sm:$0xff]  ;;  %v1073_v32 = vld [vmem:[#allocation3 + $0x3e8] sm:$0xff] }
 0x20e   :  { %1133 = vmatprep.subr.bf16.mxu0 %v1025_v15  ;;  %1219 = vmatprep.subr.bf16.mxu1 %v1027_v38  ;;  %v1075_v15 = vld [vmem:[#allocation3 + $0x3f8] sm:$0xff]  ;;  %v1072_v38 = vld [vmem:[#allocation3 + $0x3e0] sm:$0xff] }
 0x211   :  { %1134 = vmatpush1.bf16.msra.mxu0 %v1024_v56  ;;  %1220 = vmatpush1.bf16.msra.mxu1 %v1026_v35  ;;  %v1074_v56 = vld [vmem:[#allocation3 + $0x3f0] sm:$0xff]  ;;  %v821_v35 = vld [vmem:[#allocation2 + $0x8] sm:$0xff] }
 0x212   :  { %1135 = vmatprep.subr.bf16.mxu0 %v1029_v19  ;;  %1221 = vmatprep.subr.bf16.mxu1 %v1031_v24  ;;  %v823_v19 = vld [vmem:[#allocation2 + $0x18] sm:$0xff]  ;;  %v1082_v24 = vpack.c.bf16 %v3610_v55, %v3604_v53  ;;  %v829_v53 = vld [vmem:[#allocation2 + $0x48] sm:$0xff] }
 0x213   :  { %v831_v55 = vld [vmem:[#allocation2 + $0x58] sm:$0xff] }
 0x215   :  { %1136 = vmatpush1.bf16.msra.mxu0 %v1028_v16  ;;  %1222 = vmatpush1.bf16.msra.mxu1 %v1030_v39  ;;  %v820_v16 = vld [vmem:[#allocation2] sm:$0xff]  ;;  %v822_v39 = vld [vmem:[#allocation2 + $0x10] sm:$0xff] }
 0x216   :  { %1137 = vmatprep.subr.bf16.mxu0 %v1033_v20  ;;  %1223 = vmatprep.subr.bf16.mxu1 %v1035_v45  ;;  %v825_v20 = vld [vmem:[#allocation2 + $0x28] sm:$0xff]  ;;  %v827_v45 = vld [vmem:[#allocation2 + $0x38] sm:$0xff] }
 0x219   :  { %1138 = vmatpush1.bf16.msra.mxu0 %v1032_v36  ;;  %1224 = vmatpush1.bf16.msra.mxu1 %v1034_v43  ;;  %v1077_v36 = vpack.c.bf16 %v3596_v47, %v3588_v23  ;;  %v824_v43 = vld [vmem:[#allocation2 + $0x20] sm:$0xff]  ;;  %v835_v23 = vld [vmem:[#allocation2 + $0x78] sm:$0xff] }
 0x21a   :  { %1139 = vmatprep.subr.bf16.mxu0 %v1037_v29  ;;  %1225 = vmatprep.subr.bf16.mxu1 %v1039_v52  ;;  %v826_v29 = vld [vmem:[#allocation2 + $0x30] sm:$0xff]  ;;  %v828_v52 = vld [vmem:[#allocation2 + $0x40] sm:$0xff] }
 0x21b   :  { %v832_v47 = vld [vmem:[#allocation2 + $0x60] sm:$0xff] }
 0x21d   :  { %1140 = vmatpush1.bf16.msra.mxu0 %v1036_v46  ;;  %1226 = vmatpush1.bf16.msra.mxu1 %v1038_v58  ;;  %v830_v46 = vld [vmem:[#allocation2 + $0x50] sm:$0xff]  ;;  %v833_v58 = vld [vmem:[#allocation2 + $0x68] sm:$0xff] }
 0x21e   :  { %1141 = vmatprep.subr.bf16.mxu0 %v1041_v62  ;;  %1227 = vmatprep.subr.bf16.mxu1 %v1043_v63  ;;  %v834_v62 = vld [vmem:[#allocation2 + $0x70] sm:$0xff]  ;;  %v837_v63 = vld [vmem:[#allocation2 + $0x88] sm:$0xff] }
 0x221   :  { %1142 = vmatpush1.bf16.msra.mxu0 %v1040_v0  ;;  %1228 = vmatpush1.bf16.msra.mxu1 %v1042_v1  ;;  %v839_v0 = vld [vmem:[#allocation2 + $0x98] sm:$0xff]  ;;  %v836_v1 = vld [vmem:[#allocation2 + $0x80] sm:$0xff] }
 0x222   :  { %1143 = vmatprep.subr.bf16.mxu0 %v1045_v2  ;;  %1229 = vmatprep.subr.bf16.mxu1 %v1047_v3  ;;  %v838_v2 = vld [vmem:[#allocation2 + $0x90] sm:$0xff]  ;;  %v841_v3 = vld [vmem:[#allocation2 + $0xa8] sm:$0xff] }
 0x225   :  { %1144 = vmatpush1.bf16.msra.mxu0 %v1044_v4  ;;  %1230 = vmatpush1.bf16.msra.mxu1 %v1046_v5  ;;  %v843_v4 = vld [vmem:[#allocation2 + $0xb8] sm:$0xff]  ;;  %v840_v5 = vld [vmem:[#allocation2 + $0xa0] sm:$0xff] }
 0x226   :  { %1145 = vmatprep.subr.bf16.mxu0 %v1049_v6  ;;  %1231 = vmatprep.subr.bf16.mxu1 %v1051_v7  ;;  %v842_v6 = vld [vmem:[#allocation2 + $0xb0] sm:$0xff]  ;;  %v845_v7 = vld [vmem:[#allocation2 + $0xc8] sm:$0xff] }
 0x229   :  { %1146 = vmatpush1.bf16.msra.mxu0 %v1048_v8  ;;  %1232 = vmatpush1.bf16.msra.mxu1 %v1050_v9  ;;  %v847_v8 = vld [vmem:[#allocation2 + $0xd8] sm:$0xff]  ;;  %v844_v9 = vld [vmem:[#allocation2 + $0xc0] sm:$0xff] }
 0x22a   :  { %1147 = vmatprep.subr.bf16.mxu0 %v1053_v10  ;;  %1233 = vmatprep.subr.bf16.mxu1 %v1055_v11  ;;  %v846_v10 = vld [vmem:[#allocation2 + $0xd0] sm:$0xff]  ;;  %v849_v11 = vld [vmem:[#allocation2 + $0xe8] sm:$0xff] }
 0x22d   :  { %1148 = vmatpush1.bf16.msra.mxu0 %v1052_v12  ;;  %1234 = vmatpush1.bf16.msra.mxu1 %v1054_v27  ;;  %v851_v12 = vld [vmem:[#allocation2 + $0xf8] sm:$0xff]  ;;  %v848_v27 = vld [vmem:[#allocation2 + $0xe0] sm:$0xff] }
 0x22e   :  { %1149 = vmatprep.subr.bf16.mxu0 %v1057_v21  ;;  %1235 = vmatprep.subr.bf16.mxu1 %v1059_v25  ;;  %v850_v21 = vld [vmem:[#allocation2 + $0xf0] sm:$0xff]  ;;  %v853_v25 = vld [vmem:[#allocation2 + $0x108] sm:$0xff] }
 0x231   :  { %1150 = vmatpush1.bf16.msra.mxu0 %v1056_v28  ;;  %1236 = vmatpush1.bf16.msra.mxu1 %v1058_v22  ;;  %v855_v28 = vld [vmem:[#allocation2 + $0x118] sm:$0xff]  ;;  %v852_v22 = vld [vmem:[#allocation2 + $0x100] sm:$0xff] }
 0x232   :  { %1151 = vmatprep.subr.bf16.mxu0 %v1061_v13  ;;  %1237 = vmatprep.subr.bf16.mxu1 %v1063_v33  ;;  %v854_v13 = vld [vmem:[#allocation2 + $0x110] sm:$0xff]  ;;  %v857_v33 = vld [vmem:[#allocation2 + $0x128] sm:$0xff] }
 0x235   :  { %1152 = vmatpush1.bf16.msra.mxu0 %v1060_v17  ;;  %1238 = vmatpush1.bf16.msra.mxu1 %v1062_v40  ;;  %v859_v17 = vld [vmem:[#allocation2 + $0x138] sm:$0xff]  ;;  %v856_v40 = vld [vmem:[#allocation2 + $0x120] sm:$0xff] }
 0x236   :  { %1153 = vmatprep.subr.bf16.mxu0 %v1065_v14  ;;  %1239 = vmatprep.subr.bf16.mxu1 %v1067_v34  ;;  %v858_v14 = vld [vmem:[#allocation2 + $0x130] sm:$0xff]  ;;  %v861_v34 = vld [vmem:[#allocation2 + $0x148] sm:$0xff] }
 0x239   :  { %1154 = vmatpush1.bf16.msra.mxu0 %v1064_v26  ;;  %1240 = vmatpush1.bf16.msra.mxu1 %v1066_v18  ;;  %v863_v26 = vld [vmem:[#allocation2 + $0x158] sm:$0xff]  ;;  %v860_v18 = vld [vmem:[#allocation2 + $0x140] sm:$0xff] }
 0x23a   :  { %1155 = vmatprep.subr.bf16.mxu0 %v1069_v31  ;;  %1241 = vmatprep.subr.bf16.mxu1 %v1071_v51  ;;  %v862_v31 = vld [vmem:[#allocation2 + $0x150] sm:$0xff]  ;;  %v865_v51 = vld [vmem:[#allocation2 + $0x168] sm:$0xff] }
 0x23d   :  { %1156 = vmatpush1.bf16.msra.mxu0 %v1068_v54  ;;  %1242 = vmatpush1.bf16.msra.mxu1 %v1070_v41  ;;  %v867_v54 = vld [vmem:[#allocation2 + $0x178] sm:$0xff]  ;;  %v864_v41 = vld [vmem:[#allocation2 + $0x160] sm:$0xff] }
 0x23e   :  { %1157 = vmatprep.subr.bf16.mxu0 %v1073_v32  ;;  %1243 = vmatprep.subr.bf16.mxu1 %v1075_v15  ;;  %v866_v32 = vld [vmem:[#allocation2 + $0x170] sm:$0xff]  ;;  %v869_v15 = vld [vmem:[#allocation2 + $0x188] sm:$0xff] }
 0x241   :  { %1158 = vmatpush1.bf16.msra.mxu0 %v1072_v38  ;;  %1244 = vmatpush1.bf16.msra.mxu1 %v1074_v56  ;;  %v871_v38 = vld [vmem:[#allocation2 + $0x198] sm:$0xff]  ;;  %v868_v56 = vld [vmem:[#allocation2 + $0x180] sm:$0xff] }
 0x242   :  { %1256 = vmatprep.subr.bf16.mxu0 %v821_v35  ;;  %1342 = vmatprep.subr.bf16.mxu1 %v823_v19  ;;  %v870_v35 = vld [vmem:[#allocation2 + $0x190] sm:$0xff]  ;;  %v873_v19 = vld [vmem:[#allocation2 + $0x1a8] sm:$0xff] }
 0x244   :  { %1160 = vmatmul.mubr.bf16.vlgmr.msra.gmra.mrb[8].mxu0 %v1082_v24  ;;  %1246 = vmatmul.mubr.bf16.vlgmr.msra.gmra.mrb[8].mxu1 %v1082_v24  ;;  %v875_v24 = vld [vmem:[#allocation2 + $0x1b8] sm:$0xff] }
 0x245   :  { %1257 = vmatpush1.bf16.msra.mxu0 %v820_v16  ;;  %1343 = vmatpush1.bf16.msra.mxu1 %v822_v39  ;;  %v872_v16 = vld [vmem:[#allocation2 + $0x1a0] sm:$0xff]  ;;  %v874_v39 = vld [vmem:[#allocation2 + $0x1b0] sm:$0xff] }
 0x246   :  { %1258 = vmatprep.subr.bf16.mxu0 %v825_v20  ;;  %1344 = vmatprep.subr.bf16.mxu1 %v827_v45  ;;  %v877_v20 = vld [vmem:[#allocation2 + $0x1c8] sm:$0xff]  ;;  %v879_v45 = vld [vmem:[#allocation2 + $0x1d8] sm:$0xff] }
 0x247   :  { %1288 = vmatprep.mubr.bf16.mxu0 %v1077_v36  ;;  %1374 = vmatprep.mubr.bf16.mxu1 %v1077_v36  ;;  %v876_v36 = vld [vmem:[#allocation2 + $0x1c0] sm:$0xff] }
 0x249   :  { %1259 = vmatpush1.bf16.msra.mxu0 %v824_v43  ;;  %1345 = vmatpush1.bf16.msra.mxu1 %v826_v29  ;;  %v878_v43 = vld [vmem:[#allocation2 + $0x1d0] sm:$0xff]  ;;  %v881_v29 = vld [vmem:[#allocation2 + $0x1e8] sm:$0xff] }
 0x24a   :  { %1260 = vmatprep.subr.bf16.mxu0 %v829_v53  ;;  %1346 = vmatprep.subr.bf16.mxu1 %v831_v55  ;;  %v883_v53 = vld [vmem:[#allocation2 + $0x1f8] sm:$0xff]  ;;  %v880_v55 = vld [vmem:[#allocation2 + $0x1e0] sm:$0xff] }
 0x24d   :  { %1261 = vmatpush1.bf16.msra.mxu0 %v828_v52  ;;  %1347 = vmatpush1.bf16.msra.mxu1 %v830_v46  ;;  %v882_v52 = vld [vmem:[#allocation2 + $0x1f0] sm:$0xff]  ;;  %v885_v46 = vld [vmem:[#allocation2 + $0x208] sm:$0xff] }
 0x24e   :  { %1262 = vmatprep.subr.bf16.mxu0 %v833_v58  ;;  %1348 = vmatprep.subr.bf16.mxu1 %v835_v23  ;;  %v887_v58 = vld [vmem:[#allocation2 + $0x218] sm:$0xff]  ;;  %v1076_v23 = vpack.c.bf16 %v3594_v30, %v3586_v42  ;;  %v893_v42 = vld [vmem:[#allocation2 + $0x248] sm:$0xff] }
 0x24f   :  { %v895_v30 = vld [vmem:[#allocation2 + $0x258] sm:$0xff] }
 0x251   :  { %1263 = vmatpush1.bf16.msra.mxu0 %v832_v47  ;;  %1349 = vmatpush1.bf16.msra.mxu1 %v834_v62  ;;  %v884_v47 = vld [vmem:[#allocation2 + $0x200] sm:$0xff]  ;;  %v886_v62 = vld [vmem:[#allocation2 + $0x210] sm:$0xff] }
 0x252   :  { %1264 = vmatprep.subr.bf16.mxu0 %v837_v63  ;;  %1350 = vmatprep.subr.bf16.mxu1 %v839_v0  ;;  %v889_v63 = vld [vmem:[#allocation2 + $0x228] sm:$0xff]  ;;  %v891_v0 = vld [vmem:[#allocation2 + $0x238] sm:$0xff] }
 0x255   :  { %1265 = vmatpush1.bf16.msra.mxu0 %v836_v1  ;;  %1351 = vmatpush1.bf16.msra.mxu1 %v838_v2  ;;  %v1079_v1 = vpack.c.bf16 %v3600_v49, %v3592_v44  ;;  %v888_v2 = vld [vmem:[#allocation2 + $0x220] sm:$0xff]  ;;  %v899_v44 = vld [vmem:[#allocation2 + $0x278] sm:$0xff] }
 0x256   :  { %1266 = vmatprep.subr.bf16.mxu0 %v841_v3  ;;  %1352 = vmatprep.subr.bf16.mxu1 %v843_v4  ;;  %v890_v3 = vld [vmem:[#allocation2 + $0x230] sm:$0xff]  ;;  %v892_v4 = vld [vmem:[#allocation2 + $0x240] sm:$0xff] }
 0x257   :  { %v896_v49 = vld [vmem:[#allocation2 + $0x260] sm:$0xff] }
 0x259   :  { %1267 = vmatpush1.bf16.msra.mxu0 %v840_v5  ;;  %1353 = vmatpush1.bf16.msra.mxu1 %v842_v6  ;;  %v894_v5 = vld [vmem:[#allocation2 + $0x250] sm:$0xff]  ;;  %v897_v6 = vld [vmem:[#allocation2 + $0x268] sm:$0xff] }
 0x25a   :  { %1268 = vmatprep.subr.bf16.mxu0 %v845_v7  ;;  %1354 = vmatprep.subr.bf16.mxu1 %v847_v8  ;;  %v898_v7 = vld [vmem:[#allocation2 + $0x270] sm:$0xff]  ;;  %v901_v8 = vld [vmem:[#allocation2 + $0x288] sm:$0xff] }
 0x25d   :  { %1269 = vmatpush1.bf16.msra.mxu0 %v844_v9  ;;  %1355 = vmatpush1.bf16.msra.mxu1 %v846_v10  ;;  %v903_v9 = vld [vmem:[#allocation2 + $0x298] sm:$0xff]  ;;  %v900_v10 = vld [vmem:[#allocation2 + $0x280] sm:$0xff] }
 0x25e   :  { %1270 = vmatprep.subr.bf16.mxu0 %v849_v11  ;;  %1356 = vmatprep.subr.bf16.mxu1 %v851_v12  ;;  %v902_v11 = vld [vmem:[#allocation2 + $0x290] sm:$0xff]  ;;  %v905_v12 = vld [vmem:[#allocation2 + $0x2a8] sm:$0xff] }
 0x261   :  { %1271 = vmatpush1.bf16.msra.mxu0 %v848_v27  ;;  %1357 = vmatpush1.bf16.msra.mxu1 %v850_v21  ;;  %v907_v27 = vld [vmem:[#allocation2 + $0x2b8] sm:$0xff]  ;;  %v904_v21 = vld [vmem:[#allocation2 + $0x2a0] sm:$0xff] }
 0x262   :  { %1272 = vmatprep.subr.bf16.mxu0 %v853_v25  ;;  %1358 = vmatprep.subr.bf16.mxu1 %v855_v28  ;;  %v906_v25 = vld [vmem:[#allocation2 + $0x2b0] sm:$0xff]  ;;  %v909_v28 = vld [vmem:[#allocation2 + $0x2c8] sm:$0xff] }
 0x265   :  { %1273 = vmatpush1.bf16.msra.mxu0 %v852_v22  ;;  %1359 = vmatpush1.bf16.msra.mxu1 %v854_v13  ;;  %v911_v22 = vld [vmem:[#allocation2 + $0x2d8] sm:$0xff]  ;;  %v908_v13 = vld [vmem:[#allocation2 + $0x2c0] sm:$0xff] }
 0x266   :  { %1274 = vmatprep.subr.bf16.mxu0 %v857_v33  ;;  %1360 = vmatprep.subr.bf16.mxu1 %v859_v17  ;;  %v910_v33 = vld [vmem:[#allocation2 + $0x2d0] sm:$0xff]  ;;  %v913_v17 = vld [vmem:[#allocation2 + $0x2e8] sm:$0xff] }
 0x269   :  { %1275 = vmatpush1.bf16.msra.mxu0 %v856_v40  ;;  %1361 = vmatpush1.bf16.msra.mxu1 %v858_v14  ;;  %v915_v40 = vld [vmem:[#allocation2 + $0x2f8] sm:$0xff]  ;;  %v912_v14 = vld [vmem:[#allocation2 + $0x2e0] sm:$0xff] }
 0x26a   :  { %1276 = vmatprep.subr.bf16.mxu0 %v861_v34  ;;  %1362 = vmatprep.subr.bf16.mxu1 %v863_v26  ;;  %v914_v34 = vld [vmem:[#allocation2 + $0x2f0] sm:$0xff]  ;;  %v917_v26 = vld [vmem:[#allocation2 + $0x308] sm:$0xff] }
 0x26d   :  { %1277 = vmatpush1.bf16.msra.mxu0 %v860_v18  ;;  %1363 = vmatpush1.bf16.msra.mxu1 %v862_v31  ;;  %v919_v18 = vld [vmem:[#allocation2 + $0x318] sm:$0xff]  ;;  %v916_v31 = vld [vmem:[#allocation2 + $0x300] sm:$0xff] }
 0x26e   :  { %1278 = vmatprep.subr.bf16.mxu0 %v865_v51  ;;  %1364 = vmatprep.subr.bf16.mxu1 %v867_v54  ;;  %v918_v51 = vld [vmem:[#allocation2 + $0x310] sm:$0xff]  ;;  %v921_v54 = vld [vmem:[#allocation2 + $0x328] sm:$0xff] }
 0x271   :  { %1279 = vmatpush1.bf16.msra.mxu0 %v864_v41  ;;  %1365 = vmatpush1.bf16.msra.mxu1 %v866_v32  ;;  %v923_v41 = vld [vmem:[#allocation2 + $0x338] sm:$0xff]  ;;  %v920_v32 = vld [vmem:[#allocation2 + $0x320] sm:$0xff] }
 0x272   :  { %1280 = vmatprep.subr.bf16.mxu0 %v869_v15  ;;  %1366 = vmatprep.subr.bf16.mxu1 %v871_v38  ;;  %v922_v15 = vld [vmem:[#allocation2 + $0x330] sm:$0xff]  ;;  %v925_v38 = vld [vmem:[#allocation2 + $0x348] sm:$0xff] }
 0x275   :  { %1281 = vmatpush1.bf16.msra.mxu0 %v868_v56  ;;  %1367 = vmatpush1.bf16.msra.mxu1 %v870_v35  ;;  %v927_v56 = vld [vmem:[#allocation2 + $0x358] sm:$0xff]  ;;  %v924_v35 = vld [vmem:[#allocation2 + $0x340] sm:$0xff] }
 0x276   :  { %1282 = vmatprep.subr.bf16.mxu0 %v873_v19  ;;  %1368 = vmatprep.subr.bf16.mxu1 %v875_v24  ;;  %v926_v19 = vld [vmem:[#allocation2 + $0x350] sm:$0xff]  ;;  %v929_v24 = vld [vmem:[#allocation2 + $0x368] sm:$0xff] }
 0x279   :  { %1283 = vmatpush1.bf16.msra.mxu0 %v872_v16  ;;  %1369 = vmatpush1.bf16.msra.mxu1 %v874_v39  ;;  %v931_v16 = vld [vmem:[#allocation2 + $0x378] sm:$0xff]  ;;  %v928_v39 = vld [vmem:[#allocation2 + $0x360] sm:$0xff] }
 0x27a   :  { %1284 = vmatprep.subr.bf16.mxu0 %v877_v20  ;;  %1370 = vmatprep.subr.bf16.mxu1 %v879_v45  ;;  %v930_v20 = vld [vmem:[#allocation2 + $0x370] sm:$0xff]  ;;  %v933_v45 = vld [vmem:[#allocation2 + $0x388] sm:$0xff] }
 0x27d   :  { %1285 = vmatpush1.bf16.msra.mxu0 %v876_v36  ;;  %1371 = vmatpush1.bf16.msra.mxu1 %v878_v43  ;;  %v935_v36 = vld [vmem:[#allocation2 + $0x398] sm:$0xff]  ;;  %v932_v43 = vld [vmem:[#allocation2 + $0x380] sm:$0xff] }
 0x27e   :  { %1286 = vmatprep.subr.bf16.mxu0 %v881_v29  ;;  %1372 = vmatprep.subr.bf16.mxu1 %v883_v53  ;;  %v934_v29 = vld [vmem:[#allocation2 + $0x390] sm:$0xff]  ;;  %v937_v53 = vld [vmem:[#allocation2 + $0x3a8] sm:$0xff] }
 0x281   :  { %1287 = vmatpush1.bf16.msra.mxu0 %v880_v55  ;;  %1373 = vmatpush1.bf16.msra.mxu1 %v882_v52  ;;  %v939_v55 = vld [vmem:[#allocation2 + $0x3b8] sm:$0xff]  ;;  %v936_v52 = vld [vmem:[#allocation2 + $0x3a0] sm:$0xff] }
 0x282   :  { %1299 = vmatprep.subr.bf16.mxu0 %v885_v46  ;;  %1385 = vmatprep.subr.bf16.mxu1 %v887_v58  ;;  %v938_v46 = vld [vmem:[#allocation2 + $0x3b0] sm:$0xff]  ;;  %v941_v58 = vld [vmem:[#allocation2 + $0x3c8] sm:$0xff] }
 0x284   :  { %1289 = vmatmul.mubr.bf16.vlgmr.msra.gmra.mrb[8].mxu0 %v1076_v23  ;;  %1375 = vmatmul.mubr.bf16.vlgmr.msra.gmra.mrb[8].mxu1 %v1076_v23  ;;  %v943_v23 = vld [vmem:[#allocation2 + $0x3d8] sm:$0xff] }
 0x285   :  { %1300 = vmatpush1.bf16.msra.mxu0 %v884_v47  ;;  %1386 = vmatpush1.bf16.msra.mxu1 %v886_v62  ;;  %v940_v47 = vld [vmem:[#allocation2 + $0x3c0] sm:$0xff]  ;;  %v942_v62 = vld [vmem:[#allocation2 + $0x3d0] sm:$0xff] }
 0x286   :  { %1301 = vmatprep.subr.bf16.mxu0 %v889_v63  ;;  %1387 = vmatprep.subr.bf16.mxu1 %v891_v0  ;;  %v945_v63 = vld [vmem:[#allocation2 + $0x3e8] sm:$0xff]  ;;  %v947_v0 = vld [vmem:[#allocation2 + $0x3f8] sm:$0xff] }
 0x287   :  { %1331 = vmatprep.mubr.bf16.mxu0 %v1079_v1  ;;  %1417 = vmatprep.mubr.bf16.mxu1 %v1079_v1  ;;  %v944_v1 = vld [vmem:[#allocation2 + $0x3e0] sm:$0xff] }
 0x289   :  { %1302 = vmatpush1.bf16.msra.mxu0 %v888_v2  ;;  %1388 = vmatpush1.bf16.msra.mxu1 %v890_v3  ;;  %v946_v2 = vld [vmem:[#allocation2 + $0x3f0] sm:$0xff]  ;;  %v1078_v3 = vpack.c.bf16 %v3598_v48, %v3590_v37 }
 0x28a   :  { %1303 = vmatprep.subr.bf16.mxu0 %v893_v42  ;;  %1389 = vmatprep.subr.bf16.mxu1 %v895_v30 }
 0x28d   :  { %1304 = vmatpush1.bf16.msra.mxu0 %v892_v4  ;;  %1390 = vmatpush1.bf16.msra.mxu1 %v894_v5 }
 0x28e   :  { %1305 = vmatprep.subr.bf16.mxu0 %v897_v6  ;;  %1391 = vmatprep.subr.bf16.mxu1 %v899_v44 }
 0x291   :  { %1306 = vmatpush1.bf16.msra.mxu0 %v896_v49  ;;  %1392 = vmatpush1.bf16.msra.mxu1 %v898_v7 }
 0x292   :  { %1307 = vmatprep.subr.bf16.mxu0 %v901_v8  ;;  %1393 = vmatprep.subr.bf16.mxu1 %v903_v9 }
 0x295   :  { %1308 = vmatpush1.bf16.msra.mxu0 %v900_v10  ;;  %1394 = vmatpush1.bf16.msra.mxu1 %v902_v11 }
 0x296   :  { %1309 = vmatprep.subr.bf16.mxu0 %v905_v12  ;;  %1395 = vmatprep.subr.bf16.mxu1 %v907_v27 }
 0x299   :  { %1310 = vmatpush1.bf16.msra.mxu0 %v904_v21  ;;  %1396 = vmatpush1.bf16.msra.mxu1 %v906_v25 }
 0x29a   :  { %1311 = vmatprep.subr.bf16.mxu0 %v909_v28  ;;  %1397 = vmatprep.subr.bf16.mxu1 %v911_v22 }
 0x29d   :  { %1312 = vmatpush1.bf16.msra.mxu0 %v908_v13  ;;  %1398 = vmatpush1.bf16.msra.mxu1 %v910_v33 }
 0x29e   :  { %1313 = vmatprep.subr.bf16.mxu0 %v913_v17  ;;  %1399 = vmatprep.subr.bf16.mxu1 %v915_v40 }
 0x2a1   :  { %1314 = vmatpush1.bf16.msra.mxu0 %v912_v14  ;;  %1400 = vmatpush1.bf16.msra.mxu1 %v914_v34 }
 0x2a2   :  { %1315 = vmatprep.subr.bf16.mxu0 %v917_v26  ;;  %1401 = vmatprep.subr.bf16.mxu1 %v919_v18 }
 0x2a5   :  { %1316 = vmatpush1.bf16.msra.mxu0 %v916_v31  ;;  %1402 = vmatpush1.bf16.msra.mxu1 %v918_v51 }
 0x2a6   :  { %1317 = vmatprep.subr.bf16.mxu0 %v921_v54  ;;  %1403 = vmatprep.subr.bf16.mxu1 %v923_v41 }
 0x2a9   :  { %1318 = vmatpush1.bf16.msra.mxu0 %v920_v32  ;;  %1404 = vmatpush1.bf16.msra.mxu1 %v922_v15 }
 0x2aa   :  { %1319 = vmatprep.subr.bf16.mxu0 %v925_v38  ;;  %1405 = vmatprep.subr.bf16.mxu1 %v927_v56 }
 0x2ad   :  { %1320 = vmatpush1.bf16.msra.mxu0 %v924_v35  ;;  %1406 = vmatpush1.bf16.msra.mxu1 %v926_v19 }
 0x2ae   :  { %1321 = vmatprep.subr.bf16.mxu0 %v929_v24  ;;  %1407 = vmatprep.subr.bf16.mxu1 %v931_v16 }
 0x2b1   :  { %1322 = vmatpush1.bf16.msra.mxu0 %v928_v39  ;;  %1408 = vmatpush1.bf16.msra.mxu1 %v930_v20 }
 0x2b2   :  { %1323 = vmatprep.subr.bf16.mxu0 %v933_v45  ;;  %1409 = vmatprep.subr.bf16.mxu1 %v935_v36 }
 0x2b5   :  { %1324 = vmatpush1.bf16.msra.mxu0 %v932_v43  ;;  %1410 = vmatpush1.bf16.msra.mxu1 %v934_v29 }
 0x2b6   :  { %1325 = vmatprep.subr.bf16.mxu0 %v937_v53  ;;  %1411 = vmatprep.subr.bf16.mxu1 %v939_v55 }
 0x2b9   :  { %1326 = vmatpush1.bf16.msra.mxu0 %v936_v52  ;;  %1412 = vmatpush1.bf16.msra.mxu1 %v938_v46 }
 0x2ba   :  { %1327 = vmatprep.subr.bf16.mxu0 %v941_v58  ;;  %1413 = vmatprep.subr.bf16.mxu1 %v943_v23 }
 0x2bd   :  { %1328 = vmatpush1.bf16.msra.mxu0 %v940_v47  ;;  %1414 = vmatpush1.bf16.msra.mxu1 %v942_v62 }
 0x2be   :  { %1329 = vmatprep.subr.bf16.mxu0 %v945_v63  ;;  %1415 = vmatprep.subr.bf16.mxu1 %v947_v0 }
 0x2c1   :  { %1330 = vmatpush1.bf16.msra.mxu0 %v944_v1  ;;  %1416 = vmatpush1.bf16.msra.mxu1 %v946_v2 }
 0x2c4   :  { %1332 = vmatmul.mubr.bf16.vlgmr.msra.gmra.mrb[8].mxu0 %v1078_v3  ;;  %1418 = vmatmul.mubr.bf16.vlgmr.msra.gmra.mrb[8].mxu1 %v1078_v3 }
 0x397   :  { %v1333_v42 = vpop.f32.mrb[8].mxu0  ;;  %v1419_v30 = vpop.f32.mrb[8].mxu1 }
 0x398   :  { %v1335_v4 = vpop.f32.mrb[9].mxu0  ;;  %v1421_v5 = vpop.f32.mrb[9].mxu1 }
 0x399   :  { %v1337_v6 = vpop.f32.mrb[10].mxu0  ;;  %v1423_v44 = vpop.f32.mrb[10].mxu1 }
 0x39a   :  { %v1430_v49 = vadd.f32 %v1337_v6, %v1333_v42  ;;  %v1444_v7 = vadd.f32 %v1423_v44, %v1419_v30  ;;  %v1339_v8 = vpop.f32.mrb[11].mxu0  ;;  %v1425_v9 = vpop.f32.mrb[11].mxu1 }
 0x39b   :  { %v1437_v10 = vadd.f32 %v1339_v8, %v1335_v4  ;;  %v1451_v11 = vadd.f32 %v1425_v9, %v1421_v5 }
 0x39c   :  { %v1431_v12 = vrot.slane %v1430_v49, 4  ;;  %v1445_v27 = vrot.slane %v1444_v7, 4 }
 0x39d   :  { %v1438_v21 = vrot.slane %v1437_v10, 4  ;;  %v1452_v37 = vrot.slane %v1451_v11, 4 }
 0x39e   :  { %v1432_v48 = vadd.f32 %v1431_v12, %v1430_v49  ;;  %v1446_v25 = vadd.f32 %v1445_v27, %v1444_v7 }
 0x39f   :  { %v1439_v28 = vadd.f32 %v1438_v21, %v1437_v10  ;;  %v1453_v22 = vadd.f32 %v1452_v37, %v1451_v11 }
 0x3a0   :  { %v1433_v13 = vrot.slane %v1432_v48, 2  ;;  %v1447_v33 = vrot.slane %v1446_v25, 2 }
 0x3a1   :  { %v1440_v17 = vrot.slane %v1439_v28, 2  ;;  %v1454_v40 = vrot.slane %v1453_v22, 2 }
 0x3a2   :  { %v1434_v14 = vadd.f32 %v1433_v13, %v1432_v48  ;;  %v1448_v34 = vadd.f32 %v1447_v33, %v1446_v25 }
 0x3a3   :  { %v1441_v26 = vadd.f32 %v1440_v17, %v1439_v28  ;;  %v1455_v18 = vadd.f32 %v1454_v40, %v1453_v22 }
 0x3a4   :  { %v1435_v31 = vrot.slane %v1434_v14, 1  ;;  %v1449_v51 = vrot.slane %v1448_v34, 1 }
 0x3a5   :  { %v1442_v54 = vrot.slane %v1441_v26, 1  ;;  %v1456_v41 = vrot.slane %v1455_v18, 1 }
 0x3a6   :  { %v1436_v32 = vadd.f32 %v1435_v31, %v1434_v14  ;;  %v1450_v15 = vadd.f32 %v1449_v51, %v1448_v34 }
 0x3a7   :  { %v1443_v38 = vadd.f32 %v1442_v54, %v1441_v26  ;;  %v1457_v56 = vadd.f32 %v1456_v41, %v1455_v18 }
 0x3a8   :  { %v1458_v35 = vmul.f32 0.0625, %v1436_v32  ;;  %v1460_v19 = vmul.f32 0.0625, %v1450_v15 }
 0x3a9   :  { %v1459_v24 = vmul.f32 0.0625, %v1443_v38  ;;  %v1461_v16 = vmul.f32 0.0625, %v1457_v56 }
 0x3aa   :  { %v3628_v39 = vsub.f32 %v1333_v42, %v1458_v35  ;;  %v3630_v20 = vsub.f32 %v1337_v6, %v1458_v35  ;;  %v3632_v45 = vsub.f32 %v1419_v30, %v1460_v19  ;;  %v3634_v36 = vsub.f32 %v1423_v44, %v1460_v19 }
 0x3ab   :  { %v3636_v43 = vsub.f32 %v1335_v4, %v1459_v24  ;;  %v3638_v29 = vsub.f32 %v1339_v8, %v1459_v24  ;;  %v3640_v53 = vsub.f32 %v1421_v5, %v1461_v16  ;;  %v3642_v55 = vsub.f32 %v1425_v9, %v1461_v16 }
 0x3ac   :  { %v1470_v52 = vmul.f32 %v3628_v39, %v3628_v39  ;;  %v1474_v46 = vmul.f32 %v3630_v20, %v3630_v20  ;;  %v1472_v58 = vmul.f32 %v3632_v45, %v3632_v45  ;;  %v1476_v23 = vmul.f32 %v3634_v36, %v3634_v36 }
 0x3ad   :  { %v1471_v47 = vmul.f32 %v3636_v43, %v3636_v43  ;;  %v1475_v62 = vmul.f32 %v3638_v29, %v3638_v29  ;;  %v1473_v63 = vmul.f32 %v3640_v53, %v3640_v53  ;;  %v1477_v0 = vmul.f32 %v3642_v55, %v3642_v55 }
 0x3ae   :  { %v1478_v1 = vadd.f32 %v1474_v46, %v1470_v52  ;;  %v1492_v2 = vadd.f32 %v1476_v23, %v1472_v58  ;;  %v1428_v58 = vld [vmem:[%s3764_s7] sm:$0xf] }
 0x3af   :  { %v1485_v3 = vadd.f32 %v1475_v62, %v1471_v47  ;;  %v1499_v42 = vadd.f32 %v1477_v0, %v1473_v63  ;;  %v1429_v23 = vld [vmem:[%s3765_s8] sm:$0xf] }
 0x3b0   :  { %v1479_v30 = vrot.slane %v1478_v1, 4  ;;  %v1493_v4 = vrot.slane %v1492_v2, 4  ;;  %v1581_v63 = vrot.slane %v1429_v23, %v3550_v57  ;;  %v1585_v0 = vrot.slane %v1429_v23, %v3553_v59 }
 0x3b1   :  { %v1486_v5 = vrot.slane %v1485_v3, 4  ;;  %v1500_v6 = vrot.slane %v1499_v42, 4 }
 0x3b2   :  { %v1480_v44 = vadd.f32 %v1479_v30, %v1478_v1  ;;  %v1494_v49 = vadd.f32 %v1493_v4, %v1492_v2  ;;  %v1589_v1 = vrot.slane %v1429_v23, %v3555_v60  ;;  %v1593_v4 = vrot.slane %v1429_v23, %v3557_v61 }
 0x3b3   :  { %v1487_v7 = vadd.f32 %v1486_v5, %v1485_v3  ;;  %v1501_v8 = vadd.f32 %v1500_v6, %v1499_v42 }
 0x3b4   :  { %v1481_v9 = vrot.slane %v1480_v44, 2  ;;  %v1495_v10 = vrot.slane %v1494_v49, 2 }
 0x3b5   :  { %v1488_v11 = vrot.slane %v1487_v7, 2  ;;  %v1502_v12 = vrot.slane %v1501_v8, 2 }
 0x3b6   :  { %v1482_v27 = vadd.f32 %v1481_v9, %v1480_v44  ;;  %v1496_v21 = vadd.f32 %v1495_v10, %v1494_v49 }
 0x3b7   :  { %v1489_v37 = vadd.f32 %v1488_v11, %v1487_v7  ;;  %v1503_v48 = vadd.f32 %v1502_v12, %v1501_v8 }
 0x3b8   :  { %v1483_v25 = vrot.slane %v1482_v27, 1  ;;  %v1497_v28 = vrot.slane %v1496_v21, 1 }
 0x3b9   :  { %v1490_v22 = vrot.slane %v1489_v37, 1  ;;  %v1504_v13 = vrot.slane %v1503_v48, 1 }
 0x3ba   :  { %v1484_v33 = vadd.f32 %v1483_v25, %v1482_v27  ;;  %v1498_v17 = vadd.f32 %v1497_v28, %v1496_v21 }
 0x3bb   :  { %v1491_v40 = vadd.f32 %v1490_v22, %v1489_v37  ;;  %v1505_v14 = vadd.f32 %v1504_v13, %v1503_v48 }
 0x3bc   :  { %v1506_v34 = vmul.f32 0.06666667, %v1484_v33  ;;  %v1508_v26 = vmul.f32 0.06666667, %v1498_v17 }
 0x3bd   :  { %v1507_v18 = vmul.f32 0.06666667, %v1491_v40  ;;  %v1509_v31 = vmul.f32 0.06666667, %v1505_v14 }
 0x3be   :  { %v1510_v51 = vadd.f32 1e-05, %v1506_v34  ;;  %v1512_v54 = vadd.f32 1e-05, %v1508_v26 }
 0x3bf   :  { %v1511_v41 = vadd.f32 1e-05, %v1507_v18  ;;  %v1513_v32 = vadd.f32 1e-05, %v1509_v31 }
 0x3c0   :  { %3033 = vrsqrt.f32 %v1510_v51 }
 0x3c1   :  { %3035 = vrsqrt.f32 %v1512_v54 }
 0x3c2   :  { %3037 = vrsqrt.f32 %v1511_v41 }
 0x3c3   :  { %3039 = vrsqrt.f32 %v1513_v32 }
 0x3ca   :  { %v3034_v15 = vpop.eup %3033 }
 0x3cb   :  { %v3036_v38 = vpop.eup %3035 }
 0x3cc   :  { %v3038_v56 = vpop.eup %3037 }
 0x3cd   :  { %v3040_v35 = vpop.eup %3039  ;;  %v1522_v19 = vcombine.low %v3034_v15, %v3038_v56 }
 0x3ce   :  { %v1523_v24 = vcombine.low %v3036_v38, %v3040_v35 }
 0x3cf   :  { %v1530_v16 = vrot.slane %v1522_v19, %v3543_v50 }
 0x3d0   :  { %v1537_v52 = vrot.slane %v1523_v24, %v3543_v50 }
 0x3d2   :  { %v1538_v46 = vcombine.low %v1530_v16, %v1537_v52 }
 0x3d4   :  { %v1545_v47 = vrot.slane %v1538_v46, %v3543_v50 }
 0x3d6   :  { %v1547_v62 = vmul.f32 %v1545_v47, %v1428_v58 }
 0x3d8   :  { %v1552_v2 = vrot.slane %v1547_v62, %v3550_v57  ;;  %v1556_v3 = vrot.slane %v1547_v62, %v3553_v59  ;;  %v1560_v42 = vrot.slane %v1547_v62, %v3555_v60  ;;  %v1564_v30 = vrot.slane %v1547_v62, %v3557_v61 }
 0x3da   :  { %v1569_v5 = vmul.f32 %v1552_v2, %v3628_v39  ;;  %v1570_v6 = vmul.f32 %v1556_v3, %v3636_v43  ;;  %v1571_v44 = vmul.f32 %v1560_v42, %v3632_v45  ;;  %v1572_v49 = vmul.f32 %v1564_v30, %v3640_v53 }
 0x3db   :  { %v1573_v7 = vmul.f32 %v1552_v2, %v3630_v20  ;;  %v1574_v8 = vmul.f32 %v1556_v3, %v3638_v29  ;;  %v1575_v9 = vmul.f32 %v1560_v42, %v3634_v36  ;;  %v1576_v10 = vmul.f32 %v1564_v30, %v3642_v55 }
 0x3dc   :  { %v1598_v11 = vadd.f32 %v1581_v63, %v1569_v5  ;;  %v1599_v12 = vadd.f32 %v1585_v0, %v1570_v6  ;;  %v1600_v27 = vadd.f32 %v1589_v1, %v1571_v44  ;;  %v1601_v21 = vadd.f32 %v1593_v4, %v1572_v49 }
 0x3dd   :  { %v1602_v37 = vadd.f32 %v1581_v63, %v1573_v7  ;;  %v1603_v39 = vadd.f32 %v1585_v0, %v1574_v8  ;;  %v1604_v43 = vadd.f32 %v1589_v1, %v1575_v9  ;;  %v1605_v45 = vadd.f32 %v1593_v4, %v1576_v10 }
 0x3de   :  { %3041 = vtanh.f32 %v1598_v11 }
 0x3df   :  { %3043 = vtanh.f32 %v1599_v12 }
 0x3e0   :  { %3045 = vtanh.f32 %v1600_v27 }
 0x3e1   :  { %3047 = vtanh.f32 %v1601_v21 }
 0x3e2   :  { %3049 = vtanh.f32 %v1602_v37 }
 0x3e3   :  { %3051 = vtanh.f32 %v1603_v39 }
 0x3e4   :  { %3053 = vtanh.f32 %v1604_v43 }
 0x3e5   :  { %3055 = vtanh.f32 %v1605_v45 }
 0x3e8   :  { %v3685_v20 = vpop.eup %3041 }
 0x3e9   :  { %v3687_v36 = vpop.eup %3043 }
 0x3ea   :  { %v3689_v29 = vpop.eup %3045 }
 0x3eb   :  { %v3691_v53 = vpop.eup %3047 }
 0x3ec   :  { %v3693_v55 = vpop.eup %3049 }
 0x3ed   :  { %v3052_v48 = vpop.eup %3051 }
 0x3ee   :  { %v3695_v25 = vpop.eup %3053 }
 0x3ef   :  { %v3697_v28 = vpop.eup %3055 }
 0x3f0   :  { %3201 = dma.done.wait [#allocation6 + $0x2], 16384 }
 0x3f1   :  { %3202 = vsyncadd [#allocation6 + $0x2], 4294950912 }
 0x3f2   :  { %3203 = dma.done.wait [#allocation6 + $0x3], 16384 }
 0x3f3   :  { %3204 = vsyncadd [#allocation6 + $0x3], 4294950912  ;;  %v1879_v22 = vpack.c.bf16 %v3052_v48, %v3052_v48  ;;  %v1747_v13 = vld [vmem:[#allocation5 + $0x8] sm:$0xff]  ;;  %v1749_v33 = vld [vmem:[#allocation5 + $0x18] sm:$0xff] }
 0x3f4   :  { %v1746_v17 = vld [vmem:[#allocation5] sm:$0xff]  ;;  %1882 = vmatprep.subr.bf16.mxu0 %v1747_v13  ;;  %1964 = vmatprep.subr.bf16.mxu1 %v1749_v33  ;;  %v1748_v40 = vld [vmem:[#allocation5 + $0x10] sm:$0xff]  ;;  %v1751_v14 = vld [vmem:[#allocation5 + $0x28] sm:$0xff] }
 0x3f5   :  { %1914 = vmatprep.mubr.bf16.mxu0 %v1879_v22  ;;  %1996 = vmatprep.mubr.bf16.mxu1 %v1879_v22  ;;  %v1753_v34 = vld [vmem:[#allocation5 + $0x38] sm:$0xff]  ;;  %v1750_v26 = vld [vmem:[#allocation5 + $0x20] sm:$0xff]  ;;  %v1752_v18 = vld [vmem:[#allocation5 + $0x30] sm:$0xff] }
 0x3f6   :  { %1883 = vmatpush1.bf16.msra.mxu0 %v1746_v17  ;;  %1965 = vmatpush1.bf16.msra.mxu1 %v1748_v40  ;;  %v1755_v31 = vld [vmem:[#allocation5 + $0x48] sm:$0xff]  ;;  %v1757_v51 = vld [vmem:[#allocation5 + $0x58] sm:$0xff]  ;;  %v1754_v54 = vld [vmem:[#allocation5 + $0x40] sm:$0xff] }
 0x3f7   :  { %1884 = vmatprep.subr.bf16.mxu0 %v1751_v14  ;;  %1966 = vmatprep.subr.bf16.mxu1 %v1753_v34  ;;  %v1756_v41 = vld [vmem:[#allocation5 + $0x50] sm:$0xff]  ;;  %v1759_v32 = vld [vmem:[#allocation5 + $0x68] sm:$0xff]  ;;  %v1761_v15 = vld [vmem:[#allocation5 + $0x78] sm:$0xff] }
 0x3f8   :  { %v1758_v38 = vld [vmem:[#allocation5 + $0x60] sm:$0xff]  ;;  %v1760_v56 = vld [vmem:[#allocation5 + $0x70] sm:$0xff]  ;;  %v1763_v35 = vld [vmem:[#allocation5 + $0x88] sm:$0xff] }
 0x3f9   :  { %v1765_v19 = vld [vmem:[#allocation5 + $0x98] sm:$0xff]  ;;  %v1762_v24 = vld [vmem:[#allocation5 + $0x80] sm:$0xff]  ;;  %v1764_v16 = vld [vmem:[#allocation5 + $0x90] sm:$0xff] }
 0x3fa   :  { %1885 = vmatpush1.bf16.msra.mxu0 %v1750_v26  ;;  %1967 = vmatpush1.bf16.msra.mxu1 %v1752_v18  ;;  %v1767_v52 = vld [vmem:[#allocation5 + $0xa8] sm:$0xff]  ;;  %v1769_v46 = vld [vmem:[#allocation5 + $0xb8] sm:$0xff]  ;;  %v1766_v58 = vld [vmem:[#allocation5 + $0xa0] sm:$0xff] }
 0x3fb   :  { %1886 = vmatprep.subr.bf16.mxu0 %v1755_v31  ;;  %1968 = vmatprep.subr.bf16.mxu1 %v1757_v51  ;;  %v1768_v23 = vld [vmem:[#allocation5 + $0xb0] sm:$0xff]  ;;  %v1771_v47 = vld [vmem:[#allocation5 + $0xc8] sm:$0xff]  ;;  %v1773_v62 = vld [vmem:[#allocation5 + $0xd8] sm:$0xff] }
 0x3fc   :  { %v1770_v63 = vld [vmem:[#allocation5 + $0xc0] sm:$0xff]  ;;  %v1772_v0 = vld [vmem:[#allocation5 + $0xd0] sm:$0xff]  ;;  %v1775_v1 = vld [vmem:[#allocation5 + $0xe8] sm:$0xff] }
 0x3fd   :  { %v1777_v2 = vld [vmem:[#allocation5 + $0xf8] sm:$0xff]  ;;  %v1774_v3 = vld [vmem:[#allocation5 + $0xe0] sm:$0xff]  ;;  %v1776_v42 = vld [vmem:[#allocation5 + $0xf0] sm:$0xff] }
 0x3fe   :  { %1887 = vmatpush1.bf16.msra.mxu0 %v1754_v54  ;;  %1969 = vmatpush1.bf16.msra.mxu1 %v1756_v41  ;;  %v1779_v30 = vld [vmem:[#allocation5 + $0x108] sm:$0xff]  ;;  %v1781_v4 = vld [vmem:[#allocation5 + $0x118] sm:$0xff]  ;;  %v1778_v5 = vld [vmem:[#allocation5 + $0x100] sm:$0xff] }
 0x3ff   :  { %1888 = vmatprep.subr.bf16.mxu0 %v1759_v32  ;;  %1970 = vmatprep.subr.bf16.mxu1 %v1761_v15  ;;  %v1780_v6 = vld [vmem:[#allocation5 + $0x110] sm:$0xff]  ;;  %v1783_v44 = vld [vmem:[#allocation5 + $0x128] sm:$0xff]  ;;  %v1785_v49 = vld [vmem:[#allocation5 + $0x138] sm:$0xff] }
 0x400   :  { %v1782_v7 = vld [vmem:[#allocation5 + $0x120] sm:$0xff]  ;;  %v1784_v8 = vld [vmem:[#allocation5 + $0x130] sm:$0xff]  ;;  %v1787_v9 = vld [vmem:[#allocation5 + $0x148] sm:$0xff] }
 0x401   :  { %v1789_v10 = vld [vmem:[#allocation5 + $0x158] sm:$0xff]  ;;  %v1786_v11 = vld [vmem:[#allocation5 + $0x140] sm:$0xff]  ;;  %v1788_v12 = vld [vmem:[#allocation5 + $0x150] sm:$0xff] }
 0x402   :  { %1889 = vmatpush1.bf16.msra.mxu0 %v1758_v38  ;;  %1971 = vmatpush1.bf16.msra.mxu1 %v1760_v56  ;;  %v1791_v27 = vld [vmem:[#allocation5 + $0x168] sm:$0xff]  ;;  %v1793_v21 = vld [vmem:[#allocation5 + $0x178] sm:$0xff]  ;;  %v1790_v37 = vld [vmem:[#allocation5 + $0x160] sm:$0xff]  ;;  %v1878_v38 = vpack.c.bf16 %v3693_v55, %v3693_v55 }
 0x403   :  { %1890 = vmatprep.subr.bf16.mxu0 %v1763_v35  ;;  %1972 = vmatprep.subr.bf16.mxu1 %v1765_v19  ;;  %v1792_v39 = vld [vmem:[#allocation5 + $0x170] sm:$0xff]  ;;  %v1795_v43 = vld [vmem:[#allocation5 + $0x188] sm:$0xff]  ;;  %v1797_v45 = vld [vmem:[#allocation5 + $0x198] sm:$0xff] }
 0x404   :  { %v1794_v48 = vld [vmem:[#allocation5 + $0x180] sm:$0xff]  ;;  %v1796_v22 = vld [vmem:[#allocation5 + $0x190] sm:$0xff]  ;;  %v1799_v13 = vld [vmem:[#allocation5 + $0x1a8] sm:$0xff] }
 0x405   :  { %v1801_v33 = vld [vmem:[#allocation5 + $0x1b8] sm:$0xff]  ;;  %v1798_v17 = vld [vmem:[#allocation5 + $0x1a0] sm:$0xff]  ;;  %v1800_v40 = vld [vmem:[#allocation5 + $0x1b0] sm:$0xff] }
 0x406   :  { %1891 = vmatpush1.bf16.msra.mxu0 %v1762_v24  ;;  %1973 = vmatpush1.bf16.msra.mxu1 %v1764_v16  ;;  %v1803_v14 = vld [vmem:[#allocation5 + $0x1c8] sm:$0xff]  ;;  %v1805_v34 = vld [vmem:[#allocation5 + $0x1d8] sm:$0xff]  ;;  %v1802_v26 = vld [vmem:[#allocation5 + $0x1c0] sm:$0xff]  ;;  %v1881_v16 = vpack.c.bf16 %v3697_v28, %v3697_v28 }
 0x407   :  { %1892 = vmatprep.subr.bf16.mxu0 %v1767_v52  ;;  %1974 = vmatprep.subr.bf16.mxu1 %v1769_v46  ;;  %v1804_v18 = vld [vmem:[#allocation5 + $0x1d0] sm:$0xff]  ;;  %v1807_v31 = vld [vmem:[#allocation5 + $0x1e8] sm:$0xff]  ;;  %v1809_v51 = vld [vmem:[#allocation5 + $0x1f8] sm:$0xff] }
 0x408   :  { %v1806_v54 = vld [vmem:[#allocation5 + $0x1e0] sm:$0xff]  ;;  %v1808_v41 = vld [vmem:[#allocation5 + $0x1f0] sm:$0xff]  ;;  %v1811_v32 = vld [vmem:[#allocation5 + $0x208] sm:$0xff] }
 0x409   :  { %v1813_v15 = vld [vmem:[#allocation5 + $0x218] sm:$0xff]  ;;  %v1810_v56 = vld [vmem:[#allocation5 + $0x200] sm:$0xff]  ;;  %v1812_v35 = vld [vmem:[#allocation5 + $0x210] sm:$0xff] }
 0x40a   :  { %1893 = vmatpush1.bf16.msra.mxu0 %v1766_v58  ;;  %1975 = vmatpush1.bf16.msra.mxu1 %v1768_v23  ;;  %v1815_v19 = vld [vmem:[#allocation5 + $0x228] sm:$0xff]  ;;  %v1817_v24 = vld [vmem:[#allocation5 + $0x238] sm:$0xff]  ;;  %v1814_v52 = vld [vmem:[#allocation5 + $0x220] sm:$0xff] }
 0x40b   :  { %1894 = vmatprep.subr.bf16.mxu0 %v1771_v47  ;;  %1976 = vmatprep.subr.bf16.mxu1 %v1773_v62  ;;  %v1816_v46 = vld [vmem:[#allocation5 + $0x230] sm:$0xff]  ;;  %v1819_v55 = vld [vmem:[#allocation5 + $0x248] sm:$0xff]  ;;  %v1821_v58 = vld [vmem:[#allocation5 + $0x258] sm:$0xff] }
 0x40c   :  { %v1818_v23 = vld [vmem:[#allocation5 + $0x240] sm:$0xff]  ;;  %v1820_v47 = vld [vmem:[#allocation5 + $0x250] sm:$0xff]  ;;  %v1823_v62 = vld [vmem:[#allocation5 + $0x268] sm:$0xff] }
 0x40d   :  { %v1825_v28 = vld [vmem:[#allocation5 + $0x278] sm:$0xff] }
 0x40e   :  { %1895 = vmatpush1.bf16.msra.mxu0 %v1770_v63  ;;  %1977 = vmatpush1.bf16.msra.mxu1 %v1772_v0  ;;  %v1822_v63 = vld [vmem:[#allocation5 + $0x260] sm:$0xff]  ;;  %v1824_v0 = vld [vmem:[#allocation5 + $0x270] sm:$0xff] }
 0x40f   :  { %1896 = vmatprep.subr.bf16.mxu0 %v1775_v1  ;;  %1978 = vmatprep.subr.bf16.mxu1 %v1777_v2  ;;  %v1827_v1 = vld [vmem:[#allocation5 + $0x288] sm:$0xff]  ;;  %v1829_v2 = vld [vmem:[#allocation5 + $0x298] sm:$0xff] }
 0x412   :  { %1897 = vmatpush1.bf16.msra.mxu0 %v1774_v3  ;;  %1979 = vmatpush1.bf16.msra.mxu1 %v1776_v42  ;;  %v1826_v3 = vld [vmem:[#allocation5 + $0x280] sm:$0xff]  ;;  %v1828_v42 = vld [vmem:[#allocation5 + $0x290] sm:$0xff] }
 0x413   :  { %1898 = vmatprep.subr.bf16.mxu0 %v1779_v30  ;;  %1980 = vmatprep.subr.bf16.mxu1 %v1781_v4  ;;  %v1831_v30 = vld [vmem:[#allocation5 + $0x2a8] sm:$0xff]  ;;  %v1833_v4 = vld [vmem:[#allocation5 + $0x2b8] sm:$0xff] }
 0x416   :  { %1899 = vmatpush1.bf16.msra.mxu0 %v1778_v5  ;;  %1981 = vmatpush1.bf16.msra.mxu1 %v1780_v6  ;;  %v1830_v5 = vld [vmem:[#allocation5 + $0x2a0] sm:$0xff]  ;;  %v1832_v6 = vld [vmem:[#allocation5 + $0x2b0] sm:$0xff] }
 0x417   :  { %1900 = vmatprep.subr.bf16.mxu0 %v1783_v44  ;;  %1982 = vmatprep.subr.bf16.mxu1 %v1785_v49  ;;  %v1835_v44 = vld [vmem:[#allocation5 + $0x2c8] sm:$0xff]  ;;  %v1837_v49 = vld [vmem:[#allocation5 + $0x2d8] sm:$0xff] }
 0x41a   :  { %1901 = vmatpush1.bf16.msra.mxu0 %v1782_v7  ;;  %1983 = vmatpush1.bf16.msra.mxu1 %v1784_v8  ;;  %v1834_v7 = vld [vmem:[#allocation5 + $0x2c0] sm:$0xff]  ;;  %v1836_v8 = vld [vmem:[#allocation5 + $0x2d0] sm:$0xff] }
 0x41b   :  { %1902 = vmatprep.subr.bf16.mxu0 %v1787_v9  ;;  %1984 = vmatprep.subr.bf16.mxu1 %v1789_v10  ;;  %v1839_v9 = vld [vmem:[#allocation5 + $0x2e8] sm:$0xff]  ;;  %v1841_v10 = vld [vmem:[#allocation5 + $0x2f8] sm:$0xff] }
 0x41e   :  { %1903 = vmatpush1.bf16.msra.mxu0 %v1786_v11  ;;  %1985 = vmatpush1.bf16.msra.mxu1 %v1788_v12  ;;  %v1838_v11 = vld [vmem:[#allocation5 + $0x2e0] sm:$0xff]  ;;  %v1840_v12 = vld [vmem:[#allocation5 + $0x2f0] sm:$0xff] }
 0x41f   :  { %1904 = vmatprep.subr.bf16.mxu0 %v1791_v27  ;;  %1986 = vmatprep.subr.bf16.mxu1 %v1793_v21  ;;  %v1843_v27 = vld [vmem:[#allocation5 + $0x308] sm:$0xff]  ;;  %v1845_v21 = vld [vmem:[#allocation5 + $0x318] sm:$0xff] }
 0x422   :  { %1905 = vmatpush1.bf16.msra.mxu0 %v1790_v37  ;;  %1987 = vmatpush1.bf16.msra.mxu1 %v1792_v39  ;;  %v1842_v37 = vld [vmem:[#allocation5 + $0x300] sm:$0xff]  ;;  %v1844_v39 = vld [vmem:[#allocation5 + $0x310] sm:$0xff] }
 0x423   :  { %1906 = vmatprep.subr.bf16.mxu0 %v1795_v43  ;;  %1988 = vmatprep.subr.bf16.mxu1 %v1797_v45  ;;  %v1847_v43 = vld [vmem:[#allocation5 + $0x328] sm:$0xff]  ;;  %v1849_v45 = vld [vmem:[#allocation5 + $0x338] sm:$0xff] }
 0x426   :  { %1907 = vmatpush1.bf16.msra.mxu0 %v1794_v48  ;;  %1989 = vmatpush1.bf16.msra.mxu1 %v1796_v22  ;;  %v1846_v48 = vld [vmem:[#allocation5 + $0x320] sm:$0xff]  ;;  %v1848_v22 = vld [vmem:[#allocation5 + $0x330] sm:$0xff] }
 0x427   :  { %1908 = vmatprep.subr.bf16.mxu0 %v1799_v13  ;;  %1990 = vmatprep.subr.bf16.mxu1 %v1801_v33  ;;  %v1851_v13 = vld [vmem:[#allocation5 + $0x348] sm:$0xff]  ;;  %v1853_v33 = vld [vmem:[#allocation5 + $0x358] sm:$0xff] }
 0x42a   :  { %1909 = vmatpush1.bf16.msra.mxu0 %v1798_v17  ;;  %1991 = vmatpush1.bf16.msra.mxu1 %v1800_v40  ;;  %v1850_v17 = vld [vmem:[#allocation5 + $0x340] sm:$0xff]  ;;  %v1852_v40 = vld [vmem:[#allocation5 + $0x350] sm:$0xff] }
 0x42b   :  { %1910 = vmatprep.subr.bf16.mxu0 %v1803_v14  ;;  %1992 = vmatprep.subr.bf16.mxu1 %v1805_v34  ;;  %v1855_v14 = vld [vmem:[#allocation5 + $0x368] sm:$0xff]  ;;  %v1857_v34 = vld [vmem:[#allocation5 + $0x378] sm:$0xff] }
 0x42e   :  { %1911 = vmatpush1.bf16.msra.mxu0 %v1802_v26  ;;  %1993 = vmatpush1.bf16.msra.mxu1 %v1804_v18  ;;  %v1854_v26 = vld [vmem:[#allocation5 + $0x360] sm:$0xff]  ;;  %v1856_v18 = vld [vmem:[#allocation5 + $0x370] sm:$0xff] }
 0x42f   :  { %1912 = vmatprep.subr.bf16.mxu0 %v1807_v31  ;;  %1994 = vmatprep.subr.bf16.mxu1 %v1809_v51  ;;  %v1859_v31 = vld [vmem:[#allocation5 + $0x388] sm:$0xff]  ;;  %v1861_v51 = vld [vmem:[#allocation5 + $0x398] sm:$0xff] }
 0x432   :  { %1913 = vmatpush1.bf16.msra.mxu0 %v1806_v54  ;;  %1995 = vmatpush1.bf16.msra.mxu1 %v1808_v41  ;;  %v1858_v54 = vld [vmem:[#allocation5 + $0x380] sm:$0xff]  ;;  %v1860_v41 = vld [vmem:[#allocation5 + $0x390] sm:$0xff] }
 0x433   :  { %1923 = vmatprep.subr.bf16.mxu0 %v1811_v32  ;;  %2005 = vmatprep.subr.bf16.mxu1 %v1813_v15  ;;  %v1863_v32 = vld [vmem:[#allocation5 + $0x3a8] sm:$0xff]  ;;  %v1865_v15 = vld [vmem:[#allocation5 + $0x3b8] sm:$0xff] }
 0x435   :  { %1915 = vmatmul.mubr.bf16.vlgmr.msra.gmra.mrb[12].mxu0 %v1878_v38  ;;  %1997 = vmatmul.mubr.bf16.vlgmr.msra.gmra.mrb[12].mxu1 %v1878_v38  ;;  %v1862_v38 = vld [vmem:[#allocation5 + $0x3a0] sm:$0xff] }
 0x436   :  { %1924 = vmatpush1.bf16.msra.mxu0 %v1810_v56  ;;  %2006 = vmatpush1.bf16.msra.mxu1 %v1812_v35  ;;  %v1864_v56 = vld [vmem:[#allocation5 + $0x3b0] sm:$0xff]  ;;  %v1867_v35 = vld [vmem:[#allocation5 + $0x3c8] sm:$0xff] }
 0x437   :  { %1925 = vmatprep.subr.bf16.mxu0 %v1815_v19  ;;  %2007 = vmatprep.subr.bf16.mxu1 %v1817_v24  ;;  %v1869_v19 = vld [vmem:[#allocation5 + $0x3d8] sm:$0xff]  ;;  %v1866_v24 = vld [vmem:[#allocation5 + $0x3c0] sm:$0xff] }
 0x438   :  { %1955 = vmatprep.mubr.bf16.mxu0 %v1881_v16  ;;  %2037 = vmatprep.mubr.bf16.mxu1 %v1881_v16  ;;  %v1868_v16 = vld [vmem:[#allocation5 + $0x3d0] sm:$0xff] }
 0x43a   :  { %1926 = vmatpush1.bf16.msra.mxu0 %v1814_v52  ;;  %2008 = vmatpush1.bf16.msra.mxu1 %v1816_v46  ;;  %v1871_v52 = vld [vmem:[#allocation5 + $0x3e8] sm:$0xff]  ;;  %v1873_v46 = vld [vmem:[#allocation5 + $0x3f8] sm:$0xff] }
 0x43b   :  { %1927 = vmatprep.subr.bf16.mxu0 %v1819_v55  ;;  %2009 = vmatprep.subr.bf16.mxu1 %v1821_v58  ;;  %v1870_v55 = vld [vmem:[#allocation5 + $0x3e0] sm:$0xff]  ;;  %v1872_v58 = vld [vmem:[#allocation5 + $0x3f0] sm:$0xff] }
 0x43e   :  { %1928 = vmatpush1.bf16.msra.mxu0 %v1818_v23  ;;  %2010 = vmatpush1.bf16.msra.mxu1 %v1820_v47  ;;  %v1619_v23 = vld [vmem:[#allocation4 + $0x8] sm:$0xff]  ;;  %v1621_v47 = vld [vmem:[#allocation4 + $0x18] sm:$0xff] }
 0x43f   :  { %1929 = vmatprep.subr.bf16.mxu0 %v1823_v62  ;;  %2011 = vmatprep.subr.bf16.mxu1 %v1825_v28  ;;  %v1880_v62 = vpack.c.bf16 %v3695_v25, %v3695_v25  ;;  %v1618_v28 = vld [vmem:[#allocation4] sm:$0xff]  ;;  %v1627_v25 = vld [vmem:[#allocation4 + $0x48] sm:$0xff] }
 0x442   :  { %1930 = vmatpush1.bf16.msra.mxu0 %v1822_v63  ;;  %2012 = vmatpush1.bf16.msra.mxu1 %v1824_v0  ;;  %v1620_v63 = vld [vmem:[#allocation4 + $0x10] sm:$0xff]  ;;  %v1623_v0 = vld [vmem:[#allocation4 + $0x28] sm:$0xff] }
 0x443   :  { %1931 = vmatprep.subr.bf16.mxu0 %v1827_v1  ;;  %2013 = vmatprep.subr.bf16.mxu1 %v1829_v2  ;;  %v1625_v1 = vld [vmem:[#allocation4 + $0x38] sm:$0xff]  ;;  %v1875_v2 = vpack.c.bf16 %v3687_v36, %v3687_v36 }
 0x444   :  { %v1633_v36 = vld [vmem:[#allocation4 + $0x78] sm:$0xff] }
 0x446   :  { %1932 = vmatpush1.bf16.msra.mxu0 %v1826_v3  ;;  %2014 = vmatpush1.bf16.msra.mxu1 %v1828_v42  ;;  %v1622_v3 = vld [vmem:[#allocation4 + $0x20] sm:$0xff]  ;;  %v1624_v42 = vld [vmem:[#allocation4 + $0x30] sm:$0xff] }
 0x447   :  { %1933 = vmatprep.subr.bf16.mxu0 %v1831_v30  ;;  %2015 = vmatprep.subr.bf16.mxu1 %v1833_v4  ;;  %v1629_v30 = vld [vmem:[#allocation4 + $0x58] sm:$0xff]  ;;  %v1626_v4 = vld [vmem:[#allocation4 + $0x40] sm:$0xff] }
 0x44a   :  { %1934 = vmatpush1.bf16.msra.mxu0 %v1830_v5  ;;  %2016 = vmatpush1.bf16.msra.mxu1 %v1832_v6  ;;  %v1628_v5 = vld [vmem:[#allocation4 + $0x50] sm:$0xff]  ;;  %v1631_v6 = vld [vmem:[#allocation4 + $0x68] sm:$0xff] }
 0x44b   :  { %1935 = vmatprep.subr.bf16.mxu0 %v1835_v44  ;;  %2017 = vmatprep.subr.bf16.mxu1 %v1837_v49  ;;  %v1630_v44 = vld [vmem:[#allocation4 + $0x60] sm:$0xff]  ;;  %v1632_v49 = vld [vmem:[#allocation4 + $0x70] sm:$0xff] }
 0x44e   :  { %1936 = vmatpush1.bf16.msra.mxu0 %v1834_v7  ;;  %2018 = vmatpush1.bf16.msra.mxu1 %v1836_v8  ;;  %v1635_v7 = vld [vmem:[#allocation4 + $0x88] sm:$0xff]  ;;  %v1637_v8 = vld [vmem:[#allocation4 + $0x98] sm:$0xff] }
 0x44f   :  { %1937 = vmatprep.subr.bf16.mxu0 %v1839_v9  ;;  %2019 = vmatprep.subr.bf16.mxu1 %v1841_v10  ;;  %v1634_v9 = vld [vmem:[#allocation4 + $0x80] sm:$0xff]  ;;  %v1636_v10 = vld [vmem:[#allocation4 + $0x90] sm:$0xff] }
 0x452   :  { %1938 = vmatpush1.bf16.msra.mxu0 %v1838_v11  ;;  %2020 = vmatpush1.bf16.msra.mxu1 %v1840_v12  ;;  %v1639_v11 = vld [vmem:[#allocation4 + $0xa8] sm:$0xff]  ;;  %v1641_v12 = vld [vmem:[#allocation4 + $0xb8] sm:$0xff] }
 0x453   :  { %1939 = vmatprep.subr.bf16.mxu0 %v1843_v27  ;;  %2021 = vmatprep.subr.bf16.mxu1 %v1845_v21  ;;  %v1638_v27 = vld [vmem:[#allocation4 + $0xa0] sm:$0xff]  ;;  %v1640_v21 = vld [vmem:[#allocation4 + $0xb0] sm:$0xff] }
 0x456   :  { %1940 = vmatpush1.bf16.msra.mxu0 %v1842_v37  ;;  %2022 = vmatpush1.bf16.msra.mxu1 %v1844_v39  ;;  %v1643_v37 = vld [vmem:[#allocation4 + $0xc8] sm:$0xff]  ;;  %v1645_v39 = vld [vmem:[#allocation4 + $0xd8] sm:$0xff] }
 0x457   :  { %1941 = vmatprep.subr.bf16.mxu0 %v1847_v43  ;;  %2023 = vmatprep.subr.bf16.mxu1 %v1849_v45  ;;  %v1642_v43 = vld [vmem:[#allocation4 + $0xc0] sm:$0xff]  ;;  %v1644_v45 = vld [vmem:[#allocation4 + $0xd0] sm:$0xff] }
 0x45a   :  { %1942 = vmatpush1.bf16.msra.mxu0 %v1846_v48  ;;  %2024 = vmatpush1.bf16.msra.mxu1 %v1848_v22  ;;  %v1647_v48 = vld [vmem:[#allocation4 + $0xe8] sm:$0xff]  ;;  %v1649_v22 = vld [vmem:[#allocation4 + $0xf8] sm:$0xff] }
 0x45b   :  { %1943 = vmatprep.subr.bf16.mxu0 %v1851_v13  ;;  %2025 = vmatprep.subr.bf16.mxu1 %v1853_v33  ;;  %v1646_v13 = vld [vmem:[#allocation4 + $0xe0] sm:$0xff]  ;;  %v1648_v33 = vld [vmem:[#allocation4 + $0xf0] sm:$0xff] }
 0x45e   :  { %1944 = vmatpush1.bf16.msra.mxu0 %v1850_v17  ;;  %2026 = vmatpush1.bf16.msra.mxu1 %v1852_v40  ;;  %v1651_v17 = vld [vmem:[#allocation4 + $0x108] sm:$0xff]  ;;  %v1653_v40 = vld [vmem:[#allocation4 + $0x118] sm:$0xff] }
 0x45f   :  { %1945 = vmatprep.subr.bf16.mxu0 %v1855_v14  ;;  %2027 = vmatprep.subr.bf16.mxu1 %v1857_v34  ;;  %v1650_v14 = vld [vmem:[#allocation4 + $0x100] sm:$0xff]  ;;  %v1652_v34 = vld [vmem:[#allocation4 + $0x110] sm:$0xff] }
 0x462   :  { %1946 = vmatpush1.bf16.msra.mxu0 %v1854_v26  ;;  %2028 = vmatpush1.bf16.msra.mxu1 %v1856_v18  ;;  %v1655_v26 = vld [vmem:[#allocation4 + $0x128] sm:$0xff]  ;;  %v1657_v18 = vld [vmem:[#allocation4 + $0x138] sm:$0xff] }
 0x463   :  { %1947 = vmatprep.subr.bf16.mxu0 %v1859_v31  ;;  %2029 = vmatprep.subr.bf16.mxu1 %v1861_v51  ;;  %v1654_v31 = vld [vmem:[#allocation4 + $0x120] sm:$0xff]  ;;  %v1656_v51 = vld [vmem:[#allocation4 + $0x130] sm:$0xff] }
 0x466   :  { %1948 = vmatpush1.bf16.msra.mxu0 %v1858_v54  ;;  %2030 = vmatpush1.bf16.msra.mxu1 %v1860_v41  ;;  %v1659_v54 = vld [vmem:[#allocation4 + $0x148] sm:$0xff]  ;;  %v1661_v41 = vld [vmem:[#allocation4 + $0x158] sm:$0xff] }
 0x467   :  { %1949 = vmatprep.subr.bf16.mxu0 %v1863_v32  ;;  %2031 = vmatprep.subr.bf16.mxu1 %v1865_v15  ;;  %v1658_v32 = vld [vmem:[#allocation4 + $0x140] sm:$0xff]  ;;  %v1660_v15 = vld [vmem:[#allocation4 + $0x150] sm:$0xff] }
 0x46a   :  { %1950 = vmatpush1.bf16.msra.mxu0 %v1862_v38  ;;  %2032 = vmatpush1.bf16.msra.mxu1 %v1864_v56  ;;  %v1663_v38 = vld [vmem:[#allocation4 + $0x168] sm:$0xff]  ;;  %v1665_v56 = vld [vmem:[#allocation4 + $0x178] sm:$0xff] }
 0x46b   :  { %1951 = vmatprep.subr.bf16.mxu0 %v1867_v35  ;;  %2033 = vmatprep.subr.bf16.mxu1 %v1869_v19  ;;  %v1662_v35 = vld [vmem:[#allocation4 + $0x160] sm:$0xff]  ;;  %v1664_v19 = vld [vmem:[#allocation4 + $0x170] sm:$0xff] }
 0x46e   :  { %1952 = vmatpush1.bf16.msra.mxu0 %v1866_v24  ;;  %2034 = vmatpush1.bf16.msra.mxu1 %v1868_v16  ;;  %v1667_v24 = vld [vmem:[#allocation4 + $0x188] sm:$0xff]  ;;  %v1669_v16 = vld [vmem:[#allocation4 + $0x198] sm:$0xff] }
 0x46f   :  { %1953 = vmatprep.subr.bf16.mxu0 %v1871_v52  ;;  %2035 = vmatprep.subr.bf16.mxu1 %v1873_v46  ;;  %v1666_v52 = vld [vmem:[#allocation4 + $0x180] sm:$0xff]  ;;  %v1668_v46 = vld [vmem:[#allocation4 + $0x190] sm:$0xff] }
 0x472   :  { %1954 = vmatpush1.bf16.msra.mxu0 %v1870_v55  ;;  %2036 = vmatpush1.bf16.msra.mxu1 %v1872_v58  ;;  %v1671_v55 = vld [vmem:[#allocation4 + $0x1a8] sm:$0xff]  ;;  %v1673_v58 = vld [vmem:[#allocation4 + $0x1b8] sm:$0xff] }
 0x473   :  { %2046 = vmatprep.subr.bf16.mxu0 %v1619_v23  ;;  %2128 = vmatprep.subr.bf16.mxu1 %v1621_v47  ;;  %v1670_v23 = vld [vmem:[#allocation4 + $0x1a0] sm:$0xff]  ;;  %v1672_v47 = vld [vmem:[#allocation4 + $0x1b0] sm:$0xff] }
 0x475   :  { %1956 = vmatmul.mubr.bf16.vlgmr.msra.gmra.mrb[12].mxu0 %v1880_v62  ;;  %2038 = vmatmul.mubr.bf16.vlgmr.msra.gmra.mrb[12].mxu1 %v1880_v62  ;;  %v1675_v62 = vld [vmem:[#allocation4 + $0x1c8] sm:$0xff] }
 0x476   :  { %2047 = vmatpush1.bf16.msra.mxu0 %v1618_v28  ;;  %2129 = vmatpush1.bf16.msra.mxu1 %v1620_v63  ;;  %v1677_v28 = vld [vmem:[#allocation4 + $0x1d8] sm:$0xff]  ;;  %v1674_v63 = vld [vmem:[#allocation4 + $0x1c0] sm:$0xff] }
 0x477   :  { %2048 = vmatprep.subr.bf16.mxu0 %v1623_v0  ;;  %2130 = vmatprep.subr.bf16.mxu1 %v1625_v1  ;;  %v1676_v0 = vld [vmem:[#allocation4 + $0x1d0] sm:$0xff]  ;;  %v1679_v1 = vld [vmem:[#allocation4 + $0x1e8] sm:$0xff] }
 0x478   :  { %2078 = vmatprep.mubr.bf16.mxu0 %v1875_v2  ;;  %2160 = vmatprep.mubr.bf16.mxu1 %v1875_v2  ;;  %v1681_v2 = vld [vmem:[#allocation4 + $0x1f8] sm:$0xff] }
 0x47a   :  { %2049 = vmatpush1.bf16.msra.mxu0 %v1622_v3  ;;  %2131 = vmatpush1.bf16.msra.mxu1 %v1624_v42  ;;  %v1678_v3 = vld [vmem:[#allocation4 + $0x1e0] sm:$0xff]  ;;  %v1680_v42 = vld [vmem:[#allocation4 + $0x1f0] sm:$0xff] }
 0x47b   :  { %2050 = vmatprep.subr.bf16.mxu0 %v1627_v25  ;;  %2132 = vmatprep.subr.bf16.mxu1 %v1629_v30  ;;  %v1683_v25 = vld [vmem:[#allocation4 + $0x208] sm:$0xff]  ;;  %v1685_v30 = vld [vmem:[#allocation4 + $0x218] sm:$0xff] }
 0x47e   :  { %2051 = vmatpush1.bf16.msra.mxu0 %v1626_v4  ;;  %2133 = vmatpush1.bf16.msra.mxu1 %v1628_v5  ;;  %v1874_v4 = vpack.c.bf16 %v3685_v20, %v3685_v20  ;;  %v1682_v5 = vld [vmem:[#allocation4 + $0x200] sm:$0xff]  ;;  %v1691_v20 = vld [vmem:[#allocation4 + $0x248] sm:$0xff] }
 0x47f   :  { %2052 = vmatprep.subr.bf16.mxu0 %v1631_v6  ;;  %2134 = vmatprep.subr.bf16.mxu1 %v1633_v36  ;;  %v1684_v6 = vld [vmem:[#allocation4 + $0x210] sm:$0xff]  ;;  %v1687_v36 = vld [vmem:[#allocation4 + $0x228] sm:$0xff] }
 0x482   :  { %2053 = vmatpush1.bf16.msra.mxu0 %v1630_v44  ;;  %2135 = vmatpush1.bf16.msra.mxu1 %v1632_v49  ;;  %v1689_v44 = vld [vmem:[#allocation4 + $0x238] sm:$0xff]  ;;  %v1877_v49 = vpack.c.bf16 %v3691_v53, %v3691_v53 }
 0x483   :  { %2054 = vmatprep.subr.bf16.mxu0 %v1635_v7  ;;  %2136 = vmatprep.subr.bf16.mxu1 %v1637_v8  ;;  %v1686_v7 = vld [vmem:[#allocation4 + $0x220] sm:$0xff]  ;;  %v1688_v8 = vld [vmem:[#allocation4 + $0x230] sm:$0xff]  ;;  %v1697_v53 = vld [vmem:[#allocation4 + $0x278] sm:$0xff] }
 0x486   :  { %2055 = vmatpush1.bf16.msra.mxu0 %v1634_v9  ;;  %2137 = vmatpush1.bf16.msra.mxu1 %v1636_v10  ;;  %v1693_v9 = vld [vmem:[#allocation4 + $0x258] sm:$0xff]  ;;  %v1690_v10 = vld [vmem:[#allocation4 + $0x240] sm:$0xff] }
 0x487   :  { %2056 = vmatprep.subr.bf16.mxu0 %v1639_v11  ;;  %2138 = vmatprep.subr.bf16.mxu1 %v1641_v12  ;;  %v1692_v11 = vld [vmem:[#allocation4 + $0x250] sm:$0xff]  ;;  %v1695_v12 = vld [vmem:[#allocation4 + $0x268] sm:$0xff] }
 0x48a   :  { %2057 = vmatpush1.bf16.msra.mxu0 %v1638_v27  ;;  %2139 = vmatpush1.bf16.msra.mxu1 %v1640_v21  ;;  %v1694_v27 = vld [vmem:[#allocation4 + $0x260] sm:$0xff]  ;;  %v1696_v21 = vld [vmem:[#allocation4 + $0x270] sm:$0xff] }
 0x48b   :  { %2058 = vmatprep.subr.bf16.mxu0 %v1643_v37  ;;  %2140 = vmatprep.subr.bf16.mxu1 %v1645_v39  ;;  %v1699_v37 = vld [vmem:[#allocation4 + $0x288] sm:$0xff]  ;;  %v1701_v39 = vld [vmem:[#allocation4 + $0x298] sm:$0xff] }
 0x48e   :  { %2059 = vmatpush1.bf16.msra.mxu0 %v1642_v43  ;;  %2141 = vmatpush1.bf16.msra.mxu1 %v1644_v45  ;;  %v1698_v43 = vld [vmem:[#allocation4 + $0x280] sm:$0xff]  ;;  %v1700_v45 = vld [vmem:[#allocation4 + $0x290] sm:$0xff] }
 0x48f   :  { %2060 = vmatprep.subr.bf16.mxu0 %v1647_v48  ;;  %2142 = vmatprep.subr.bf16.mxu1 %v1649_v22  ;;  %v1703_v48 = vld [vmem:[#allocation4 + $0x2a8] sm:$0xff]  ;;  %v1705_v22 = vld [vmem:[#allocation4 + $0x2b8] sm:$0xff] }
 0x492   :  { %2061 = vmatpush1.bf16.msra.mxu0 %v1646_v13  ;;  %2143 = vmatpush1.bf16.msra.mxu1 %v1648_v33  ;;  %v1702_v13 = vld [vmem:[#allocation4 + $0x2a0] sm:$0xff]  ;;  %v1704_v33 = vld [vmem:[#allocation4 + $0x2b0] sm:$0xff] }
 0x493   :  { %2062 = vmatprep.subr.bf16.mxu0 %v1651_v17  ;;  %2144 = vmatprep.subr.bf16.mxu1 %v1653_v40  ;;  %v1707_v17 = vld [vmem:[#allocation4 + $0x2c8] sm:$0xff]  ;;  %v1709_v40 = vld [vmem:[#allocation4 + $0x2d8] sm:$0xff] }
 0x496   :  { %2063 = vmatpush1.bf16.msra.mxu0 %v1650_v14  ;;  %2145 = vmatpush1.bf16.msra.mxu1 %v1652_v34  ;;  %v1706_v14 = vld [vmem:[#allocation4 + $0x2c0] sm:$0xff]  ;;  %v1708_v34 = vld [vmem:[#allocation4 + $0x2d0] sm:$0xff] }
 0x497   :  { %2064 = vmatprep.subr.bf16.mxu0 %v1655_v26  ;;  %2146 = vmatprep.subr.bf16.mxu1 %v1657_v18  ;;  %v1711_v26 = vld [vmem:[#allocation4 + $0x2e8] sm:$0xff]  ;;  %v1713_v18 = vld [vmem:[#allocation4 + $0x2f8] sm:$0xff] }
 0x49a   :  { %2065 = vmatpush1.bf16.msra.mxu0 %v1654_v31  ;;  %2147 = vmatpush1.bf16.msra.mxu1 %v1656_v51  ;;  %v1710_v31 = vld [vmem:[#allocation4 + $0x2e0] sm:$0xff]  ;;  %v1712_v51 = vld [vmem:[#allocation4 + $0x2f0] sm:$0xff] }
 0x49b   :  { %2066 = vmatprep.subr.bf16.mxu0 %v1659_v54  ;;  %2148 = vmatprep.subr.bf16.mxu1 %v1661_v41  ;;  %v1715_v54 = vld [vmem:[#allocation4 + $0x308] sm:$0xff]  ;;  %v1717_v41 = vld [vmem:[#allocation4 + $0x318] sm:$0xff] }
 0x49e   :  { %2067 = vmatpush1.bf16.msra.mxu0 %v1658_v32  ;;  %2149 = vmatpush1.bf16.msra.mxu1 %v1660_v15  ;;  %v1714_v32 = vld [vmem:[#allocation4 + $0x300] sm:$0xff]  ;;  %v1716_v15 = vld [vmem:[#allocation4 + $0x310] sm:$0xff] }
 0x49f   :  { %2068 = vmatprep.subr.bf16.mxu0 %v1663_v38  ;;  %2150 = vmatprep.subr.bf16.mxu1 %v1665_v56  ;;  %v1719_v38 = vld [vmem:[#allocation4 + $0x328] sm:$0xff]  ;;  %v1721_v56 = vld [vmem:[#allocation4 + $0x338] sm:$0xff] }
 0x4a2   :  { %2069 = vmatpush1.bf16.msra.mxu0 %v1662_v35  ;;  %2151 = vmatpush1.bf16.msra.mxu1 %v1664_v19  ;;  %v1718_v35 = vld [vmem:[#allocation4 + $0x320] sm:$0xff]  ;;  %v1720_v19 = vld [vmem:[#allocation4 + $0x330] sm:$0xff] }
 0x4a3   :  { %2070 = vmatprep.subr.bf16.mxu0 %v1667_v24  ;;  %2152 = vmatprep.subr.bf16.mxu1 %v1669_v16  ;;  %v1723_v24 = vld [vmem:[#allocation4 + $0x348] sm:$0xff]  ;;  %v1725_v16 = vld [vmem:[#allocation4 + $0x358] sm:$0xff] }
 0x4a6   :  { %2071 = vmatpush1.bf16.msra.mxu0 %v1666_v52  ;;  %2153 = vmatpush1.bf16.msra.mxu1 %v1668_v46  ;;  %v1722_v52 = vld [vmem:[#allocation4 + $0x340] sm:$0xff]  ;;  %v1724_v46 = vld [vmem:[#allocation4 + $0x350] sm:$0xff] }
 0x4a7   :  { %2072 = vmatprep.subr.bf16.mxu0 %v1671_v55  ;;  %2154 = vmatprep.subr.bf16.mxu1 %v1673_v58  ;;  %v1727_v55 = vld [vmem:[#allocation4 + $0x368] sm:$0xff]  ;;  %v1729_v58 = vld [vmem:[#allocation4 + $0x378] sm:$0xff] }
 0x4aa   :  { %2073 = vmatpush1.bf16.msra.mxu0 %v1670_v23  ;;  %2155 = vmatpush1.bf16.msra.mxu1 %v1672_v47  ;;  %v1726_v23 = vld [vmem:[#allocation4 + $0x360] sm:$0xff]  ;;  %v1728_v47 = vld [vmem:[#allocation4 + $0x370] sm:$0xff] }
 0x4ab   :  { %2074 = vmatprep.subr.bf16.mxu0 %v1675_v62  ;;  %2156 = vmatprep.subr.bf16.mxu1 %v1677_v28  ;;  %v1731_v62 = vld [vmem:[#allocation4 + $0x388] sm:$0xff]  ;;  %v1733_v28 = vld [vmem:[#allocation4 + $0x398] sm:$0xff] }
 0x4ae   :  { %2075 = vmatpush1.bf16.msra.mxu0 %v1674_v63  ;;  %2157 = vmatpush1.bf16.msra.mxu1 %v1676_v0  ;;  %v1730_v63 = vld [vmem:[#allocation4 + $0x380] sm:$0xff]  ;;  %v1732_v0 = vld [vmem:[#allocation4 + $0x390] sm:$0xff] }
 0x4af   :  { %2076 = vmatprep.subr.bf16.mxu0 %v1679_v1  ;;  %2158 = vmatprep.subr.bf16.mxu1 %v1681_v2  ;;  %v1735_v1 = vld [vmem:[#allocation4 + $0x3a8] sm:$0xff]  ;;  %v1737_v2 = vld [vmem:[#allocation4 + $0x3b8] sm:$0xff] }
 0x4b2   :  { %2077 = vmatpush1.bf16.msra.mxu0 %v1678_v3  ;;  %2159 = vmatpush1.bf16.msra.mxu1 %v1680_v42  ;;  %v1734_v3 = vld [vmem:[#allocation4 + $0x3a0] sm:$0xff]  ;;  %v1736_v42 = vld [vmem:[#allocation4 + $0x3b0] sm:$0xff] }
 0x4b3   :  { %2087 = vmatprep.subr.bf16.mxu0 %v1683_v25  ;;  %2169 = vmatprep.subr.bf16.mxu1 %v1685_v30  ;;  %v1739_v25 = vld [vmem:[#allocation4 + $0x3c8] sm:$0xff]  ;;  %v1741_v30 = vld [vmem:[#allocation4 + $0x3d8] sm:$0xff] }
 0x4b5   :  { %2079 = vmatmul.mubr.bf16.vlgmr.msra.gmra.mrb[12].mxu0 %v1874_v4  ;;  %2161 = vmatmul.mubr.bf16.vlgmr.msra.gmra.mrb[12].mxu1 %v1874_v4  ;;  %v1738_v4 = vld [vmem:[#allocation4 + $0x3c0] sm:$0xff] }
 0x4b6   :  { %2088 = vmatpush1.bf16.msra.mxu0 %v1682_v5  ;;  %2170 = vmatpush1.bf16.msra.mxu1 %v1684_v6  ;;  %v1740_v5 = vld [vmem:[#allocation4 + $0x3d0] sm:$0xff]  ;;  %v1743_v6 = vld [vmem:[#allocation4 + $0x3e8] sm:$0xff] }
 0x4b7   :  { %2089 = vmatprep.subr.bf16.mxu0 %v1687_v36  ;;  %2171 = vmatprep.subr.bf16.mxu1 %v1689_v44  ;;  %v1745_v36 = vld [vmem:[#allocation4 + $0x3f8] sm:$0xff]  ;;  %v1742_v44 = vld [vmem:[#allocation4 + $0x3e0] sm:$0xff] }
 0x4b8   :  { %2119 = vmatprep.mubr.bf16.mxu0 %v1877_v49  ;;  %2201 = vmatprep.mubr.bf16.mxu1 %v1877_v49  ;;  %v1744_v49 = vld [vmem:[#allocation4 + $0x3f0] sm:$0xff] }
 0x4ba   :  { %2090 = vmatpush1.bf16.msra.mxu0 %v1686_v7  ;;  %2172 = vmatpush1.bf16.msra.mxu1 %v1688_v8  ;;  %v1876_v7 = vpack.c.bf16 %v3689_v29, %v3689_v29  ;;  %v3057_v8 = vld [vmem:[#allocation10 + $0x40] sm:$0xff]   ;;  %v3065_v29 = vld [vmem:[#allocation10 + $0x50] sm:$0xff]  }
 0x4bb   :  { %2091 = vmatprep.subr.bf16.mxu0 %v1691_v20  ;;  %2173 = vmatprep.subr.bf16.mxu1 %v1693_v9  ;;  %v3058_v20 = vld [vmem:[#allocation10 + $0xc0] sm:$0xff]  }
 0x4bc   :  { %v3059_v9 = vld [vmem:[#allocation10] sm:$0xff]  }
 0x4be   :  { %2092 = vmatpush1.bf16.msra.mxu0 %v1690_v10  ;;  %2174 = vmatpush1.bf16.msra.mxu1 %v1692_v11  ;;  %v3060_v10 = vld [vmem:[#allocation10 + $0x80] sm:$0xff]   ;;  %v3061_v11 = vld [vmem:[#allocation10 + $0x48] sm:$0xff]  }
 0x4bf   :  { %2093 = vmatprep.subr.bf16.mxu0 %v1695_v12  ;;  %2175 = vmatprep.subr.bf16.mxu1 %v1697_v53  ;;  %v3062_v12 = vld [vmem:[#allocation10 + $0xc8] sm:$0xff]  }
 0x4c0   :  { %v3063_v53 = vld [vmem:[#allocation10 + $0x8] sm:$0xff]  }
 0x4c2   :  { %2094 = vmatpush1.bf16.msra.mxu0 %v1694_v27  ;;  %2176 = vmatpush1.bf16.msra.mxu1 %v1696_v21  ;;  %v3064_v27 = vld [vmem:[#allocation10 + $0x88] sm:$0xff]   ;;  %v3066_v21 = vld [vmem:[#allocation10 + $0xd0] sm:$0xff]  }
 0x4c3   :  { %2095 = vmatprep.subr.bf16.mxu0 %v1699_v37  ;;  %2177 = vmatprep.subr.bf16.mxu1 %v1701_v39  ;;  %v3067_v37 = vld [vmem:[#allocation10 + $0x10] sm:$0xff]  }
 0x4c4   :  { %v3068_v39 = vld [vmem:[#allocation10 + $0x90] sm:$0xff]  }
 0x4c6   :  { %2096 = vmatpush1.bf16.msra.mxu0 %v1698_v43  ;;  %2178 = vmatpush1.bf16.msra.mxu1 %v1700_v45  ;;  %v3069_v43 = vld [vmem:[#allocation10 + $0x58] sm:$0xff]  }
 0x4c7   :  { %2097 = vmatprep.subr.bf16.mxu0 %v1703_v48  ;;  %2179 = vmatprep.subr.bf16.mxu1 %v1705_v22  ;;  %v3070_v45 = vld [vmem:[#allocation10 + $0xd8] sm:$0xff]  }
 0x4c8   :  { %v3071_v48 = vld [vmem:[#allocation10 + $0x18] sm:$0xff]  }
 0x4c9   :  { %v3072_v22 = vld [vmem:[#allocation10 + $0x98] sm:$0xff]  }
 0x4ca   :  { %2098 = vmatpush1.bf16.msra.mxu0 %v1702_v13  ;;  %2180 = vmatpush1.bf16.msra.mxu1 %v1704_v33  ;;  %v3073_v13 = vld [vmem:[#allocation10 + $0x60] sm:$0xff]  }
 0x4cb   :  { %2099 = vmatprep.subr.bf16.mxu0 %v1707_v17  ;;  %2181 = vmatprep.subr.bf16.mxu1 %v1709_v40  ;;  %v3074_v33 = vld [vmem:[#allocation10 + $0xe0] sm:$0xff]  }
 0x4cc   :  { %v3075_v17 = vld [vmem:[#allocation10 + $0x20] sm:$0xff]  }
 0x4cd   :  { %v3076_v40 = vld [vmem:[#allocation10 + $0xa0] sm:$0xff]  }
 0x4ce   :  { %2100 = vmatpush1.bf16.msra.mxu0 %v1706_v14  ;;  %2182 = vmatpush1.bf16.msra.mxu1 %v1708_v34  ;;  %v3077_v14 = vld [vmem:[#allocation10 + $0x68] sm:$0xff]  }
 0x4cf   :  { %2101 = vmatprep.subr.bf16.mxu0 %v1711_v26  ;;  %2183 = vmatprep.subr.bf16.mxu1 %v1713_v18  ;;  %v3078_v34 = vld [vmem:[#allocation10 + $0xe8] sm:$0xff]  }
 0x4d0   :  { %v3079_v26 = vld [vmem:[#allocation10 + $0x28] sm:$0xff]  }
 0x4d1   :  { %v3080_v18 = vld [vmem:[#allocation10 + $0xa8] sm:$0xff]  }
 0x4d2   :  { %2102 = vmatpush1.bf16.msra.mxu0 %v1710_v31  ;;  %2184 = vmatpush1.bf16.msra.mxu1 %v1712_v51  ;;  %v3081_v31 = vld [vmem:[#allocation10 + $0x70] sm:$0xff]  }
 0x4d3   :  { %2103 = vmatprep.subr.bf16.mxu0 %v1715_v54  ;;  %2185 = vmatprep.subr.bf16.mxu1 %v1717_v41  ;;  %v3082_v51 = vld [vmem:[#allocation10 + $0xf0] sm:$0xff]  }
 0x4d4   :  { %v3083_v54 = vld [vmem:[#allocation10 + $0x30] sm:$0xff]  }
 0x4d5   :  { %v3084_v41 = vld [vmem:[#allocation10 + $0xb0] sm:$0xff]  }
 0x4d6   :  { %2104 = vmatpush1.bf16.msra.mxu0 %v1714_v32  ;;  %2186 = vmatpush1.bf16.msra.mxu1 %v1716_v15  ;;  %v3085_v32 = vld [vmem:[#allocation10 + $0x78] sm:$0xff]  }
 0x4d7   :  { %2105 = vmatprep.subr.bf16.mxu0 %v1719_v38  ;;  %2187 = vmatprep.subr.bf16.mxu1 %v1721_v56  ;;  %v3086_v15 = vld [vmem:[#allocation10 + $0xf8] sm:$0xff]  }
 0x4d8   :  { %v3087_v38 = vld [vmem:[#allocation10 + $0x38] sm:$0xff]  }
 0x4d9   :  { %v3088_v56 = vld [vmem:[#allocation10 + $0xb8] sm:$0xff]  }
 0x4da   :  { %2106 = vmatpush1.bf16.msra.mxu0 %v1718_v35  ;;  %2188 = vmatpush1.bf16.msra.mxu1 %v1720_v19 }
 0x4db   :  { %2107 = vmatprep.subr.bf16.mxu0 %v1723_v24  ;;  %2189 = vmatprep.subr.bf16.mxu1 %v1725_v16 }
 0x4de   :  { %2108 = vmatpush1.bf16.msra.mxu0 %v1722_v52  ;;  %2190 = vmatpush1.bf16.msra.mxu1 %v1724_v46 }
 0x4df   :  { %2109 = vmatprep.subr.bf16.mxu0 %v1727_v55  ;;  %2191 = vmatprep.subr.bf16.mxu1 %v1729_v58 }
 0x4e2   :  { %2110 = vmatpush1.bf16.msra.mxu0 %v1726_v23  ;;  %2192 = vmatpush1.bf16.msra.mxu1 %v1728_v47 }
 0x4e3   :  { %2111 = vmatprep.subr.bf16.mxu0 %v1731_v62  ;;  %2193 = vmatprep.subr.bf16.mxu1 %v1733_v28 }
 0x4e6   :  { %2112 = vmatpush1.bf16.msra.mxu0 %v1730_v63  ;;  %2194 = vmatpush1.bf16.msra.mxu1 %v1732_v0 }
 0x4e7   :  { %2113 = vmatprep.subr.bf16.mxu0 %v1735_v1  ;;  %2195 = vmatprep.subr.bf16.mxu1 %v1737_v2 }
 0x4ea   :  { %2114 = vmatpush1.bf16.msra.mxu0 %v1734_v3  ;;  %2196 = vmatpush1.bf16.msra.mxu1 %v1736_v42 }
 0x4eb   :  { %2115 = vmatprep.subr.bf16.mxu0 %v1739_v25  ;;  %2197 = vmatprep.subr.bf16.mxu1 %v1741_v30 }
 0x4ee   :  { %2116 = vmatpush1.bf16.msra.mxu0 %v1738_v4  ;;  %2198 = vmatpush1.bf16.msra.mxu1 %v1740_v5 }
 0x4ef   :  { %2117 = vmatprep.subr.bf16.mxu0 %v1743_v6  ;;  %2199 = vmatprep.subr.bf16.mxu1 %v1745_v36 }
 0x4f2   :  { %2118 = vmatpush1.bf16.msra.mxu0 %v1742_v44  ;;  %2200 = vmatpush1.bf16.msra.mxu1 %v1744_v49 }
 0x4f3   :  { %2832 = vmatprep.subr.bf16.mxu0 %v3057_v8  ;;  %2854 = vmatprep.subr.bf16.mxu1 %v3058_v20 }
 0x4f5   :  { %2120 = vmatmul.mubr.bf16.vlgmr.msra.gmra.mrb[12].mxu0 %v1876_v7  ;;  %2202 = vmatmul.mubr.bf16.vlgmr.msra.gmra.mrb[12].mxu1 %v1876_v7 }
 0x4f6   :  { %2833 = vmatpush3.bf16.msra.mxu0 %v3059_v9  ;;  %2855 = vmatpush3.bf16.msra.mxu1 %v3060_v10 }
 0x4f7   :  { %2834 = vmatprep.subr.bf16.mxu0 %v3061_v11  ;;  %2856 = vmatprep.subr.bf16.mxu1 %v3062_v12 }
 0x4fa   :  { %2835 = vmatpush3.bf16.msra.mxu0 %v3063_v53  ;;  %2857 = vmatpush3.bf16.msra.mxu1 %v3064_v27 }
 0x4fb   :  { %2836 = vmatprep.subr.bf16.mxu0 %v3065_v29  ;;  %2858 = vmatprep.subr.bf16.mxu1 %v3066_v21 }
 0x4fe   :  { %2837 = vmatpush3.bf16.msra.mxu0 %v3067_v37  ;;  %2859 = vmatpush3.bf16.msra.mxu1 %v3068_v39 }
 0x4ff   :  { %2838 = vmatprep.subr.bf16.mxu0 %v3069_v43  ;;  %2860 = vmatprep.subr.bf16.mxu1 %v3070_v45 }
 0x502   :  { %2839 = vmatpush3.bf16.msra.mxu0 %v3071_v48  ;;  %2861 = vmatpush3.bf16.msra.mxu1 %v3072_v22 }
 0x503   :  { %2840 = vmatprep.subr.bf16.mxu0 %v3073_v13  ;;  %2862 = vmatprep.subr.bf16.mxu1 %v3074_v33 }
 0x506   :  { %2841 = vmatpush3.bf16.msra.mxu0 %v3075_v17  ;;  %2863 = vmatpush3.bf16.msra.mxu1 %v3076_v40 }
 0x507   :  { %2842 = vmatprep.subr.bf16.mxu0 %v3077_v14  ;;  %2864 = vmatprep.subr.bf16.mxu1 %v3078_v34 }
 0x50a   :  { %2843 = vmatpush3.bf16.msra.mxu0 %v3079_v26  ;;  %2865 = vmatpush3.bf16.msra.mxu1 %v3080_v18 }
 0x50b   :  { %2844 = vmatprep.subr.bf16.mxu0 %v3081_v31  ;;  %2866 = vmatprep.subr.bf16.mxu1 %v3082_v51 }
 0x50e   :  { %2845 = vmatpush3.bf16.msra.mxu0 %v3083_v54  ;;  %2867 = vmatpush3.bf16.msra.mxu1 %v3084_v41 }
 0x50f   :  { %2846 = vmatprep.subr.bf16.mxu0 %v3085_v32  ;;  %2868 = vmatprep.subr.bf16.mxu1 %v3086_v15 }
 0x512   :  { %2847 = vmatpush3.bf16.msra.mxu0 %v3087_v38  ;;  %2869 = vmatpush3.bf16.msra.mxu1 %v3088_v56 }
 0x5c8   :  { %v2121_v35 = vpop.f32.mrb[12].mxu0  ;;  %v2203_v19 = vpop.f32.mrb[12].mxu1 }
 0x5c9   :  { %v2212_v24 = vrot.slane %v2121_v35, 4  ;;  %v2224_v16 = vrot.slane %v2203_v19, 4  ;;  %v2123_v52 = vpop.f32.mrb[13].mxu0  ;;  %v2205_v46 = vpop.f32.mrb[13].mxu1 }
 0x5ca   :  { %v2218_v55 = vrot.slane %v2123_v52, 4  ;;  %v2230_v58 = vrot.slane %v2205_v46, 4  ;;  %v2125_v23 = vpop.f32.mrb[14].mxu0  ;;  %v2207_v47 = vpop.f32.mrb[14].mxu1 }
 0x5cb   :  { %v2213_v62 = vadd.f32 %v2212_v24, %v2121_v35  ;;  %v2225_v28 = vadd.f32 %v2224_v16, %v2203_v19  ;;  %v2126_v63 = vpop.f32.mrb[15].mxu0  ;;  %v2208_v0 = vpop.f32.mrb[15].mxu1 }
 0x5cc   :  { %v2219_v1 = vadd.f32 %v2218_v55, %v2123_v52  ;;  %v2231_v2 = vadd.f32 %v2230_v58, %v2205_v46 }
 0x5cd   :  { %v2214_v3 = vrot.slane %v2213_v62, 2  ;;  %v2226_v42 = vrot.slane %v2225_v28, 2 }
 0x5ce   :  { %v2220_v25 = vrot.slane %v2219_v1, 2  ;;  %v2232_v30 = vrot.slane %v2231_v2, 2 }
 0x5cf   :  { %v2215_v4 = vadd.f32 %v2214_v3, %v2213_v62  ;;  %v2227_v5 = vadd.f32 %v2226_v42, %v2225_v28 }
 0x5d0   :  { %v2221_v6 = vadd.f32 %v2220_v25, %v2219_v1  ;;  %v2233_v36 = vadd.f32 %v2232_v30, %v2231_v2 }
 0x5d1   :  { %v2216_v44 = vrot.slane %v2215_v4, 1  ;;  %v2228_v49 = vrot.slane %v2227_v5, 1 }
 0x5d2   :  { %v2222_v7 = vrot.slane %v2221_v6, 1  ;;  %v2234_v8 = vrot.slane %v2233_v36, 1 }
 0x5d3   :  { %v2217_v20 = vadd.f32 %v2216_v44, %v2215_v4  ;;  %v2229_v9 = vadd.f32 %v2228_v49, %v2227_v5 }
 0x5d4   :  { %v2223_v10 = vadd.f32 %v2222_v7, %v2221_v6  ;;  %v2235_v11 = vadd.f32 %v2234_v8, %v2233_v36  ;;  %v2210_v7 = vld [vmem:[%s3768_s11] sm:$0xf]  ;;  %s3231_s11 = smov [#allocation13]  }
 0x5d5   :  { %v2236_v12 = vmul.f32 0.125, %v2217_v20  ;;  %v2238_v53 = vmul.f32 0.125, %v2229_v9  ;;  %v2211_v20 = vld [vmem:[%s3769_s12] sm:$0xf]  ;;  %s2722_s12 = sshll.u32 %s3231_s11, 4  ;;  %s2723_s12 = int_to_ptr.vmem [resolvable:$true] %s2722_s12 }
 0x5d6   :  { %v2237_v27 = vmul.f32 0.125, %v2223_v10  ;;  %v2239_v29 = vmul.f32 0.125, %v2235_v11  ;;  %v2347_v10 = vrot.slane %v2211_v20, %v3553_v59  ;;  %v2355_v11 = vrot.slane %v2211_v20, %v3557_v61  ;;  %s3171_s30 = scalar_lea.vmem %s2723_s12, 128  ;;  %p3176_p11 = scmp.lt.s32.totalorder %s2723_s12, %s2723_s12 }
 0x5d7   :  { %v3713_v21 = vsub.f32 %v2121_v35, %v2236_v12  ;;  %v3715_v37 = vsub.f32 %v2203_v19, %v2238_v53  ;;  %v2343_v12 = vrot.slane %v2211_v20, %v3550_v57  ;;  %p3172_p10 = scmp.ne.s32.totalorder %s2723_s12, %s3171_s30  ;;  %p3177_p12 = scmp.lt.s32.totalorder %s3171_s30, %s3171_s30 }
 0x5d8   :  { %v3717_v39 = vsub.f32 %v2123_v52, %v2237_v27  ;;  %v2243_v43 = vsub.f32 %v2205_v46, %v2239_v29 }
 0x5d9   :  { %v2244_v45 = vmul.f32 %v3713_v21, %v3713_v21  ;;  %v2246_v48 = vmul.f32 %v3715_v37, %v3715_v37  ;;  %p3178_p13 = por %p3177_p12, %p3176_p11 }
 0x5da   :  { %v2245_v22 = vmul.f32 %v3717_v39, %v3717_v39  ;;  %v2247_v13 = vmul.f32 %v2243_v43, %v2243_v43 }
 0x5db   :  { %v2248_v33 = vrot.slane %v2244_v45, 4  ;;  %v2260_v17 = vrot.slane %v2246_v48, 4  ;;  %p3179_p0 = pnand %p3178_p13, %p3172_p10 }
 0x5dc   :  { %v2254_v40 = vrot.slane %v2245_v22, 4  ;;  %v2266_v14 = vrot.slane %v2247_v13, 4 }
 0x5dd   :  { %v2249_v34 = vadd.f32 %v2248_v33, %v2244_v45  ;;  %v2261_v26 = vadd.f32 %v2260_v17, %v2246_v48 }
 0x5de   :  { %v2255_v18 = vadd.f32 %v2254_v40, %v2245_v22  ;;  %v2267_v31 = vadd.f32 %v2266_v14, %v2247_v13 }
 0x5df   :  { %v2250_v51 = vrot.slane %v2249_v34, 2  ;;  %v2262_v54 = vrot.slane %v2261_v26, 2 }
 0x5e0   :  { %v2256_v41 = vrot.slane %v2255_v18, 2  ;;  %v2268_v32 = vrot.slane %v2267_v31, 2 }
 0x5e1   :  { %v2251_v15 = vadd.f32 %v2250_v51, %v2249_v34  ;;  %v2263_v38 = vadd.f32 %v2262_v54, %v2261_v26 }
 0x5e2   :  { %v2257_v56 = vadd.f32 %v2256_v41, %v2255_v18  ;;  %v2269_v35 = vadd.f32 %v2268_v32, %v2267_v31  ;;  %v2795_v31 = vld [vmem:[#allocation12] ss:$0 sm:$0xff] }
 0x5e3   :  { %v2252_v19 = vrot.slane %v2251_v15, 1  ;;  %v2264_v24 = vrot.slane %v2263_v38, 1 }
 0x5e4   :  { %v2258_v16 = vrot.slane %v2257_v56, 1  ;;  %v2270_v52 = vrot.slane %v2269_v35, 1 }
 0x5e5   :  { %v2253_v46 = vadd.f32 %v2252_v19, %v2251_v15  ;;  %v2265_v55 = vadd.f32 %v2264_v24, %v2263_v38 }
 0x5e6   :  { %v2259_v58 = vadd.f32 %v2258_v16, %v2257_v56  ;;  %v2271_v23 = vadd.f32 %v2270_v52, %v2269_v35 }
 0x5e7   :  { %v2272_v47 = vmul.f32 0.14285715, %v2253_v46  ;;  %v2274_v62 = vmul.f32 0.14285715, %v2265_v55 }
 0x5e8   :  { %v2273_v28 = vmul.f32 0.14285715, %v2259_v58  ;;  %v2275_v63 = vmul.f32 0.14285715, %v2271_v23 }
 0x5e9   :  { %v2276_v0 = vadd.f32 1e-05, %v2272_v47  ;;  %v2278_v1 = vadd.f32 1e-05, %v2274_v62 }
 0x5ea   :  { %v2277_v2 = vadd.f32 1e-05, %v2273_v28  ;;  %v2279_v3 = vadd.f32 1e-05, %v2275_v63 }
 0x5eb   :  { %3089 = vrsqrt.f32 %v2276_v0 }
 0x5ec   :  { %3091 = vrsqrt.f32 %v2278_v1 }
 0x5ed   :  { %3093 = vrsqrt.f32 %v2277_v2 }
 0x5ee   :  { %3095 = vrsqrt.f32 %v2279_v3 }
 0x5f5   :  { %v3090_v42 = vpop.eup %3089 }
 0x5f6   :  { %v3092_v25 = vpop.eup %3091 }
 0x5f7   :  { %v3094_v30 = vpop.eup %3093 }
 0x5f8   :  { %v3096_v4 = vpop.eup %3095  ;;  %v2288_v5 = vcombine.low %v3090_v42, %v3094_v30 }
 0x5f9   :  { %v2289_v6 = vcombine.low %v3092_v25, %v3096_v4 }
 0x5fa   :  { %v2296_v36 = vrot.slane %v2288_v5, %v3543_v50 }
 0x5fb   :  { %v2303_v44 = vrot.slane %v2289_v6, %v3543_v50 }
 0x5fd   :  { %v2304_v49 = vcombine.low %v2296_v36, %v2303_v44 }
 0x5ff   :  { %v2311_v8 = vrot.slane %v2304_v49, %v3543_v50  ;;  %v2351_v50 = vrot.slane %v2211_v20, %v3555_v60 }
 0x601   :  { %v2313_v9 = vmul.f32 %v2311_v8, %v2210_v7 }
 0x603   :  { %v2330_v53 = vrot.slane %v2313_v9, %v3557_v61  ;;  %v2322_v27 = vrot.slane %v2313_v9, %v3553_v59  ;;  %v2318_v29 = vrot.slane %v2313_v9, %v3550_v57  ;;  %v2326_v45 = vrot.slane %v2313_v9, %v3555_v60 }
 0x605   :  { %v2338_v48 = vmul.f32 %v2330_v53, %v2243_v43  ;;  %v2336_v22 = vmul.f32 %v2322_v27, %v3717_v39  ;;  %v2335_v13 = vmul.f32 %v2318_v29, %v3713_v21  ;;  %v2337_v33 = vmul.f32 %v2326_v45, %v3715_v37 }
 0x607   :  { %v2361_v17 = vadd.f32 %v2347_v10, %v2336_v22  ;;  %v2363_v40 = vadd.f32 %v2355_v11, %v2338_v48  ;;  %v2360_v14 = vadd.f32 %v2343_v12, %v2335_v13  ;;  %v2362_v34 = vadd.f32 %v2351_v50, %v2337_v33 }
 0x609   :  { %3097 = vtanh.f32 %v2361_v17 }
 0x60a   :  { %3099 = vtanh.f32 %v2363_v40 }
 0x60b   :  { %3101 = vtanh.f32 %v2360_v14 }
 0x60c   :  { %3103 = vtanh.f32 %v2362_v34 }
 0x613   :  { %v3098_v57 = vpop.eup %3097 }
 0x614   :  { %v3100_v59 = vpop.eup %3099  ;;  %v2369_v61 = vpack.c.bf16 %v3098_v57, %v3098_v57 }
 0x615   :  { %v3102_v26 = vpop.eup %3101  ;;  %v2371_v60 = vpack.c.bf16 %v3100_v59, %v3100_v59 }
 0x616   :  { %v3104_v43 = vpop.eup %3103  ;;  %2667 = vmatprep.mubr.bf16.mxu0 %v2369_v61  ;;  %v2368_v39 = vpack.c.bf16 %v3102_v26, %v3102_v26 }
 0x617   :  { %2707 = vmatprep.mubr.bf16.mxu1 %v2371_v60  ;;  %v2370_v21 = vpack.c.bf16 %v3104_v43, %v3104_v43 }
 0x618   :  { %2668 = vmatmul.mubr.bf16.vlgmr.msra.gmra.mrb[16].mxu0 %v2368_v39 }
 0x619   :  { %2708 = vmatmul.mubr.bf16.vlgmr.msra.gmra.mrb[16].mxu1 %v2370_v21 }
 0x6eb   :  { %v2848_v37 = vpop.f32.mrb[16].mxu0 }
 0x6ec   :  { %v2870_v18 = vpop.f32.mrb[16].mxu1  ;;  %v2849_v51 = vpop.f32.mrb[17].mxu0 }
 0x6ed   :  { %v2850_v54 = vadd.f32 %v2849_v51, %v2848_v37  ;;  %v2871_v41 = vpop.f32.mrb[17].mxu1  ;;  %v2851_v32 = vpop.f32.mrb[18].mxu0 }
 0x6ee   :  { %v2872_v15 = vadd.f32 %v2871_v41, %v2870_v18  ;;  %v2873_v38 = vpop.f32.mrb[18].mxu1  ;;  %v2852_v56 = vpop.f32.mrb[19].mxu0 }
 0x6ef   :  { %v2670_v35 = vadd.f32 %v2850_v54, %v2795_v31  ;;  %v2874_v19 = vpop.f32.mrb[19].mxu1 }
 0x6f1   :  { %v2710_v24 = vadd.f32 %v2872_v15, %v2670_v35 }
 0x6f3   :  { %2715 = vst [vmem:[#allocation13] sm:$0xff] %v2710_v24 }
 0x6f4   :  { %3182 = shalt.err (!%p3179_p0)
}
 0x6f5   :  { %s3183_s20 = scalar_lea.hbm %s3772_s15, 128 }
 0x6f6   :  { %p3184_p1 = scmp.ne.s32.totalorder %s3772_s15, %s3183_s20  ;;  %p3187_p2 = scmp.lt.u32.totalorder %s3183_s20, %s3772_s15 }
 0x6f8   :  { %p3189_p3 = pnand %p3187_p2, %p3184_p1 }
 0x6fa   :  { %3192 = shalt.err (!%p3189_p3)
}
 0x6fb   :  { %2725 = dma.vmem_to_hbm [thread:$0]  %s2723_s12, 128, %s3772_s15, [#allocation9]  }
 0x6fc   :  { %3205 = dma.done.wait [#allocation9], 128  }
 0x6fd   :  { %3206 = vsyncadd [#allocation9], 4294967168 }
 0x6fe   :  { %2729 = vsyncpa [#allocation8], 1 }
 0x6ff   :  { %2730 = vsyncpa [#allocation11], 1 }
 0x700   :  { %2731 = vsyncpa [#allocation9], 1 }
 0x701   :  { %2732 = vsyncmov [#allocation6] }
 0x704   :  { %s2733_s9 = vpop.sfrf %2732 }
 0x705   :  { %p2828_p4 = scmp.ne.s32.totalorder %s2733_s9, 0 }
 0x707   :  { %2737 = shalt.err (%p2828_p4)  }
 0x708   :  { %2739 = vsyncmov [#allocation6 + $0x1] }
 0x70b   :  { %s2740_s18 = vpop.sfrf %2739 }
 0x70c   :  { %p2829_p5 = scmp.ne.s32.totalorder %s2740_s18, 0 }
 0x70e   :  { %2744 = shalt.err (%p2829_p5)  }
 0x70f   :  { %2746 = vsyncmov [#allocation6 + $0x2] }
 0x712   :  { %s2747_s1 = vpop.sfrf %2746 }
 0x713   :  { %p2830_p6 = scmp.ne.s32.totalorder %s2747_s1, 0 }
 0x715   :  { %2751 = shalt.err (%p2830_p6)  }
 0x716   :  { %2753 = vsyncmov [#allocation6 + $0x3] }
 0x719   :  { %s2754_s16 = vpop.sfrf %2753 }
 0x71a   :  { %p2831_p7 = scmp.ne.s32.totalorder %s2754_s16, 0 }
 0x71c   :  { %2758 = shalt.err (%p2831_p7)  }

</bundles_post_ra>
